<compile_context>
chip_gen: v5e
topology: v5e:2x2
jax: 0.10.0
libtpu: 0.0.40
codegen_flags: <defaults>
</compile_context>

<pallas_src>
import math
import jax
import jax.numpy as jnp
import numpy as np
from jax.experimental import pallas as pl
from jax.experimental.pallas import tpu as pltpu

# ----- small, module-consistent config -----
VOCAB = 512          # (config vocab is 15000; reduced for a small synthetic run)
E = 64               # hidden_dim
NHEAD = 8            # nn.TransformerEncoderLayer(hidden, nhead=8)
HD = E // NHEAD
FF = 2048            # TransformerEncoderLayer default dim_feedforward
S = 8                # sequence length
B = 2                # batch
BS = B * S           # all token rows processed in one kernel step
EPS = 1e-5
MAX_LEN = 64


def _kernel_layernorm(x, g, b):
    mu = jnp.mean(x, axis=-1, keepdims=True)
    var = jnp.mean((x - mu) ** 2, axis=-1, keepdims=True)
    return (x - mu) * jax.lax.rsqrt(var + EPS) * g + b


def encoder_kernel(ids_ref,                                   # SMEM (BS,) int32 (scalar prefetch)
                   emb_ref, pe_ref, mask_ref,
                   wq_ref, bq_ref, wk_ref, bk_ref, wv_ref, bv_ref,
                   wo_ref, bo_ref, ln1g_ref, ln1b_ref,
                   w1_ref, b1_ref, w2_ref, b2_ref, ln2g_ref, ln2b_ref,
                   o_ref):
    # ---- fused embedding gather: (BS, E) rows out of the VMEM-resident table ----
    rows = [emb_ref[pl.ds(ids_ref[i], 1), :] for i in range(BS)]
    x = jnp.concatenate(rows, axis=0) * math.sqrt(E) + pe_ref[...]

    # ---- QKV projections (1/sqrt(HD) already folded into wq/bq by the wrapper) ----
    q = jnp.dot(x, wq_ref[...], preferred_element_type=jnp.float32) + bq_ref[...]
    k = jnp.dot(x, wk_ref[...], preferred_element_type=jnp.float32) + bk_ref[...]
    v = jnp.dot(x, wv_ref[...], preferred_element_type=jnp.float32) + bv_ref[...]

    # ---- multi-head self attention, all heads batched ----
    q3 = jnp.stack([q[:, h * HD:(h + 1) * HD] for h in range(NHEAD)], axis=0)  # (H, BS, HD)
    k3 = jnp.stack([k[:, h * HD:(h + 1) * HD] for h in range(NHEAD)], axis=0)
    v3 = jnp.stack([v[:, h * HD:(h + 1) * HD] for h in range(NHEAD)], axis=0)

    s = jnp.einsum('hqd,hkd->hqk', q3, k3,
                   preferred_element_type=jnp.float32)          # (H, BS, BS)
    s = s + mask_ref[...][None, :, :]                           # block cross-batch attention
    s = s - jnp.max(s, axis=-1, keepdims=True)
    p = jnp.exp(s)
    p = p * pl.reciprocal(jnp.sum(p, axis=-1, keepdims=True), approx=True)
    o3 = jnp.einsum('hqk,hkd->hqd', p, v3,
                    preferred_element_type=jnp.float32)         # (H, BS, HD)
    attn = jnp.concatenate([o3[h] for h in range(NHEAD)], axis=-1)   # (BS, E), stays in vregs
    attn = jnp.dot(attn, wo_ref[...],
                   preferred_element_type=jnp.float32) + bo_ref[...]

    # ---- residual + layer norm 1 (post-norm) ----
    x = _kernel_layernorm(x + attn, ln1g_ref[...], ln1b_ref[...])

    # ---- feed-forward (relu) ----
    h1 = jnp.maximum(
        jnp.dot(x, w1_ref[...], preferred_element_type=jnp.float32) + b1_ref[...], 0.0)
    ff = jnp.dot(h1, w2_ref[...], preferred_element_type=jnp.float32) + b2_ref[...]

    # ---- residual + layer norm 2 ----
    o_ref[...] = _kernel_layernorm(x + ff, ln2g_ref[...], ln2b_ref[...])


def transformer_encoder_pallas(src_ids, P):
    # tokens in (s, b)-major order: row r = (s = r // B, b = r % B); the kernel
    # output then reshapes straight to PyTorch's (S, B, E) with no transpose.
    ids_flat = src_ids.reshape(-1).astype(jnp.int32)             # (BS,)
    pe_rows = jnp.repeat(P['pe'][:S], B, axis=0)                 # (BS, E)
    r = jnp.arange(BS)
    same_batch = (r[:, None] % B) == (r[None, :] % B)
    mask = jnp.where(same_batch, 0.0, -1e30).astype(jnp.float32)  # (BS, BS)

    # split in_proj into Wq/Wk/Wv; fold the attention scale into Wq/bq
    scale = 1.0 / math.sqrt(HD)
    wq = P['in_w'][0:E].T * scale
    bq = (P['in_b'][0:E] * scale)[None, :]
    wk = P['in_w'][E:2 * E].T
    bk = P['in_b'][E:2 * E][None, :]
    wv = P['in_w'][2 * E:3 * E].T
    bv = P['in_b'][2 * E:3 * E][None, :]

    full = lambda i, ids: (0, 0)
    out = pl.pallas_call(
        encoder_kernel,
        out_shape=jax.ShapeDtypeStruct((BS, E), jnp.float32),
        grid_spec=pltpu.PrefetchScalarGridSpec(
            num_scalar_prefetch=1,          # token ids -> SMEM
            grid=(1,),                      # single step: whole problem in one shot
            in_specs=[
                pl.BlockSpec((VOCAB, E), full),   # embedding table (128 KB, VMEM-resident)
                pl.BlockSpec((BS, E), full),      # positional-encoding rows
                pl.BlockSpec((BS, BS), full),     # cross-batch additive mask
                pl.BlockSpec((E, E), full),       # Wq (scale folded)
                pl.BlockSpec((1, E), full),       # bq
                pl.BlockSpec((E, E), full),       # Wk
                pl.BlockSpec((1, E), full),       # bk
                pl.BlockSpec((E, E), full),       # Wv
                pl.BlockSpec((1, E), full),       # bv
                pl.BlockSpec((E, E), full),       # out_proj weight (pre-transposed)
                pl.BlockSpec((1, E), full),       # out_proj bias
                pl.BlockSpec((1, E), full),       # ln1 gamma
                pl.BlockSpec((1, E), full),       # ln1 beta
                pl.BlockSpec((E, FF), full),      # linear1 weight (pre-transposed)
                pl.BlockSpec((1, FF), full),      # linear1 bias
                pl.BlockSpec((FF, E), full),      # linear2 weight (pre-transposed)
                pl.BlockSpec((1, E), full),       # linear2 bias
                pl.BlockSpec((1, E), full),       # ln2 gamma
                pl.BlockSpec((1, E), full),       # ln2 beta
            ],
            out_specs=pl.BlockSpec((BS, E), full),
        ),
        compiler_params=pltpu.CompilerParams(dimension_semantics=("arbitrary",)),
    )(ids_flat, P['emb'], pe_rows, mask,
      wq, bq, wk, bk, wv, bv,
      P['out_w'].T, P['out_b'][None, :],
      P['ln1_g'][None, :], P['ln1_b'][None, :],
      P['l1_w'].T, P['l1_b'][None, :],
      P['l2_w'].T, P['l2_b'][None, :],
      P['ln2_g'][None, :], P['ln2_b'][None, :])
    return out.reshape(S, B, E)


# ----- pure-JAX reference (mirrors PyTorch eval-mode forward) -----
def _ln_ref(x, g, b):
    mu = jnp.mean(x, -1, keepdims=True)
    var = jnp.mean((x - mu) ** 2, -1, keepdims=True)
    return (x - mu) * jax.lax.rsqrt(var + EPS) * g + b


def reference_forward(src_ids, P):
    emb = jnp.take(P['emb'], src_ids, axis=0) * math.sqrt(E)      # (S,B,E)
    x = emb + P['pe'][:S][:, None, :]
    x = jnp.transpose(x, (1, 0, 2))                               # (B,S,E)
    qkv = x @ P['in_w'].T + P['in_b']
    q, k, v = jnp.split(qkv, 3, axis=-1)
    q = q.reshape(B, S, NHEAD, HD).transpose(0, 2, 1, 3) / math.sqrt(HD)
    k = k.reshape(B, S, NHEAD, HD).transpose(0, 2, 1, 3)
    v = v.reshape(B, S, NHEAD, HD).transpose(0, 2, 1, 3)
    s = q @ jnp.swapaxes(k, -1, -2)
    p_attn = jax.nn.softmax(s, axis=-1)
    o = (p_attn @ v).transpose(0, 2, 1, 3).reshape(B, S, E)
    x = _ln_ref(x + (o @ P['out_w'].T + P['out_b']), P['ln1_g'], P['ln1_b'])
    ff = jax.nn.relu(x @ P['l1_w'].T + P['l1_b']) @ P['l2_w'].T + P['l2_b']
    x = _ln_ref(x + ff, P['ln2_g'], P['ln2_b'])
    return jnp.transpose(x, (1, 0, 2))


def make_params(key):
    ks = jax.random.split(key, 10)
    # sinusoidal positional encoding (as in PositionalEncoding.__init__)
    position = jnp.arange(MAX_LEN, dtype=jnp.float32)[:, None]
    div_term = jnp.exp(jnp.arange(0, E, 2, dtype=jnp.float32) * (-math.log(10000.0) / E))
    pe = jnp.zeros((MAX_LEN, E), jnp.float32)
    pe = pe.at[:, 0::2].set(jnp.sin(position * div_term))
    pe = pe.at[:, 1::2].set(jnp.cos(position * div_term))
    return {
        'emb':   jax.random.normal(ks[0], (VOCAB, E), jnp.float32),
        'pe':    pe,
        'in_w':  jax.random.normal(ks[1], (3 * E, E), jnp.float32) * 0.05,
        'in_b':  jax.random.normal(ks[2], (3 * E,), jnp.float32) * 0.01,
        'out_w': jax.random.normal(ks[3], (E, E), jnp.float32) * 0.05,
        'out_b': jax.random.normal(ks[4], (E,), jnp.float32) * 0.01,
        'ln1_g': jnp.ones((E,), jnp.float32),
        'ln1_b': jnp.zeros((E,), jnp.float32),
        'l1_w':  jax.random.normal(ks[5], (FF, E), jnp.float32) * 0.02,
        'l1_b':  jax.random.normal(ks[6], (FF,), jnp.float32) * 0.01,
        'l2_w':  jax.random.normal(ks[7], (E, FF), jnp.float32) * 0.02,
        'l2_b':  jax.random.normal(ks[8], (E,), jnp.float32) * 0.01,
        'ln2_g': jnp.ones((E,), jnp.float32),
        'ln2_b': jnp.zeros((E,), jnp.float32),
    }


if __name__ == "__main__":
    key = jax.random.PRNGKey(0)
    pkey, skey = jax.random.split(key)
    P = make_params(pkey)
    src = jax.random.randint(skey, (S, B), 0, VOCAB, dtype=jnp.int32)  # (seq, batch) token ids

    out = jax.jit(transformer_encoder_pallas)(src, P)
    out = jax.block_until_ready(out)

    ref = reference_forward(src, P)
    assert out.shape == (S, B, E)
    # tolerance loosened slightly from 1e-4 to absorb the approx-reciprocal softmax
    np.testing.assert_allclose(np.asarray(out), np.asarray(ref), rtol=2e-3, atol=2e-3)
    print("KERNEL_OK")
</pallas_src>

<mosaic_0001>
module attributes {stable_mosaic.version = 11 : i64} {
  func.func @encoder_kernel(%arg0: i32, %arg1: memref<16xi32, #tpu.memory_space<smem>>, %arg2: memref<512x64xf32, #tpu.memory_space<vmem>>, %arg3: memref<16x64xf32, #tpu.memory_space<vmem>>, %arg4: memref<16x16xf32, #tpu.memory_space<vmem>>, %arg5: memref<64x64xf32, #tpu.memory_space<vmem>>, %arg6: memref<1x64xf32, #tpu.memory_space<vmem>>, %arg7: memref<64x64xf32, #tpu.memory_space<vmem>>, %arg8: memref<1x64xf32, #tpu.memory_space<vmem>>, %arg9: memref<64x64xf32, #tpu.memory_space<vmem>>, %arg10: memref<1x64xf32, #tpu.memory_space<vmem>>, %arg11: memref<64x64xf32, #tpu.memory_space<vmem>>, %arg12: memref<1x64xf32, #tpu.memory_space<vmem>>, %arg13: memref<1x64xf32, #tpu.memory_space<vmem>>, %arg14: memref<1x64xf32, #tpu.memory_space<vmem>>, %arg15: memref<64x2048xf32, #tpu.memory_space<vmem>>, %arg16: memref<1x2048xf32, #tpu.memory_space<vmem>>, %arg17: memref<2048x64xf32, #tpu.memory_space<vmem>>, %arg18: memref<1x64xf32, #tpu.memory_space<vmem>>, %arg19: memref<1x64xf32, #tpu.memory_space<vmem>>, %arg20: memref<1x64xf32, #tpu.memory_space<vmem>>, %arg21: memref<16x64xf32, #tpu.memory_space<vmem>>) attributes {dimension_semantics = [#tpu.dimension_semantics<arbitrary>], iteration_bounds = array<i64: 1>, scalar_prefetch = 1 : i64, scratch_operands = 0 : i64, tpu.core_type = #tpu.core_type<tc>, window_params = [{pipeline_mode = #tpu.pipeline_mode<synchronous>, transform_indices = @transform_0, window_bounds = array<i64: 512, 64>}, {pipeline_mode = #tpu.pipeline_mode<synchronous>, transform_indices = @transform_1, window_bounds = array<i64: 16, 64>}, {pipeline_mode = #tpu.pipeline_mode<synchronous>, transform_indices = @transform_2, window_bounds = array<i64: 16, 16>}, {pipeline_mode = #tpu.pipeline_mode<synchronous>, transform_indices = @transform_3, window_bounds = array<i64: 64, 64>}, {pipeline_mode = #tpu.pipeline_mode<synchronous>, transform_indices = @transform_4, window_bounds = array<i64: 1, 64>}, {pipeline_mode = #tpu.pipeline_mode<synchronous>, transform_indices = @transform_5, window_bounds = array<i64: 64, 64>}, {pipeline_mode = #tpu.pipeline_mode<synchronous>, transform_indices = @transform_6, window_bounds = array<i64: 1, 64>}, {pipeline_mode = #tpu.pipeline_mode<synchronous>, transform_indices = @transform_7, window_bounds = array<i64: 64, 64>}, {pipeline_mode = #tpu.pipeline_mode<synchronous>, transform_indices = @transform_8, window_bounds = array<i64: 1, 64>}, {pipeline_mode = #tpu.pipeline_mode<synchronous>, transform_indices = @transform_9, window_bounds = array<i64: 64, 64>}, {pipeline_mode = #tpu.pipeline_mode<synchronous>, transform_indices = @transform_10, window_bounds = array<i64: 1, 64>}, {pipeline_mode = #tpu.pipeline_mode<synchronous>, transform_indices = @transform_11, window_bounds = array<i64: 1, 64>}, {pipeline_mode = #tpu.pipeline_mode<synchronous>, transform_indices = @transform_12, window_bounds = array<i64: 1, 64>}, {pipeline_mode = #tpu.pipeline_mode<synchronous>, transform_indices = @transform_13, window_bounds = array<i64: 64, 2048>}, {pipeline_mode = #tpu.pipeline_mode<synchronous>, transform_indices = @transform_14, window_bounds = array<i64: 1, 2048>}, {pipeline_mode = #tpu.pipeline_mode<synchronous>, transform_indices = @transform_15, window_bounds = array<i64: 2048, 64>}, {pipeline_mode = #tpu.pipeline_mode<synchronous>, transform_indices = @transform_16, window_bounds = array<i64: 1, 64>}, {pipeline_mode = #tpu.pipeline_mode<synchronous>, transform_indices = @transform_17, window_bounds = array<i64: 1, 64>}, {pipeline_mode = #tpu.pipeline_mode<synchronous>, transform_indices = @transform_18, window_bounds = array<i64: 1, 64>}, {pipeline_mode = #tpu.pipeline_mode<synchronous>, transform_indices = @transform_19, window_bounds = array<i64: 16, 64>}]} {
    %c0 = arith.constant 0 : index
    %0 = memref.load %arg1[%c0] : memref<16xi32, #tpu.memory_space<smem>>
    %1 = arith.index_cast %0 : i32 to index
    %c0_0 = arith.constant 0 : index
    %2 = vector.load %arg2[%1, %c0_0] : memref<512x64xf32, #tpu.memory_space<vmem>>, vector<1x64xf32>
    %c1 = arith.constant 1 : index
    %3 = memref.load %arg1[%c1] : memref<16xi32, #tpu.memory_space<smem>>
    %4 = arith.index_cast %3 : i32 to index
    %c0_1 = arith.constant 0 : index
    %5 = vector.load %arg2[%4, %c0_1] : memref<512x64xf32, #tpu.memory_space<vmem>>, vector<1x64xf32>
    %c2 = arith.constant 2 : index
    %6 = memref.load %arg1[%c2] : memref<16xi32, #tpu.memory_space<smem>>
    %7 = arith.index_cast %6 : i32 to index
    %c0_2 = arith.constant 0 : index
    %8 = vector.load %arg2[%7, %c0_2] : memref<512x64xf32, #tpu.memory_space<vmem>>, vector<1x64xf32>
    %c3 = arith.constant 3 : index
    %9 = memref.load %arg1[%c3] : memref<16xi32, #tpu.memory_space<smem>>
    %10 = arith.index_cast %9 : i32 to index
    %c0_3 = arith.constant 0 : index
    %11 = vector.load %arg2[%10, %c0_3] : memref<512x64xf32, #tpu.memory_space<vmem>>, vector<1x64xf32>
    %c4 = arith.constant 4 : index
    %12 = memref.load %arg1[%c4] : memref<16xi32, #tpu.memory_space<smem>>
    %13 = arith.index_cast %12 : i32 to index
    %c0_4 = arith.constant 0 : index
    %14 = vector.load %arg2[%13, %c0_4] : memref<512x64xf32, #tpu.memory_space<vmem>>, vector<1x64xf32>
    %c5 = arith.constant 5 : index
    %15 = memref.load %arg1[%c5] : memref<16xi32, #tpu.memory_space<smem>>
    %16 = arith.index_cast %15 : i32 to index
    %c0_5 = arith.constant 0 : index
    %17 = vector.load %arg2[%16, %c0_5] : memref<512x64xf32, #tpu.memory_space<vmem>>, vector<1x64xf32>
    %c6 = arith.constant 6 : index
    %18 = memref.load %arg1[%c6] : memref<16xi32, #tpu.memory_space<smem>>
    %19 = arith.index_cast %18 : i32 to index
    %c0_6 = arith.constant 0 : index
    %20 = vector.load %arg2[%19, %c0_6] : memref<512x64xf32, #tpu.memory_space<vmem>>, vector<1x64xf32>
    %c7 = arith.constant 7 : index
    %21 = memref.load %arg1[%c7] : memref<16xi32, #tpu.memory_space<smem>>
    %22 = arith.index_cast %21 : i32 to index
    %c0_7 = arith.constant 0 : index
    %23 = vector.load %arg2[%22, %c0_7] : memref<512x64xf32, #tpu.memory_space<vmem>>, vector<1x64xf32>
    %c8 = arith.constant 8 : index
    %24 = memref.load %arg1[%c8] : memref<16xi32, #tpu.memory_space<smem>>
    %25 = arith.index_cast %24 : i32 to index
    %c0_8 = arith.constant 0 : index
    %26 = vector.load %arg2[%25, %c0_8] : memref<512x64xf32, #tpu.memory_space<vmem>>, vector<1x64xf32>
    %c9 = arith.constant 9 : index
    %27 = memref.load %arg1[%c9] : memref<16xi32, #tpu.memory_space<smem>>
    %28 = arith.index_cast %27 : i32 to index
    %c0_9 = arith.constant 0 : index
    %29 = vector.load %arg2[%28, %c0_9] : memref<512x64xf32, #tpu.memory_space<vmem>>, vector<1x64xf32>
    %c10 = arith.constant 10 : index
    %30 = memref.load %arg1[%c10] : memref<16xi32, #tpu.memory_space<smem>>
    %31 = arith.index_cast %30 : i32 to index
    %c0_10 = arith.constant 0 : index
    %32 = vector.load %arg2[%31, %c0_10] : memref<512x64xf32, #tpu.memory_space<vmem>>, vector<1x64xf32>
    %c11 = arith.constant 11 : index
    %33 = memref.load %arg1[%c11] : memref<16xi32, #tpu.memory_space<smem>>
    %34 = arith.index_cast %33 : i32 to index
    %c0_11 = arith.constant 0 : index
    %35 = vector.load %arg2[%34, %c0_11] : memref<512x64xf32, #tpu.memory_space<vmem>>, vector<1x64xf32>
    %c12 = arith.constant 12 : index
    %36 = memref.load %arg1[%c12] : memref<16xi32, #tpu.memory_space<smem>>
    %37 = arith.index_cast %36 : i32 to index
    %c0_12 = arith.constant 0 : index
    %38 = vector.load %arg2[%37, %c0_12] : memref<512x64xf32, #tpu.memory_space<vmem>>, vector<1x64xf32>
    %c13 = arith.constant 13 : index
    %39 = memref.load %arg1[%c13] : memref<16xi32, #tpu.memory_space<smem>>
    %40 = arith.index_cast %39 : i32 to index
    %c0_13 = arith.constant 0 : index
    %41 = vector.load %arg2[%40, %c0_13] : memref<512x64xf32, #tpu.memory_space<vmem>>, vector<1x64xf32>
    %c14 = arith.constant 14 : index
    %42 = memref.load %arg1[%c14] : memref<16xi32, #tpu.memory_space<smem>>
    %43 = arith.index_cast %42 : i32 to index
    %c0_14 = arith.constant 0 : index
    %44 = vector.load %arg2[%43, %c0_14] : memref<512x64xf32, #tpu.memory_space<vmem>>, vector<1x64xf32>
    %c15 = arith.constant 15 : index
    %45 = memref.load %arg1[%c15] : memref<16xi32, #tpu.memory_space<smem>>
    %46 = arith.index_cast %45 : i32 to index
    %c0_15 = arith.constant 0 : index
    %47 = vector.load %arg2[%46, %c0_15] : memref<512x64xf32, #tpu.memory_space<vmem>>, vector<1x64xf32>
    %48 = tpu.concatenate %2, %5, %8, %11, %14, %17, %20, %23, %26, %29, %32, %35, %38, %41, %44, %47 in 0 : vector<1x64xf32>, vector<1x64xf32>, vector<1x64xf32>, vector<1x64xf32>, vector<1x64xf32>, vector<1x64xf32>, vector<1x64xf32>, vector<1x64xf32>, vector<1x64xf32>, vector<1x64xf32>, vector<1x64xf32>, vector<1x64xf32>, vector<1x64xf32>, vector<1x64xf32>, vector<1x64xf32>, vector<1x64xf32> -> vector<16x64xf32>
    %cst = arith.constant 8.000000e+00 : f32
    %49 = vector.broadcast %cst : f32 to vector<16x64xf32>
    %50 = arith.mulf %48, %49 : vector<16x64xf32>
    %c0_16 = arith.constant 0 : index
    %c0_17 = arith.constant 0 : index
    %51 = vector.load %arg3[%c0_16, %c0_17] : memref<16x64xf32, #tpu.memory_space<vmem>>, vector<16x64xf32>
    %52 = arith.addf %50, %51 : vector<16x64xf32>
    %c0_18 = arith.constant 0 : index
    %c0_19 = arith.constant 0 : index
    %53 = vector.load %arg5[%c0_18, %c0_19] : memref<64x64xf32, #tpu.memory_space<vmem>>, vector<64x64xf32>
    %cst_20 = arith.constant dense<0.000000e+00> : vector<16x64xf32>
    %54 = tpu.matmul %52, %53, %cst_20 {dimension_numbers = #tpu.dot_dimension_numbers<[1], [0], [0], [1], [0, 0, 1, 1], [], []>} : vector<16x64xf32>, vector<64x64xf32>, vector<16x64xf32> -> vector<16x64xf32>
    %c0_21 = arith.constant 0 : index
    %c0_22 = arith.constant 0 : index
    %55 = vector.load %arg6[%c0_21, %c0_22] : memref<1x64xf32, #tpu.memory_space<vmem>>, vector<1x64xf32>
    %56 = vector.broadcast %55 : vector<1x64xf32> to vector<16x64xf32>
    %57 = arith.addf %54, %56 : vector<16x64xf32>
    %c0_23 = arith.constant 0 : index
    %c0_24 = arith.constant 0 : index
    %58 = vector.load %arg7[%c0_23, %c0_24] : memref<64x64xf32, #tpu.memory_space<vmem>>, vector<64x64xf32>
    %cst_25 = arith.constant dense<0.000000e+00> : vector<16x64xf32>
    %59 = tpu.matmul %52, %58, %cst_25 {dimension_numbers = #tpu.dot_dimension_numbers<[1], [0], [0], [1], [0, 0, 1, 1], [], []>} : vector<16x64xf32>, vector<64x64xf32>, vector<16x64xf32> -> vector<16x64xf32>
    %c0_26 = arith.constant 0 : index
    %c0_27 = arith.constant 0 : index
    %60 = vector.load %arg8[%c0_26, %c0_27] : memref<1x64xf32, #tpu.memory_space<vmem>>, vector<1x64xf32>
    %61 = vector.broadcast %60 : vector<1x64xf32> to vector<16x64xf32>
    %62 = arith.addf %59, %61 : vector<16x64xf32>
    %c0_28 = arith.constant 0 : index
    %c0_29 = arith.constant 0 : index
    %63 = vector.load %arg9[%c0_28, %c0_29] : memref<64x64xf32, #tpu.memory_space<vmem>>, vector<64x64xf32>
    %cst_30 = arith.constant dense<0.000000e+00> : vector<16x64xf32>
    %64 = tpu.matmul %52, %63, %cst_30 {dimension_numbers = #tpu.dot_dimension_numbers<[1], [0], [0], [1], [0, 0, 1, 1], [], []>} : vector<16x64xf32>, vector<64x64xf32>, vector<16x64xf32> -> vector<16x64xf32>
    %c0_31 = arith.constant 0 : index
    %c0_32 = arith.constant 0 : index
    %65 = vector.load %arg10[%c0_31, %c0_32] : memref<1x64xf32, #tpu.memory_space<vmem>>, vector<1x64xf32>
    %66 = vector.broadcast %65 : vector<1x64xf32> to vector<16x64xf32>
    %67 = arith.addf %64, %66 : vector<16x64xf32>
    %68 = vector.extract_strided_slice %57 {offsets = [0, 0], sizes = [16, 8], strides = [1, 1]} : vector<16x64xf32> to vector<16x8xf32>
    %69 = vector.extract_strided_slice %57 {offsets = [0, 8], sizes = [16, 8], strides = [1, 1]} : vector<16x64xf32> to vector<16x8xf32>
    %70 = vector.extract_strided_slice %57 {offsets = [0, 16], sizes = [16, 8], strides = [1, 1]} : vector<16x64xf32> to vector<16x8xf32>
    %71 = vector.extract_strided_slice %57 {offsets = [0, 24], sizes = [16, 8], strides = [1, 1]} : vector<16x64xf32> to vector<16x8xf32>
    %72 = vector.extract_strided_slice %57 {offsets = [0, 32], sizes = [16, 8], strides = [1, 1]} : vector<16x64xf32> to vector<16x8xf32>
    %73 = vector.extract_strided_slice %57 {offsets = [0, 40], sizes = [16, 8], strides = [1, 1]} : vector<16x64xf32> to vector<16x8xf32>
    %74 = vector.extract_strided_slice %57 {offsets = [0, 48], sizes = [16, 8], strides = [1, 1]} : vector<16x64xf32> to vector<16x8xf32>
    %75 = vector.extract_strided_slice %57 {offsets = [0, 56], sizes = [16, 8], strides = [1, 1]} : vector<16x64xf32> to vector<16x8xf32>
    %76 = vector.shape_cast %68 : vector<16x8xf32> to vector<1x16x8xf32>
    %77 = vector.shape_cast %69 : vector<16x8xf32> to vector<1x16x8xf32>
    %78 = vector.shape_cast %70 : vector<16x8xf32> to vector<1x16x8xf32>
    %79 = vector.shape_cast %71 : vector<16x8xf32> to vector<1x16x8xf32>
    %80 = vector.shape_cast %72 : vector<16x8xf32> to vector<1x16x8xf32>
    %81 = vector.shape_cast %73 : vector<16x8xf32> to vector<1x16x8xf32>
    %82 = vector.shape_cast %74 : vector<16x8xf32> to vector<1x16x8xf32>
    %83 = vector.shape_cast %75 : vector<16x8xf32> to vector<1x16x8xf32>
    %84 = tpu.concatenate %76, %77, %78, %79, %80, %81, %82, %83 in 0 : vector<1x16x8xf32>, vector<1x16x8xf32>, vector<1x16x8xf32>, vector<1x16x8xf32>, vector<1x16x8xf32>, vector<1x16x8xf32>, vector<1x16x8xf32>, vector<1x16x8xf32> -> vector<8x16x8xf32>
    %85 = vector.extract_strided_slice %62 {offsets = [0, 0], sizes = [16, 8], strides = [1, 1]} : vector<16x64xf32> to vector<16x8xf32>
    %86 = vector.extract_strided_slice %62 {offsets = [0, 8], sizes = [16, 8], strides = [1, 1]} : vector<16x64xf32> to vector<16x8xf32>
    %87 = vector.extract_strided_slice %62 {offsets = [0, 16], sizes = [16, 8], strides = [1, 1]} : vector<16x64xf32> to vector<16x8xf32>
    %88 = vector.extract_strided_slice %62 {offsets = [0, 24], sizes = [16, 8], strides = [1, 1]} : vector<16x64xf32> to vector<16x8xf32>
    %89 = vector.extract_strided_slice %62 {offsets = [0, 32], sizes = [16, 8], strides = [1, 1]} : vector<16x64xf32> to vector<16x8xf32>
    %90 = vector.extract_strided_slice %62 {offsets = [0, 40], sizes = [16, 8], strides = [1, 1]} : vector<16x64xf32> to vector<16x8xf32>
    %91 = vector.extract_strided_slice %62 {offsets = [0, 48], sizes = [16, 8], strides = [1, 1]} : vector<16x64xf32> to vector<16x8xf32>
    %92 = vector.extract_strided_slice %62 {offsets = [0, 56], sizes = [16, 8], strides = [1, 1]} : vector<16x64xf32> to vector<16x8xf32>
    %93 = vector.shape_cast %85 : vector<16x8xf32> to vector<1x16x8xf32>
    %94 = vector.shape_cast %86 : vector<16x8xf32> to vector<1x16x8xf32>
    %95 = vector.shape_cast %87 : vector<16x8xf32> to vector<1x16x8xf32>
    %96 = vector.shape_cast %88 : vector<16x8xf32> to vector<1x16x8xf32>
    %97 = vector.shape_cast %89 : vector<16x8xf32> to vector<1x16x8xf32>
    %98 = vector.shape_cast %90 : vector<16x8xf32> to vector<1x16x8xf32>
    %99 = vector.shape_cast %91 : vector<16x8xf32> to vector<1x16x8xf32>
    %100 = vector.shape_cast %92 : vector<16x8xf32> to vector<1x16x8xf32>
    %101 = tpu.concatenate %93, %94, %95, %96, %97, %98, %99, %100 in 0 : vector<1x16x8xf32>, vector<1x16x8xf32>, vector<1x16x8xf32>, vector<1x16x8xf32>, vector<1x16x8xf32>, vector<1x16x8xf32>, vector<1x16x8xf32>, vector<1x16x8xf32> -> vector<8x16x8xf32>
    %102 = vector.extract_strided_slice %67 {offsets = [0, 0], sizes = [16, 8], strides = [1, 1]} : vector<16x64xf32> to vector<16x8xf32>
    %103 = vector.extract_strided_slice %67 {offsets = [0, 8], sizes = [16, 8], strides = [1, 1]} : vector<16x64xf32> to vector<16x8xf32>
    %104 = vector.extract_strided_slice %67 {offsets = [0, 16], sizes = [16, 8], strides = [1, 1]} : vector<16x64xf32> to vector<16x8xf32>
    %105 = vector.extract_strided_slice %67 {offsets = [0, 24], sizes = [16, 8], strides = [1, 1]} : vector<16x64xf32> to vector<16x8xf32>
    %106 = vector.extract_strided_slice %67 {offsets = [0, 32], sizes = [16, 8], strides = [1, 1]} : vector<16x64xf32> to vector<16x8xf32>
    %107 = vector.extract_strided_slice %67 {offsets = [0, 40], sizes = [16, 8], strides = [1, 1]} : vector<16x64xf32> to vector<16x8xf32>
    %108 = vector.extract_strided_slice %67 {offsets = [0, 48], sizes = [16, 8], strides = [1, 1]} : vector<16x64xf32> to vector<16x8xf32>
    %109 = vector.extract_strided_slice %67 {offsets = [0, 56], sizes = [16, 8], strides = [1, 1]} : vector<16x64xf32> to vector<16x8xf32>
    %110 = vector.shape_cast %102 : vector<16x8xf32> to vector<1x16x8xf32>
    %111 = vector.shape_cast %103 : vector<16x8xf32> to vector<1x16x8xf32>
    %112 = vector.shape_cast %104 : vector<16x8xf32> to vector<1x16x8xf32>
    %113 = vector.shape_cast %105 : vector<16x8xf32> to vector<1x16x8xf32>
    %114 = vector.shape_cast %106 : vector<16x8xf32> to vector<1x16x8xf32>
    %115 = vector.shape_cast %107 : vector<16x8xf32> to vector<1x16x8xf32>
    %116 = vector.shape_cast %108 : vector<16x8xf32> to vector<1x16x8xf32>
    %117 = vector.shape_cast %109 : vector<16x8xf32> to vector<1x16x8xf32>
    %118 = tpu.concatenate %110, %111, %112, %113, %114, %115, %116, %117 in 0 : vector<1x16x8xf32>, vector<1x16x8xf32>, vector<1x16x8xf32>, vector<1x16x8xf32>, vector<1x16x8xf32>, vector<1x16x8xf32>, vector<1x16x8xf32>, vector<1x16x8xf32> -> vector<8x16x8xf32>
    "tpu.trace_start"() <{level = 10 : i32, message = "hqd,hkd->hqk"}> : () -> ()
    %cst_33 = arith.constant dense<0.000000e+00> : vector<8x16x16xf32>
    %119 = tpu.matmul %84, %101, %cst_33 {dimension_numbers = #tpu.dot_dimension_numbers<[2], [2], [1], [1], [0, 0, 0, 1, 1, 1], [0], [0]>} : vector<8x16x8xf32>, vector<8x16x8xf32>, vector<8x16x16xf32> -> vector<8x16x16xf32>
    "tpu.trace_stop"() : () -> ()
    %c0_34 = arith.constant 0 : index
    %c0_35 = arith.constant 0 : index
    %120 = vector.load %arg4[%c0_34, %c0_35] : memref<16x16xf32, #tpu.memory_space<vmem>>, vector<16x16xf32>
    %121 = vector.shape_cast %120 : vector<16x16xf32> to vector<1x16x16xf32>
    %122 = vector.broadcast %121 : vector<1x16x16xf32> to vector<8x16x16xf32>
    %123 = arith.addf %119, %122 : vector<8x16x16xf32>
    %cst_36 = arith.constant dense<0xFF800000> : vector<8x16xf32>
    %124 = vector.multi_reduction <maximumf>, %123, %cst_36 [2] : vector<8x16x16xf32> to vector<8x16xf32>
    %125 = vector.shape_cast %124 : vector<8x16xf32> to vector<8x16x1xf32>
    %126 = vector.broadcast %125 : vector<8x16x1xf32> to vector<8x16x16xf32>
    %127 = arith.subf %123, %126 : vector<8x16x16xf32>
    %128 = math.exp %127 : vector<8x16x16xf32>
    %cst_37 = arith.constant dense<0.000000e+00> : vector<8x16xf32>
    %129 = vector.multi_reduction <add>, %128, %cst_37 [2] : vector<8x16x16xf32> to vector<8x16xf32>
    %130 = vector.shape_cast %129 : vector<8x16xf32> to vector<8x16x1xf32>
    %131 = tpu.reciprocal %130 {approx = true} : vector<8x16x1xf32> -> vector<8x16x1xf32>
    %132 = vector.broadcast %131 : vector<8x16x1xf32> to vector<8x16x16xf32>
    %133 = arith.mulf %128, %132 : vector<8x16x16xf32>
    "tpu.trace_start"() <{level = 10 : i32, message = "hqk,hkd->hqd"}> : () -> ()
    %cst_38 = arith.constant dense<0.000000e+00> : vector<8x16x8xf32>
    %134 = tpu.matmul %133, %118, %cst_38 {dimension_numbers = #tpu.dot_dimension_numbers<[2], [1], [1], [2], [0, 0, 0, 1, 1, 2], [0], [0]>} : vector<8x16x16xf32>, vector<8x16x8xf32>, vector<8x16x8xf32> -> vector<8x16x8xf32>
    "tpu.trace_stop"() : () -> ()
    %135 = vector.extract_strided_slice %134 {offsets = [0, 0, 0], sizes = [1, 16, 8], strides = [1, 1, 1]} : vector<8x16x8xf32> to vector<1x16x8xf32>
    %136 = vector.shape_cast %135 : vector<1x16x8xf32> to vector<16x8xf32>
    %137 = vector.extract_strided_slice %134 {offsets = [1, 0, 0], sizes = [1, 16, 8], strides = [1, 1, 1]} : vector<8x16x8xf32> to vector<1x16x8xf32>
    %138 = vector.shape_cast %137 : vector<1x16x8xf32> to vector<16x8xf32>
    %139 = vector.extract_strided_slice %134 {offsets = [2, 0, 0], sizes = [1, 16, 8], strides = [1, 1, 1]} : vector<8x16x8xf32> to vector<1x16x8xf32>
    %140 = vector.shape_cast %139 : vector<1x16x8xf32> to vector<16x8xf32>
    %141 = vector.extract_strided_slice %134 {offsets = [3, 0, 0], sizes = [1, 16, 8], strides = [1, 1, 1]} : vector<8x16x8xf32> to vector<1x16x8xf32>
    %142 = vector.shape_cast %141 : vector<1x16x8xf32> to vector<16x8xf32>
    %143 = vector.extract_strided_slice %134 {offsets = [4, 0, 0], sizes = [1, 16, 8], strides = [1, 1, 1]} : vector<8x16x8xf32> to vector<1x16x8xf32>
    %144 = vector.shape_cast %143 : vector<1x16x8xf32> to vector<16x8xf32>
    %145 = vector.extract_strided_slice %134 {offsets = [5, 0, 0], sizes = [1, 16, 8], strides = [1, 1, 1]} : vector<8x16x8xf32> to vector<1x16x8xf32>
    %146 = vector.shape_cast %145 : vector<1x16x8xf32> to vector<16x8xf32>
    %147 = vector.extract_strided_slice %134 {offsets = [6, 0, 0], sizes = [1, 16, 8], strides = [1, 1, 1]} : vector<8x16x8xf32> to vector<1x16x8xf32>
    %148 = vector.shape_cast %147 : vector<1x16x8xf32> to vector<16x8xf32>
    %149 = vector.extract_strided_slice %134 {offsets = [7, 0, 0], sizes = [1, 16, 8], strides = [1, 1, 1]} : vector<8x16x8xf32> to vector<1x16x8xf32>
    %150 = vector.shape_cast %149 : vector<1x16x8xf32> to vector<16x8xf32>
    %151 = tpu.concatenate %136, %138, %140, %142, %144, %146, %148, %150 in 1 : vector<16x8xf32>, vector<16x8xf32>, vector<16x8xf32>, vector<16x8xf32>, vector<16x8xf32>, vector<16x8xf32>, vector<16x8xf32>, vector<16x8xf32> -> vector<16x64xf32>
    %c0_39 = arith.constant 0 : index
    %c0_40 = arith.constant 0 : index
    %152 = vector.load %arg11[%c0_39, %c0_40] : memref<64x64xf32, #tpu.memory_space<vmem>>, vector<64x64xf32>
    %cst_41 = arith.constant dense<0.000000e+00> : vector<16x64xf32>
    %153 = tpu.matmul %151, %152, %cst_41 {dimension_numbers = #tpu.dot_dimension_numbers<[1], [0], [0], [1], [0, 0, 1, 1], [], []>} : vector<16x64xf32>, vector<64x64xf32>, vector<16x64xf32> -> vector<16x64xf32>
    %c0_42 = arith.constant 0 : index
    %c0_43 = arith.constant 0 : index
    %154 = vector.load %arg12[%c0_42, %c0_43] : memref<1x64xf32, #tpu.memory_space<vmem>>, vector<1x64xf32>
    %155 = vector.broadcast %154 : vector<1x64xf32> to vector<16x64xf32>
    %156 = arith.addf %153, %155 : vector<16x64xf32>
    %157 = arith.addf %52, %156 : vector<16x64xf32>
    %c0_44 = arith.constant 0 : index
    %c0_45 = arith.constant 0 : index
    %158 = vector.load %arg13[%c0_44, %c0_45] : memref<1x64xf32, #tpu.memory_space<vmem>>, vector<1x64xf32>
    %c0_46 = arith.constant 0 : index
    %c0_47 = arith.constant 0 : index
    %159 = vector.load %arg14[%c0_46, %c0_47] : memref<1x64xf32, #tpu.memory_space<vmem>>, vector<1x64xf32>
    %cst_48 = arith.constant dense<0.000000e+00> : vector<16xf32>
    %160 = vector.multi_reduction <add>, %157, %cst_48 [1] : vector<16x64xf32> to vector<16xf32>
    %161 = vector.shape_cast %160 : vector<16xf32> to vector<16x1xf32>
    %cst_49 = arith.constant 6.400000e+01 : f32
    %162 = vector.broadcast %cst_49 : f32 to vector<16x1xf32>
    %163 = arith.divf %161, %162 : vector<16x1xf32>
    %164 = vector.broadcast %163 : vector<16x1xf32> to vector<16x64xf32>
    %165 = arith.subf %157, %164 : vector<16x64xf32>
    %166 = arith.mulf %165, %165 : vector<16x64xf32>
    %cst_50 = arith.constant dense<0.000000e+00> : vector<16xf32>
    %167 = vector.multi_reduction <add>, %166, %cst_50 [1] : vector<16x64xf32> to vector<16xf32>
    %168 = vector.shape_cast %167 : vector<16xf32> to vector<16x1xf32>
    %cst_51 = arith.constant 6.400000e+01 : f32
    %169 = vector.broadcast %cst_51 : f32 to vector<16x1xf32>
    %170 = arith.divf %168, %169 : vector<16x1xf32>
    %171 = vector.broadcast %163 : vector<16x1xf32> to vector<16x64xf32>
    %172 = arith.subf %157, %171 : vector<16x64xf32>
    %cst_52 = arith.constant 9.99999974E-6 : f32
    %173 = vector.broadcast %cst_52 : f32 to vector<16x1xf32>
    %174 = arith.addf %170, %173 : vector<16x1xf32>
    %175 = math.rsqrt %174 : vector<16x1xf32>
    %176 = vector.broadcast %175 : vector<16x1xf32> to vector<16x64xf32>
    %177 = arith.mulf %172, %176 : vector<16x64xf32>
    %178 = vector.broadcast %158 : vector<1x64xf32> to vector<16x64xf32>
    %179 = arith.mulf %177, %178 : vector<16x64xf32>
    %180 = vector.broadcast %159 : vector<1x64xf32> to vector<16x64xf32>
    %181 = arith.addf %179, %180 : vector<16x64xf32>
    %c0_53 = arith.constant 0 : index
    %c0_54 = arith.constant 0 : index
    %182 = vector.load %arg15[%c0_53, %c0_54] : memref<64x2048xf32, #tpu.memory_space<vmem>>, vector<64x2048xf32>
    %cst_55 = arith.constant dense<0.000000e+00> : vector<16x2048xf32>
    %183 = tpu.matmul %181, %182, %cst_55 {dimension_numbers = #tpu.dot_dimension_numbers<[1], [0], [0], [1], [0, 0, 1, 1], [], []>} : vector<16x64xf32>, vector<64x2048xf32>, vector<16x2048xf32> -> vector<16x2048xf32>
    %c0_56 = arith.constant 0 : index
    %c0_57 = arith.constant 0 : index
    %184 = vector.load %arg16[%c0_56, %c0_57] : memref<1x2048xf32, #tpu.memory_space<vmem>>, vector<1x2048xf32>
    %185 = vector.broadcast %184 : vector<1x2048xf32> to vector<16x2048xf32>
    %186 = arith.addf %183, %185 : vector<16x2048xf32>
    %cst_58 = arith.constant 0.000000e+00 : f32
    %187 = vector.broadcast %cst_58 : f32 to vector<16x2048xf32>
    %188 = arith.maximumf %186, %187 : vector<16x2048xf32>
    %c0_59 = arith.constant 0 : index
    %c0_60 = arith.constant 0 : index
    %189 = vector.load %arg17[%c0_59, %c0_60] : memref<2048x64xf32, #tpu.memory_space<vmem>>, vector<2048x64xf32>
    %cst_61 = arith.constant dense<0.000000e+00> : vector<16x64xf32>
    %190 = tpu.matmul %188, %189, %cst_61 {dimension_numbers = #tpu.dot_dimension_numbers<[1], [0], [0], [1], [0, 0, 1, 1], [], []>} : vector<16x2048xf32>, vector<2048x64xf32>, vector<16x64xf32> -> vector<16x64xf32>
    %c0_62 = arith.constant 0 : index
    %c0_63 = arith.constant 0 : index
    %191 = vector.load %arg18[%c0_62, %c0_63] : memref<1x64xf32, #tpu.memory_space<vmem>>, vector<1x64xf32>
    %192 = vector.broadcast %191 : vector<1x64xf32> to vector<16x64xf32>
    %193 = arith.addf %190, %192 : vector<16x64xf32>
    %194 = arith.addf %181, %193 : vector<16x64xf32>
    %c0_64 = arith.constant 0 : index
    %c0_65 = arith.constant 0 : index
    %195 = vector.load %arg19[%c0_64, %c0_65] : memref<1x64xf32, #tpu.memory_space<vmem>>, vector<1x64xf32>
    %c0_66 = arith.constant 0 : index
    %c0_67 = arith.constant 0 : index
    %196 = vector.load %arg20[%c0_66, %c0_67] : memref<1x64xf32, #tpu.memory_space<vmem>>, vector<1x64xf32>
    %cst_68 = arith.constant dense<0.000000e+00> : vector<16xf32>
    %197 = vector.multi_reduction <add>, %194, %cst_68 [1] : vector<16x64xf32> to vector<16xf32>
    %198 = vector.shape_cast %197 : vector<16xf32> to vector<16x1xf32>
    %cst_69 = arith.constant 6.400000e+01 : f32
    %199 = vector.broadcast %cst_69 : f32 to vector<16x1xf32>
    %200 = arith.divf %198, %199 : vector<16x1xf32>
    %201 = vector.broadcast %200 : vector<16x1xf32> to vector<16x64xf32>
    %202 = arith.subf %194, %201 : vector<16x64xf32>
    %203 = arith.mulf %202, %202 : vector<16x64xf32>
    %cst_70 = arith.constant dense<0.000000e+00> : vector<16xf32>
    %204 = vector.multi_reduction <add>, %203, %cst_70 [1] : vector<16x64xf32> to vector<16xf32>
    %205 = vector.shape_cast %204 : vector<16xf32> to vector<16x1xf32>
    %cst_71 = arith.constant 6.400000e+01 : f32
    %206 = vector.broadcast %cst_71 : f32 to vector<16x1xf32>
    %207 = arith.divf %205, %206 : vector<16x1xf32>
    %208 = vector.broadcast %200 : vector<16x1xf32> to vector<16x64xf32>
    %209 = arith.subf %194, %208 : vector<16x64xf32>
    %cst_72 = arith.constant 9.99999974E-6 : f32
    %210 = vector.broadcast %cst_72 : f32 to vector<16x1xf32>
    %211 = arith.addf %207, %210 : vector<16x1xf32>
    %212 = math.rsqrt %211 : vector<16x1xf32>
    %213 = vector.broadcast %212 : vector<16x1xf32> to vector<16x64xf32>
    %214 = arith.mulf %209, %213 : vector<16x64xf32>
    %215 = vector.broadcast %195 : vector<1x64xf32> to vector<16x64xf32>
    %216 = arith.mulf %214, %215 : vector<16x64xf32>
    %217 = vector.broadcast %196 : vector<1x64xf32> to vector<16x64xf32>
    %218 = arith.addf %216, %217 : vector<16x64xf32>
    %c0_73 = arith.constant 0 : index
    %c0_74 = arith.constant 0 : index
    %219 = vector.load %arg21[%c0_73, %c0_74] : memref<16x64xf32, #tpu.memory_space<vmem>>, vector<16x64xf32>
    tpu.vector_store %arg21[%c0_73, %c0_74], %218 {strides = array<i32>} : memref<16x64xf32, #tpu.memory_space<vmem>>, vector<16x64xf32>,
    return
  }
  func.func @transform_0(%arg0: i32, %arg1: memref<16xi32, #tpu.memory_space<smem>>) -> (i32, i32) {
    %c0_i32 = arith.constant 0 : i32
    %c0_i32_0 = arith.constant 0 : i32
    %c0_i32_1 = arith.constant 0 : i32
    return %c0_i32, %c0_i32_0 : i32, i32
  }
  func.func @transform_1(%arg0: i32, %arg1: memref<16xi32, #tpu.memory_space<smem>>) -> (i32, i32) {
    %c0_i32 = arith.constant 0 : i32
    %c0_i32_0 = arith.constant 0 : i32
    %c0_i32_1 = arith.constant 0 : i32
    return %c0_i32, %c0_i32_0 : i32, i32
  }
  func.func @transform_2(%arg0: i32, %arg1: memref<16xi32, #tpu.memory_space<smem>>) -> (i32, i32) {
    %c0_i32 = arith.constant 0 : i32
    %c0_i32_0 = arith.constant 0 : i32
    %c0_i32_1 = arith.constant 0 : i32
    return %c0_i32, %c0_i32_0 : i32, i32
  }
  func.func @transform_3(%arg0: i32, %arg1: memref<16xi32, #tpu.memory_space<smem>>) -> (i32, i32) {
    %c0_i32 = arith.constant 0 : i32
    %c0_i32_0 = arith.constant 0 : i32
    %c0_i32_1 = arith.constant 0 : i32
    return %c0_i32, %c0_i32_0 : i32, i32
  }
  func.func @transform_4(%arg0: i32, %arg1: memref<16xi32, #tpu.memory_space<smem>>) -> (i32, i32) {
    %c0_i32 = arith.constant 0 : i32
    %c0_i32_0 = arith.constant 0 : i32
    %c0_i32_1 = arith.constant 0 : i32
    return %c0_i32, %c0_i32_0 : i32, i32
  }
  func.func @transform_5(%arg0: i32, %arg1: memref<16xi32, #tpu.memory_space<smem>>) -> (i32, i32) {
    %c0_i32 = arith.constant 0 : i32
    %c0_i32_0 = arith.constant 0 : i32
    %c0_i32_1 = arith.constant 0 : i32
    return %c0_i32, %c0_i32_0 : i32, i32
  }
  func.func @transform_6(%arg0: i32, %arg1: memref<16xi32, #tpu.memory_space<smem>>) -> (i32, i32) {
    %c0_i32 = arith.constant 0 : i32
    %c0_i32_0 = arith.constant 0 : i32
    %c0_i32_1 = arith.constant 0 : i32
    return %c0_i32, %c0_i32_0 : i32, i32
  }
  func.func @transform_7(%arg0: i32, %arg1: memref<16xi32, #tpu.memory_space<smem>>) -> (i32, i32) {
    %c0_i32 = arith.constant 0 : i32
    %c0_i32_0 = arith.constant 0 : i32
    %c0_i32_1 = arith.constant 0 : i32
    return %c0_i32, %c0_i32_0 : i32, i32
  }
  func.func @transform_8(%arg0: i32, %arg1: memref<16xi32, #tpu.memory_space<smem>>) -> (i32, i32) {
    %c0_i32 = arith.constant 0 : i32
    %c0_i32_0 = arith.constant 0 : i32
    %c0_i32_1 = arith.constant 0 : i32
    return %c0_i32, %c0_i32_0 : i32, i32
  }
  func.func @transform_9(%arg0: i32, %arg1: memref<16xi32, #tpu.memory_space<smem>>) -> (i32, i32) {
    %c0_i32 = arith.constant 0 : i32
    %c0_i32_0 = arith.constant 0 : i32
    %c0_i32_1 = arith.constant 0 : i32
    return %c0_i32, %c0_i32_0 : i32, i32
  }
  func.func @transform_10(%arg0: i32, %arg1: memref<16xi32, #tpu.memory_space<smem>>) -> (i32, i32) {
    %c0_i32 = arith.constant 0 : i32
    %c0_i32_0 = arith.constant 0 : i32
    %c0_i32_1 = arith.constant 0 : i32
    return %c0_i32, %c0_i32_0 : i32, i32
  }
  func.func @transform_11(%arg0: i32, %arg1: memref<16xi32, #tpu.memory_space<smem>>) -> (i32, i32) {
    %c0_i32 = arith.constant 0 : i32
    %c0_i32_0 = arith.constant 0 : i32
    %c0_i32_1 = arith.constant 0 : i32
    return %c0_i32, %c0_i32_0 : i32, i32
  }
  func.func @transform_12(%arg0: i32, %arg1: memref<16xi32, #tpu.memory_space<smem>>) -> (i32, i32) {
    %c0_i32 = arith.constant 0 : i32
    %c0_i32_0 = arith.constant 0 : i32
    %c0_i32_1 = arith.constant 0 : i32
    return %c0_i32, %c0_i32_0 : i32, i32
  }
  func.func @transform_13(%arg0: i32, %arg1: memref<16xi32, #tpu.memory_space<smem>>) -> (i32, i32) {
    %c0_i32 = arith.constant 0 : i32
    %c0_i32_0 = arith.constant 0 : i32
    %c0_i32_1 = arith.constant 0 : i32
    return %c0_i32, %c0_i32_0 : i32, i32
  }
  func.func @transform_14(%arg0: i32, %arg1: memref<16xi32, #tpu.memory_space<smem>>) -> (i32, i32) {
    %c0_i32 = arith.constant 0 : i32
    %c0_i32_0 = arith.constant 0 : i32
    %c0_i32_1 = arith.constant 0 : i32
    return %c0_i32, %c0_i32_0 : i32, i32
  }
  func.func @transform_15(%arg0: i32, %arg1: memref<16xi32, #tpu.memory_space<smem>>) -> (i32, i32) {
    %c0_i32 = arith.constant 0 : i32
    %c0_i32_0 = arith.constant 0 : i32
    %c0_i32_1 = arith.constant 0 : i32
    return %c0_i32, %c0_i32_0 : i32, i32
  }
  func.func @transform_16(%arg0: i32, %arg1: memref<16xi32, #tpu.memory_space<smem>>) -> (i32, i32) {
    %c0_i32 = arith.constant 0 : i32
    %c0_i32_0 = arith.constant 0 : i32
    %c0_i32_1 = arith.constant 0 : i32
    return %c0_i32, %c0_i32_0 : i32, i32
  }
  func.func @transform_17(%arg0: i32, %arg1: memref<16xi32, #tpu.memory_space<smem>>) -> (i32, i32) {
    %c0_i32 = arith.constant 0 : i32
    %c0_i32_0 = arith.constant 0 : i32
    %c0_i32_1 = arith.constant 0 : i32
    return %c0_i32, %c0_i32_0 : i32, i32
  }
  func.func @transform_18(%arg0: i32, %arg1: memref<16xi32, #tpu.memory_space<smem>>) -> (i32, i32) {
    %c0_i32 = arith.constant 0 : i32
    %c0_i32_0 = arith.constant 0 : i32
    %c0_i32_1 = arith.constant 0 : i32
    return %c0_i32, %c0_i32_0 : i32, i32
  }
  func.func @transform_19(%arg0: i32, %arg1: memref<16xi32, #tpu.memory_space<smem>>) -> (i32, i32) {
    %c0_i32 = arith.constant 0 : i32
    %c0_i32_0 = arith.constant 0 : i32
    %c0_i32_1 = arith.constant 0 : i32
    return %c0_i32, %c0_i32_0 : i32, i32
  }
}

</mosaic_0001>

<bundles_post_ra>
// kernel: transformer_encoder_pallas.1
= control target key start
LH: loop header
LB: loop body
LE: loop exit
PB: predicated region body
PF: predicated region fallthrough
CT: control target
= control target key end

     0   :  { %s2817_s24 = smov [#allocation3]   ;;  %s4812_s0 = inlined_call_operand.vmem [shape: s32[16], index: 0, kind: input, shape index: {}]   ;;  %s4813_s1 = inlined_call_operand.vmem [shape: f32[512,64], index: 1, kind: input, shape index: {}]   ;;  %s4814_s2 = inlined_call_operand.vmem [shape: f32[16,64], index: 2, kind: input, shape index: {}]   ;;  %s4815_s3 = inlined_call_operand.vmem [shape: f32[16,16], index: 3, kind: input, shape index: {}]   ;;  %s4816_s4 = inlined_call_operand.vmem [shape: f32[64,64], index: 4, kind: input, shape index: {}]   ;;  %s4817_s5 = inlined_call_operand.vmem [shape: f32[1,64], index: 5, kind: input, shape index: {}]   ;;  %s4818_s6 = inlined_call_operand.vmem [shape: f32[64,64], index: 6, kind: input, shape index: {}]   ;;  %s4819_s7 = inlined_call_operand.vmem [shape: f32[1,64], index: 7, kind: input, shape index: {}]   ;;  %s4820_s8 = inlined_call_operand.vmem [shape: f32[64,64], index: 8, kind: input, shape index: {}]   ;;  %s4821_s9 = inlined_call_operand.vmem [shape: f32[1,64], index: 9, kind: input, shape index: {}]   ;;  %s4822_s10 = inlined_call_operand.vmem [shape: f32[64,64], index: 10, kind: input, shape index: {}]   ;;  %s4823_s11 = inlined_call_operand.vmem [shape: f32[1,64], index: 11, kind: input, shape index: {}]   ;;  %s4824_s12 = inlined_call_operand.vmem [shape: f32[1,64], index: 12, kind: input, shape index: {}]   ;;  %s4825_s13 = inlined_call_operand.vmem [shape: f32[1,64], index: 13, kind: input, shape index: {}]   ;;  %s4826_s14 = inlined_call_operand.vmem [shape: f32[64,2048], index: 14, kind: input, shape index: {}]   ;;  %s4827_s15 = inlined_call_operand.vmem [shape: f32[1,2048], index: 15, kind: input, shape index: {}]   ;;  %s4828_s16 = inlined_call_operand.vmem [shape: f32[2048,64], index: 16, kind: input, shape index: {}]   ;;  %s4829_s17 = inlined_call_operand.vmem [shape: f32[1,64], index: 17, kind: input, shape index: {}]   ;;  %s4830_s18 = inlined_call_operand.vmem [shape: f32[1,64], index: 18, kind: input, shape index: {}]   ;;  %s4831_s19 = inlined_call_operand.vmem [shape: f32[1,64], index: 19, kind: input, shape index: {}]   ;;  %s4832_s20 = inlined_call_operand.hbm [shape: f32[16,64], index: 20, kind: output, shape index: {}]  }
   0x1   :  { %4837 = sst [smem:[#allocation8_spill]] %s4812_s0 }
   0x2   :  { %4838 = sst [smem:[#allocation9_spill]] %s4813_s1 }
   0x3   :  { %4839 = sst [smem:[#allocation10_spill]] %s4814_s2 }
   0x4   :  { %4840 = sst [smem:[#allocation11_spill]] %s4815_s3 }
   0x5   :  { %4841 = sst [smem:[#allocation12_spill]] %s4816_s4 }
   0x6   :  { %4842 = sst [smem:[#allocation13_spill]] %s4825_s13 }
   0x7   :  { %4843 = sst [smem:[#allocation14_spill]] %s4829_s17 }
   0x8   :  { %4844 = sst [smem:[#allocation15_spill]] %s4830_s18 }
   0x9   :  { %4845 = sst [smem:[#allocation16_spill]] %s4831_s19 }
   0xa   :  { %4846 = sst [smem:[#allocation17_spill]] %s4832_s20 }
   0xb   :  { %s4847_s23 = sld [smem:[#allocation8_spill]] }
  0x11   :  { %s26_s13 = sshll.u32 %s4847_s23, 4  ;;  %s27_s13 = int_to_ptr.vmem [resolvable:$true] %s26_s13 }
  0x12   :  { %29 = dma.vmem_to_smem %s27_s13, 16, %s2817_s24, [#allocation2] }
  0x13   :  { %2813 = dma.done.wait [#allocation2], 16 }
  0x14   :  { %2814 = vsyncadd [#allocation2], 4294967280 }
  0x15   :  { %32 = sfence }
  0x16   :  { %s4848_s3 = sld [smem:[#allocation12_spill]]  ;;  %v238_v1 = vld [vmem:[%s4818_s6 + $0x38] sm:$0xff]  ;;  %v237_v3 = vld [vmem:[%s4818_s6 + $0x30] sm:$0xff]  ;;  %v236_v5 = vld [vmem:[%s4818_s6 + $0x28] sm:$0xff]  ;;  %vm162_vm0 = vcmask 1040384   ;;  %vm164_vm1 = vcmask 1041408  }
  0x17   :  { %s2952_s29 = sld [smem:[#allocation3]]  ;;  %251 = vmatpush.msra.mxu1 %v238_v1  ;;  %v235_v7 = vld [vmem:[%s4818_s6 + $0x20] sm:$0xff]  ;;  %v234_v9 = vld [vmem:[%s4818_s6 + $0x18] sm:$0xff]  ;;  %vm166_vm2 = vcmask 1042432   ;;  %v233_v12 = vld [vmem:[%s4818_s6 + $0x10] sm:$0xff]  ;;  %vm168_vm3 = vcmask 1043456  }
  0x18   :  { %s2957_s0 = sld [smem:[#allocation3 + $0x1]]  ;;  %v273_v11 = vld [vmem:[%s4820_s8 + $0x38] sm:$0xff]  ;;  %vm170_vm4 = vcmask 1044480   ;;  %v272_v13 = vld [vmem:[%s4820_s8 + $0x30] sm:$0xff]  ;;  %v232_v15 = vld [vmem:[%s4818_s6 + $0x8] sm:$0xff]  ;;  %vm172_vm5 = vcmask 1045504  }
  0x19   :  { %s2965_s24 = sld [smem:[#allocation3 + $0x2]]  ;;  %252 = vmatpush.msra.mxu1 %v237_v3  ;;  %286 = vmatpush.msra.mxu2 %v273_v11  ;;  %v271_v20 = vld [vmem:[%s4820_s8 + $0x28] sm:$0xff]  ;;  %v231_v22 = vld [vmem:[%s4818_s6] sm:$0xff]  ;;  %v269_v35 = vld [vmem:[%s4820_s8 + $0x18] sm:$0xff]  ;;  %vm174_vm6 = vcmask 1046528   ;;  %vm201_vm7 = vcmask 523264  }
  0x1a   :  { %s2967_s2 = sld [smem:[#allocation3 + $0x3]]  ;;  %v270_v28 = vld [vmem:[%s4820_s8 + $0x20] sm:$0xff]  ;;  %v268_v42 = vld [vmem:[%s4820_s8 + $0x10] sm:$0xff]  ;;  %v267_v49 = vld [vmem:[%s4820_s8 + $0x8] sm:$0xff] }
  0x1b   :  { %s2975_s4 = sld [smem:[#allocation3 + $0x4]]  ;;  %253 = vmatpush.msra.mxu1 %v236_v5  ;;  %287 = vmatpush.msra.mxu2 %v272_v13  ;;  %v266_v60 = vld [vmem:[%s4820_s8] sm:$0xff] }
  0x1c   :  { %v196_v0 = vld [vmem:[%s4848_s3 + $0x38] sm:$0xff]  ;;  %v195_v2 = vld [vmem:[%s4848_s3 + $0x30] sm:$0xff]  ;;  %v194_v4 = vld [vmem:[%s4848_s3 + $0x28] sm:$0xff]  ;;  %s2980_s21 = sld [smem:[#allocation3 + $0x5]] }
  0x1d   :  { %216 = vmatpush.msra.mxu0 %v196_v0  ;;  %v193_v6 = vld [vmem:[%s4848_s3 + $0x20] sm:$0xff]  ;;  %v192_v8 = vld [vmem:[%s4848_s3 + $0x18] sm:$0xff]  ;;  %v191_v10 = vld [vmem:[%s4848_s3 + $0x10] sm:$0xff]  ;;  %s4849_s28 = sld [smem:[#allocation9_spill]]  ;;  %254 = vmatpush.msra.mxu1 %v235_v7 }
  0x1e   :  { %s2992_s19 = sld [smem:[#allocation3 + $0x6]]  ;;  %v190_v14 = vld [vmem:[%s4848_s3 + $0x8] sm:$0xff]  ;;  %v189_v21 = vld [vmem:[%s4848_s3] sm:$0xff]  ;;  %288 = vmatpush.msra.mxu2 %v271_v20 }
  0x1f   :  { %217 = vmatpush.msra.mxu0 %v195_v2  ;;  %s3019_s25 = sld [smem:[#allocation3 + $0x8]]  ;;  %255 = vmatpush.msra.mxu1 %v234_v9 }
  0x20   :  { %s3025_s17 = sld [smem:[#allocation3 + $0x9]]  ;;  %289 = vmatpush.msra.mxu2 %v270_v28 }
  0x21   :  { %218 = vmatpush.msra.mxu0 %v194_v4  ;;  %s3040_s18 = sld [smem:[#allocation3 + $0xa]]  ;;  %256 = vmatpush.msra.mxu1 %v233_v12 }
  0x22   :  { %s3047_s6 = sld [smem:[#allocation3 + $0xb]]  ;;  %290 = vmatpush.msra.mxu2 %v269_v35 }
  0x23   :  { %s73_s20 = scalar_lea.vmem %s4849_s28, %s2952_s29  ;;  %219 = vmatpush.msra.mxu0 %v193_v6  ;;  %s76_s26 = scalar_lea.vmem %s4849_s28, %s2957_s0  ;;  %257 = vmatpush.msra.mxu1 %v232_v15 }
  0x24   :  { %s3004_s29 = sld [smem:[#allocation3 + $0x7]]  ;;  %v74_v16 = vld [vmem:[%s73_s20] sm:$0x1]  ;;  %s79_s23 = scalar_lea.vmem %s4849_s28, %s2965_s24  ;;  %291 = vmatpush.msra.mxu2 %v268_v42 }
  0x25   :  { %v77_v17 = vld [vmem:[%s76_s26] sm:$0x1]  ;;  %220 = vmatpush.msra.mxu0 %v192_v8  ;;  %s82_s13 = scalar_lea.vmem %s4849_s28, %s2967_s2  ;;  %s85_s2 = scalar_lea.vmem %s4849_s28, %s2975_s4  ;;  %258 = vmatpush.msra.mxu1 %v231_v22 }
  0x26   :  { %v80_v18 = vld [vmem:[%s79_s23] sm:$0x1]  ;;  %v121_v19 = vrot.slane %v77_v17, 7  ;;  %s88_s3 = scalar_lea.vmem %s4849_s28, %s2980_s21  ;;  %s91_s24 = scalar_lea.vmem %s4849_s28, %s2992_s19  ;;  %292 = vmatpush.msra.mxu2 %v267_v49 }
  0x27   :  { %v83_v23 = vld [vmem:[%s82_s13] sm:$0x1]  ;;  %v124_v24 = vrot.slane %v80_v18, 6  ;;  %221 = vmatpush.msra.mxu0 %v191_v10  ;;  %s3057_s21 = sld [smem:[#allocation3 + $0xc]]  ;;  %s100_s1 = scalar_lea.vmem %s4849_s28, %s3025_s17 }
  0x28   :  { %v86_v25 = vld [vmem:[%s85_s2] sm:$0x1]  ;;  %v127_v26 = vrot.slane %v83_v23, 5  ;;  %v163_v27 = vsel %vm162_vm0, %v74_v16, %v121_v19  ;;  %s3064_s19 = sld [smem:[#allocation3 + $0xd]]  ;;  %s103_s27 = scalar_lea.vmem %s4849_s28, %s3040_s18  ;;  %293 = vmatpush.msra.mxu2 %v266_v60 }
  0x29   :  { %v89_v29 = vld [vmem:[%s88_s3] sm:$0x1]  ;;  %v130_v30 = vrot.slane %v86_v25, 4  ;;  %v165_v31 = vsel %vm164_vm1, %v163_v27, %v124_v24  ;;  %222 = vmatpush.msra.mxu0 %v190_v14  ;;  %s3074_s3 = sld [smem:[#allocation3 + $0xe]]  ;;  %s106_s13 = scalar_lea.vmem %s4849_s28, %s3047_s6 }
  0x2a   :  { %v92_v32 = vld [vmem:[%s91_s24] sm:$0x1]  ;;  %s94_s22 = scalar_lea.vmem %s4849_s28, %s3004_s29  ;;  %v133_v33 = vrot.slane %v89_v29, 3  ;;  %v167_v34 = vsel %vm166_vm2, %v165_v31, %v127_v26  ;;  %s97_s29 = scalar_lea.vmem %s4849_s28, %s3019_s25 }
  0x2b   :  { %v95_v36 = vld [vmem:[%s94_s22] sm:$0x1]  ;;  %v136_v37 = vrot.slane %v92_v32, 2  ;;  %v169_v38 = vsel %vm168_vm3, %v167_v34, %v130_v30  ;;  %223 = vmatpush.msra.mxu0 %v189_v21  ;;  %s4850_s4 = sld [smem:[#allocation10_spill]] }
  0x2c   :  { %v139_v39 = vrot.slane %v95_v36, 1  ;;  %v171_v40 = vsel %vm170_vm4, %v169_v38, %v133_v33  ;;  %s3084_s0 = sld [smem:[#allocation3 + $0xf]]  ;;  %v98_v44 = vld [vmem:[%s97_s29] sm:$0x1] }
  0x2d   :  { %v173_v43 = vsel %vm172_vm5, %v171_v40, %v136_v37  ;;  %v101_v45 = vld [vmem:[%s100_s1] sm:$0x1]  ;;  %s109_s18 = scalar_lea.vmem %s4849_s28, %s3057_s21 }
  0x2e   :  { %v175_v46 = vsel %vm174_vm6, %v173_v43, %v139_v39  ;;  %v104_v47 = vld [vmem:[%s103_s27] sm:$0x1]  ;;  %v142_v48 = vrot.slane %v101_v45, 7  ;;  %s112_s6 = scalar_lea.vmem %s4849_s28, %s3064_s19 }
  0x2f   :  { %v183_v50 = vmul.f32 8.0, %v175_v46  ;;  %v107_v51 = vld [vmem:[%s106_s13] sm:$0x1]  ;;  %v145_v52 = vrot.slane %v104_v47, 6  ;;  %s115_s2 = scalar_lea.vmem %s4849_s28, %s3074_s3 }
  0x30   :  { %v110_v53 = vld [vmem:[%s109_s18] sm:$0x1]  ;;  %v148_v54 = vrot.slane %v107_v51, 5  ;;  %v176_v55 = vsel %vm162_vm0, %v98_v44, %v142_v48 }
  0x31   :  { %v185_v41 = vld [vmem:[%s4850_s4] sm:$0xff]  ;;  %v151_v58 = vrot.slane %v110_v53, 4  ;;  %v177_v59 = vsel %vm164_vm1, %v176_v55, %v145_v52 }
  0x32   :  { %v3111_v56 = vadd.f32 %v185_v41, %v183_v50  ;;  %v113_v57 = vld [vmem:[%s112_s6] sm:$0x1]  ;;  %s118_s20 = scalar_lea.vmem %s4849_s28, %s3084_s0  ;;  %v178_v63 = vsel %vm166_vm2, %v177_v59, %v148_v54 }
  0x33   :  { %v116_v61 = vld [vmem:[%s115_s2] sm:$0x1]  ;;  %v154_v62 = vrot.slane %v113_v57, 3  ;;  %v179_v2 = vsel %vm168_vm3, %v178_v63, %v151_v58 }
  0x34   :  { %2553 = vmatmul.msk.f32.vlgmr.msra.gmra.mxu0 %vm201_vm7, %v3111_v56  ;;  %2555 = vmatmul.msk.f32.vlgmr.msra.gmra.mxu1 %vm201_vm7, %v3111_v56  ;;  %v119_v0 = vld [vmem:[%s118_s20] sm:$0x1]  ;;  %v157_v1 = vrot.slane %v116_v61, 2 }
  0x35   :  { %v160_v3 = vrot.slane %v119_v0, 1  ;;  %v180_v4 = vsel %vm170_vm4, %v179_v2, %v154_v62 }
  0x36   :  { %33 = vsyncpa [#allocation5], 0  ;;  %v181_v5 = vsel %vm172_vm5, %v180_v4, %v157_v1  ;;  %2557 = vmatmul.msk.f32.vlgmr.msra.gmra.mxu2 %vm201_vm7, %v3111_v56  ;;  %v186_v7 = vld [vmem:[%s4850_s4 + $0x8] sm:$0xff]  ;;  %v2694_v10 = vld [vmem:[%s4817_s5] ss:$0 sm:$0xff]  ;;  %s2818_s4 = smov 112  }
  0x37   :  { %v182_v6 = vsel %vm174_vm6, %v181_v5, %v160_v3  ;;  %v2695_v11 = vld [vmem:[%s4819_s7] ss:$0 sm:$0xff]  ;;  %s2819_s30 = smov 120   ;;  %vm407_vm8 = vcmask 64512   ;;  %s2820_s5 = smov 104   ;;  %vm656_vm9 = vcmask 130048  }
  0x38   :  { %v184_v8 = vmul.f32 8.0, %v182_v6  ;;  %s2821_s7 = smov 96   ;;  %s2822_s29 = smov 88   ;;  %v2696_v21 = vld [vmem:[%s4821_s9] ss:$0 sm:$0xff]  ;;  %vm1125_vm10 = vcmask 195584  }
  0x39   :  { %s2823_s24 = smov 80   ;;  %s2824_s18 = smov 72   ;;  %vm1128_vm11 = vcmask 261120   ;;  %vm1131_vm12 = vcmask 326656   ;;  %vm1134_vm13 = vcmask 392192   ;;  %vm1137_vm14 = vcmask 457728  }
  0x3a   :  { %v3139_v9 = vadd.f32 %v186_v7, %v184_v8  ;;  %s4851_s22 = sld [smem:[#allocation11_spill]]  ;;  %s2825_s21 = smov 16  }
  0x3b   :  { %s2826_s27 = smov 24   ;;  %s2827_s19 = smov 48  }
  0x3c   :  { %2556 = vmatmul.msk.f32.gmra.mxu1 %vm201_vm7, %v3139_v9  ;;  %2554 = vmatmul.msk.f32.gmra.mxu0 %vm201_vm7, %v3139_v9  ;;  %s2828_s17 = smov 8   ;;  %s2829_s20 = smov 32  }
  0x3d   :  { %s2830_s8 = smov 56   ;;  %s2831_s28 = smov 40  }
  0x3e   :  { %2558 = vmatmul.msk.f32.gmra.mxu2 %vm201_vm7, %v3139_v9  ;;  %s4856_s26 = sld [smem:[#allocation17_spill]] }
  0x40   :  { %v3211_v41 = vld [vmem:[%s4851_s22] sm:$0xff]  ;;  %v3225_v48 = vld [vmem:[%s4851_s22 + $0x8] sm:$0xff] }
  0xb1   :  { %v225_v12 = vpop.f32.mrf.mxu0  ;;  %v260_v13 = vpop.f32.mrf.mxu1 }
  0xb2   :  { %v226_v14 = vadd.f32 %v2694_v10, %v225_v12  ;;  %v261_v15 = vadd.f32 %v2695_v11, %v260_v13 }
  0xb4   :  { %337 = vrot.lane.b32.xlu2 %v261_v15, %s2818_s4  ;;  %333 = vrot.lane.b32.xlu0 %v261_v15, %s2819_s30 }
  0xb5   :  { %303 = vrot.lane.b32.xlu1 %v226_v14, %s2819_s30 }
  0xb9   :  { %v263_v16 = vpop.f32.mrf.mxu1  ;;  %v228_v18 = vpop.f32.mrf.mxu0 }
  0xba   :  { %v264_v17 = vadd.f32 %v2695_v11, %v263_v16  ;;  %v229_v19 = vadd.f32 %v2694_v10, %v228_v18  ;;  %v295_v20 = vpop.f32.mrf.mxu2 }
  0xbb   :  { %v3187_v23 = vadd.f32 %v2696_v21, %v295_v20 }
  0xbc   :  { %2559 = vmatpush.xpose.msk.msra.mxu3 %vm407_vm8, %v264_v17  ;;  %341 = vrot.lane.b32.xlu0 %v261_v15, %s2820_s5 }
  0xbd   :  { %307 = vrot.lane.b32.xlu2 %v226_v14, %s2818_s4  ;;  %345 = vrot.lane.b32.xlu1 %v261_v15, %s2821_s7 }
  0xc0   :  { %2560 = vmatpush.xpose.msk.msra.mxu3 %vm407_vm8, %v261_v15 }
  0xc2   :  { %v298_v22 = vpop.f32.mrf.mxu2 }
  0xc3   :  { %2561 = vmatmul.msk.f32.vlgmr.msra.gmra.mxu3 %vm407_vm8, %v226_v14  ;;  %v299_v24 = vadd.f32 %v2696_v21, %v298_v22 }
  0xc4   :  { %349 = vrot.lane.b32.xlu0 %v261_v15, %s2822_s29 }
  0xc5   :  { %315 = vrot.lane.b32.xlu2 %v226_v14, %s2821_s7  ;;  %311 = vrot.lane.b32.xlu1 %v226_v14, %s2820_s5  ;;  %v3190_v25 = vpack.i.bf16 %v3187_v23, %v299_v24 }
  0xcb   :  { %2562 = vmatmul.msk.f32.gmra.mxu3 %vm407_vm8, %v229_v19 }
  0xcc   :  { %335 = vrot.lane.b32.xlu0 %v264_v17, %s2819_s30 }
  0xcd   :  { %343 = vrot.lane.b32.xlu2 %v264_v17, %s2820_s5  ;;  %353 = vrot.lane.b32.xlu1 %v261_v15, %s2823_s24 }
  0xd4   :  { %319 = vrot.lane.b32.xlu0 %v226_v14, %s2822_s29 }
  0xd5   :  { %305 = vrot.lane.b32.xlu2 %v229_v19, %s2819_s30  ;;  %339 = vrot.lane.b32.xlu1 %v264_v17, %s2818_s4 }
  0xdc   :  { %347 = vrot.lane.b32.xlu0 %v264_v17, %s2821_s7 }
  0xdd   :  { %313 = vrot.lane.b32.xlu2 %v229_v19, %s2820_s5  ;;  %351 = vrot.lane.b32.xlu1 %v264_v17, %s2822_s29 }
  0xe4   :  { %355 = vrot.lane.b32.xlu0 %v264_v17, %s2823_s24 }
  0xe5   :  { %359 = vrot.lane.b32.xlu2 %v264_v17, %s2824_s18  ;;  %309 = vrot.lane.b32.xlu1 %v229_v19, %s2818_s4 }
  0xec   :  { %321 = vrot.lane.b32.xlu0 %v229_v19, %s2822_s29 }
  0xed   :  { %357 = vrot.lane.b32.xlu2 %v261_v15, %s2824_s18  ;;  %317 = vrot.lane.b32.xlu1 %v229_v19, %s2821_s7 }
  0xf4   :  { %323 = vrot.lane.b32.xlu0 %v226_v14, %s2823_s24 }
  0xf5   :  { %325 = vrot.lane.b32.xlu2 %v229_v19, %s2823_s24  ;;  %327 = vrot.lane.b32.xlu1 %v226_v14, %s2824_s18 }
  0xfc   :  { %329 = vrot.lane.b32.xlu0 %v229_v19, %s2824_s18 }
  0xfd   :  { %2665 = vrot.lane.b32.xlu1 %v3190_v25, %s2818_s4  ;;  %2680 = vrot.lane.b32.xlu2 %v3190_v25, %s2822_s29  ;;  %s2510_s4 = sshll.u32 %s4856_s26, 4  ;;  %s2511_s4 = int_to_ptr.hbm [resolvable:$true] %s2510_s4 }
 0x104   :  { %2660 = vrot.lane.b32.xlu0 %v3190_v25, %s2819_s30  ;;  %s2834_s30 = smov 128  }
 0x105   :  { %2675 = vrot.lane.b32.xlu1 %v3190_v25, %s2821_s7 }
 0x10c   :  { %2670 = vrot.lane.b32.xlu0 %v3190_v25, %s2820_s5 }
 0x10e   :  { %v338_v26 = vpop.permute.xlu2 %337 }
 0x117   :  { %v308_v27 = vpop.permute.xlu2 %307 }
 0x11f   :  { %v316_v28 = vpop.permute.xlu2 %315 }
 0x126   :  { %v334_v29 = vpop.permute.xlu0 %333 }
 0x127   :  { %v344_v30 = vpop.permute.xlu2 %343  ;;  %v304_v31 = vpop.permute.xlu1 %303 }
 0x128   :  { %2571 = vmatpush.xpose.msk.msrb.mxu1 %vm407_vm8, %v344_v30 }
 0x12e   :  { %v342_v32 = vpop.permute.xlu0 %341 }
 0x12f   :  { %v306_v33 = vpop.permute.xlu2 %305  ;;  %v346_v34 = vpop.permute.xlu1 %345  ;;  %2572 = vmatpush.xpose.msk.msrb.mxu1 %vm407_vm8, %v342_v32 }
 0x136   :  { %v350_v35 = vpop.permute.xlu0 %349 }
 0x137   :  { %v314_v36 = vpop.permute.xlu2 %313  ;;  %v312_v37 = vpop.permute.xlu1 %311 }
 0x138   :  { %2573 = vmatmul.msk.f32.vlgmr.msrb.gmra.mxu1 %vm407_vm8, %v312_v37 }
 0x13e   :  { %v336_v38 = vpop.permute.xlu0 %335 }
 0x13f   :  { %v360_v39 = vpop.permute.xlu2 %359  ;;  %v354_v40 = vpop.permute.xlu1 %353  ;;  %2563 = vmatpush.xpose.msk.msrb.mxu3 %vm407_vm8, %v336_v38 }
 0x140   :  { %2587 = vmatpush.xpose.msk.msra.mxu1 %vm407_vm8, %v360_v39 }
 0x141   :  { %2574 = vmatmul.msk.f32.gmra.mxu1 %vm407_vm8, %v314_v36 }
 0x143   :  { %2564 = vmatpush.xpose.msk.msrb.mxu3 %vm407_vm8, %v334_v29 }
 0x146   :  { %v320_v42 = vpop.permute.xlu0 %319  ;;  %v433_v43 = vpop.f32.mrf.mxu3  ;;  %2565 = vmatmul.msk.f32.vlgmr.msrb.gmra.mxu3 %vm407_vm8, %v304_v31 }
 0x147   :  { %v358_v44 = vpop.permute.xlu2 %357  ;;  %v340_v45 = vpop.permute.xlu1 %339  ;;  %v3215_v46 = vadd.f32 %v433_v43, %v3211_v41 }
 0x148   :  { %2567 = vmatpush.xpose.msk.msrb.mxu0 %vm407_vm8, %v340_v45  ;;  %2588 = vmatpush.xpose.msk.msra.mxu1 %vm407_vm8, %v358_v44 }
 0x149   :  { %v657_v47 = vsel %vm656_vm9, %v3215_v46, -inf }
 0x14a   :  { %658 = vmax.xlane.f32.xlu1 %v657_v47 }
 0x14c   :  { %2568 = vmatpush.xpose.msk.msrb.mxu0 %vm407_vm8, %v338_v26 }
 0x14e   :  { %v348_v49 = vpop.permute.xlu0 %347  ;;  %v436_v50 = vpop.f32.mrf.mxu3  ;;  %2566 = vmatmul.msk.f32.gmra.mxu3 %vm407_vm8, %v306_v33 }
 0x14f   :  { %2569 = vmatmul.msk.f32.vlgmr.msrb.gmra.mxu0 %vm407_vm8, %v308_v27  ;;  %v352_v51 = vpop.permute.xlu1 %351  ;;  %v3230_v52 = vadd.f32 %v436_v50, %v3225_v48  ;;  %2575 = vmatpush.xpose.msk.msrb.mxu2 %vm407_vm8, %v348_v49  ;;  %v326_v61 = vpop.permute.xlu2 %325 }
 0x150   :  { %2579 = vmatpush.xpose.msk.msra.mxu3 %vm407_vm8, %v352_v51 }
 0x151   :  { %v660_v53 = vsel %vm656_vm9, %v3230_v52, -inf }
 0x152   :  { %661 = vmax.xlane.f32.xlu0 %v660_v53 }
 0x153   :  { %2576 = vmatpush.xpose.msk.msrb.mxu2 %vm407_vm8, %v346_v34 }
 0x154   :  { %2580 = vmatpush.xpose.msk.msra.mxu3 %vm407_vm8, %v350_v35 }
 0x156   :  { %v356_v54 = vpop.permute.xlu0 %355  ;;  %2577 = vmatmul.msk.f32.vlgmr.msrb.gmra.mxu2 %vm407_vm8, %v316_v28 }
 0x157   :  { %853 = vmatpush.msra.mxu2 %v299_v24  ;;  %v310_v55 = vpop.permute.xlu1 %309  ;;  %2581 = vmatmul.msk.f32.vlgmr.msra.gmra.mxu3 %vm407_vm8, %v320_v42  ;;  %v2681_v20 = vpop.permute.xlu2 %2680 }
 0x158   :  { %2583 = vmatpush.xpose.msk.msra.mxu0 %vm407_vm8, %v356_v54  ;;  %v2683_v22 = vunpack.i.h.bf16 %v2681_v20 }
 0x159   :  { %2570 = vmatmul.msk.f32.gmra.mxu0 %vm407_vm8, %v310_v55  ;;  %854 = vmatpush.msra.mxu2 %v3187_v23  ;;  %v2682_v23 = vunpack.i.l.bf16 %v2681_v20 }
 0x15c   :  { %2584 = vmatpush.xpose.msk.msra.mxu0 %vm407_vm8, %v354_v40 }
 0x15e   :  { %v322_v57 = vpop.permute.xlu0 %321 }
 0x15f   :  { %v318_v58 = vpop.permute.xlu1 %317  ;;  %2582 = vmatmul.msk.f32.gmra.mxu3 %vm407_vm8, %v322_v57 }
 0x160   :  { %2578 = vmatmul.msk.f32.gmra.mxu2 %vm407_vm8, %v318_v58 }
 0x166   :  { %v324_v59 = vpop.permute.xlu0 %323 }
 0x167   :  { %v328_v60 = vpop.permute.xlu1 %327  ;;  %2585 = vmatmul.msk.f32.vlgmr.msra.gmra.mxu0 %vm407_vm8, %v324_v59 }
 0x168   :  { %2589 = vmatmul.msk.f32.vlgmr.msra.gmra.mxu1 %vm407_vm8, %v328_v60 }
 0x16e   :  { %v330_v62 = vpop.permute.xlu0 %329 }
 0x16f   :  { %2586 = vmatmul.msk.f32.gmra.mxu0 %vm407_vm8, %v326_v61  ;;  %v2666_v63 = vpop.permute.xlu1 %2665 }
 0x170   :  { %2590 = vmatmul.msk.f32.gmra.mxu1 %vm407_vm8, %v330_v62  ;;  %v2668_v0 = vunpack.i.h.bf16 %v2666_v63  ;;  %v2667_v1 = vunpack.i.l.bf16 %v2666_v63 }
 0x172   :  { %911 = vmatpush.msrb.mxu0 %v2667_v1 }
 0x174   :  { %912 = vmatpush.msrb.mxu0 %v2668_v0 }
 0x176   :  { %v2661_v2 = vpop.permute.xlu0 %2660 }
 0x177   :  { %v2676_v3 = vpop.permute.xlu1 %2675  ;;  %v2663_v4 = vunpack.i.h.bf16 %v2661_v2  ;;  %v2662_v5 = vunpack.i.l.bf16 %v2661_v2 }
 0x178   :  { %v2678_v6 = vunpack.i.h.bf16 %v2676_v3  ;;  %v2677_v7 = vunpack.i.l.bf16 %v2676_v3 }
 0x179   :  { %882 = vmatpush.msrb.mxu3 %v2662_v5 }
 0x17a   :  { %969 = vmatpush.msrb.mxu2 %v2677_v7 }
 0x17b   :  { %883 = vmatpush.msrb.mxu3 %v2663_v4 }
 0x17c   :  { %970 = vmatpush.msrb.mxu2 %v2678_v6 }
 0x17d   :  { %998 = vmatpush.msra.mxu3 %v2682_v23 }
 0x17e   :  { %v2671_v8 = vpop.permute.xlu0 %2670 }
 0x17f   :  { %v2673_v10 = vunpack.i.h.bf16 %v2671_v8  ;;  %v2672_v11 = vunpack.i.l.bf16 %v2671_v8  ;;  %999 = vmatpush.msra.mxu3 %v2683_v22 }
 0x181   :  { %940 = vmatpush.msrb.mxu1 %v2672_v11 }
 0x183   :  { %941 = vmatpush.msrb.mxu1 %v2673_v10 }
 0x1b5   :  { %v526_v16 = vpop.f32.mrf.mxu1 }
 0x1b6   :  { %v3258_v18 = vadd.f32 %v526_v16, %v3211_v41 }
 0x1b8   :  { %v675_v24 = vsel %vm656_vm9, %v3258_v18, -inf }
 0x1bd   :  { %v659_v45 = vpop.xlane.xlu1 %658 }
 0x1be   :  { %v529_v33 = vpop.f32.mrf.mxu1  ;;  %v705_v49 = vsub.f32 %v3215_v46, %v659_v45 }
 0x1bf   :  { %v3286_v37 = vadd.f32 %v529_v33, %v3225_v48 }
 0x1c0   :  { %v721_v54 = vmul.f32 1.442695, %v705_v49 }
 0x1c1   :  { %v678_v44 = vsel %vm656_vm9, %v3286_v37, -inf }
 0x1c2   :  { %2703 = vpow2.f32 %v721_v54 }
 0x1c5   :  { %v662_v57 = vpop.xlane.xlu0 %661 }
 0x1c6   :  { %v706_v61 = vsub.f32 %v3230_v52, %v662_v57 }
 0x1c8   :  { %v723_v0 = vmul.f32 1.442695, %v706_v61  ;;  %v3324_v3 = vpop.eup %2703 }
 0x1c9   :  { %v464_v12 = vpop.f32.mrf.mxu3 }
 0x1ca   :  { %v3271_v30 = vadd.f32 %v464_v12, %v3211_v41  ;;  %2705 = vpow2.f32 %v723_v0 }
 0x1cc   :  { %v495_v13 = vpop.f32.mrf.mxu0  ;;  %v663_v34 = vsel %vm656_vm9, %v3271_v30, -inf }
 0x1cd   :  { %v3253_v14 = vadd.f32 %v495_v13, %v3211_v41 }
 0x1cf   :  { %v669_v15 = vsel %vm656_vm9, %v3253_v14, -inf }
 0x1d0   :  { %670 = vmax.xlane.f32.xlu2 %v669_v15  ;;  %v3328_v52 = vpop.eup %2705 }
 0x1d1   :  { %v467_v17 = vpop.f32.mrf.mxu3  ;;  %v756_v4 = vsel %vm656_vm9, %v3328_v52, 0.0 }
 0x1d2   :  { %v3281_v35 = vadd.f32 %v467_v17, %v3225_v48 }
 0x1d4   :  { %v666_v39 = vsel %vm656_vm9, %v3281_v35, -inf }
 0x1d6   :  { %v498_v19 = vpop.f32.mrf.mxu0 }
 0x1d7   :  { %v3261_v21 = vadd.f32 %v498_v19, %v3225_v48 }
 0x1d8   :  { %676 = vmax.xlane.f32.xlu2 %v675_v24 }
 0x1d9   :  { %v672_v26 = vsel %vm656_vm9, %v3261_v21, -inf  ;;  %v557_v27 = vpop.f32.mrf.mxu2 }
 0x1da   :  { %673 = vmax.xlane.f32.xlu0 %v672_v26  ;;  %v3268_v28 = vadd.f32 %v557_v27, %v3211_v41  ;;  %v588_v29 = vpop.f32.mrf.mxu3 }
 0x1db   :  { %v3274_v31 = vadd.f32 %v588_v29, %v3211_v41 }
 0x1dc   :  { %v681_v32 = vsel %vm656_vm9, %v3268_v28, -inf }
 0x1dd   :  { %682 = vmax.xlane.f32.xlu1 %v681_v32  ;;  %v687_v36 = vsel %vm656_vm9, %v3274_v31, -inf }
 0x1e0   :  { %664 = vmax.xlane.f32.xlu2 %v663_v34 }
 0x1e2   :  { %688 = vmax.xlane.f32.xlu0 %v687_v36  ;;  %v591_v60 = vpop.f32.mrf.mxu3 }
 0x1e3   :  { %v560_v38 = vpop.f32.mrf.mxu2  ;;  %v3316_v63 = vadd.f32 %v591_v60, %v3225_v48 }
 0x1e4   :  { %v619_v42 = vpop.f32.mrf.mxu0  ;;  %v3291_v43 = vadd.f32 %v560_v38, %v3225_v48 }
 0x1e5   :  { %v650_v40 = vpop.f32.mrf.mxu1  ;;  %667 = vmax.xlane.f32.xlu1 %v666_v39  ;;  %v3299_v50 = vadd.f32 %v619_v42, %v3211_v41  ;;  %v690_v2 = vsel %vm656_vm9, %v3316_v63, -inf }
 0x1e6   :  { %v684_v47 = vsel %vm656_vm9, %v3291_v43, -inf  ;;  %v3307_v58 = vadd.f32 %v650_v40, %v3211_v41 }
 0x1e7   :  { %v693_v55 = vsel %vm656_vm9, %v3299_v50, -inf }
 0x1e8   :  { %679 = vmax.xlane.f32.xlu2 %v678_v44  ;;  %v699_v41 = vsel %vm656_vm9, %v3307_v58, -inf }
 0x1ec   :  { %v622_v59 = vpop.f32.mrf.mxu0 }
 0x1ed   :  { %v653_v51 = vpop.f32.mrf.mxu1  ;;  %685 = vmax.xlane.f32.xlu1 %v684_v47  ;;  %v3313_v62 = vadd.f32 %v622_v59, %v3225_v48 }
 0x1ee   :  { %v3302_v53 = vadd.f32 %v653_v51, %v3225_v48  ;;  %v753_v48 = vsel %vm656_vm9, %v3324_v3, 0.0 }
 0x1ef   :  { %v696_v1 = vsel %vm656_vm9, %v3313_v62, -inf }
 0x1f0   :  { %694 = vmax.xlane.f32.xlu2 %v693_v55  ;;  %v702_v46 = vsel %vm656_vm9, %v3302_v53, -inf }
 0x1f1   :  { %703 = vmax.xlane.f32.xlu0 %v702_v46 }
 0x1f5   :  { %700 = vmax.xlane.f32.xlu1 %v699_v41 }
 0x1f8   :  { %697 = vmax.xlane.f32.xlu2 %v696_v1 }
 0x1f9   :  { %691 = vmax.xlane.f32.xlu0 %v690_v2 }
 0x1fd   :  { %754 = vadd.xlane.f32.xlu1 %v753_v48 }
 0x205   :  { %757 = vadd.xlane.f32.xlu1 %v756_v4 }
 0x20d   :  { %2685 = vrot.lane.b32.xlu0 %v3190_v25, %s2823_s24 }
 0x243   :  { %v671_v5 = vpop.xlane.xlu2 %670 }
 0x244   :  { %v709_v6 = vsub.f32 %v3253_v14, %v671_v5 }
 0x246   :  { %v729_v7 = vmul.f32 1.442695, %v709_v6 }
 0x248   :  { %2707 = vpow2.f32 %v729_v7 }
 0x24b   :  { %v677_v8 = vpop.xlane.xlu2 %676 }
 0x24c   :  { %v711_v10 = vsub.f32 %v3258_v18, %v677_v8 }
 0x24d   :  { %v674_v17 = vpop.xlane.xlu0 %673 }
 0x24e   :  { %v3336_v11 = vpop.eup %2707  ;;  %v733_v12 = vmul.f32 1.442695, %v711_v10  ;;  %v710_v18 = vsub.f32 %v3261_v21, %v674_v17 }
 0x24f   :  { %v765_v13 = vsel %vm656_vm9, %v3336_v11, 0.0 }
 0x250   :  { %2709 = vpow2.f32 %v733_v12  ;;  %766 = vadd.xlane.f32.xlu2 %v765_v13  ;;  %v683_v15 = vpop.xlane.xlu1 %682 }
 0x251   :  { %v713_v16 = vsub.f32 %v3268_v28, %v683_v15  ;;  %v731_v28 = vmul.f32 1.442695, %v710_v18 }
 0x253   :  { %v737_v19 = vmul.f32 1.442695, %v713_v16  ;;  %v665_v20 = vpop.xlane.xlu2 %664 }
 0x254   :  { %v707_v14 = vsub.f32 %v3271_v30, %v665_v20 }
 0x255   :  { %2711 = vpow2.f32 %v737_v19  ;;  %v689_v30 = vpop.xlane.xlu0 %688 }
 0x256   :  { %v3342_v22 = vpop.eup %2709  ;;  %v725_v23 = vmul.f32 1.442695, %v707_v14  ;;  %v715_v54 = vsub.f32 %v3274_v31, %v689_v30 }
 0x257   :  { %v771_v24 = vsel %vm656_vm9, %v3342_v22, 0.0 }
 0x258   :  { %2713 = vpow2.f32 %v725_v23  ;;  %772 = vadd.xlane.f32.xlu2 %v771_v24  ;;  %v668_v26 = vpop.xlane.xlu1 %667  ;;  %v741_v59 = vmul.f32 1.442695, %v715_v54 }
 0x259   :  { %v708_v27 = vsub.f32 %v3281_v35, %v668_v26 }
 0x25b   :  { %v3348_v29 = vpop.eup %2711  ;;  %v727_v32 = vmul.f32 1.442695, %v708_v27  ;;  %v680_v33 = vpop.xlane.xlu2 %679 }
 0x25c   :  { %v777_v34 = vsel %vm656_vm9, %v3348_v29, 0.0  ;;  %v712_v36 = vsub.f32 %v3286_v37, %v680_v33 }
 0x25d   :  { %2715 = vpow2.f32 %v727_v32  ;;  %778 = vadd.xlane.f32.xlu0 %v777_v34 }
 0x25e   :  { %v3352_v21 = vpop.eup %2713  ;;  %2717 = vpow2.f32 %v731_v28  ;;  %v735_v40 = vmul.f32 1.442695, %v712_v36 }
 0x25f   :  { %v759_v38 = vsel %vm656_vm9, %v3352_v21, 0.0 }
 0x260   :  { %760 = vadd.xlane.f32.xlu2 %v759_v38  ;;  %v686_v35 = vpop.xlane.xlu1 %685 }
 0x261   :  { %v714_v39 = vsub.f32 %v3291_v43, %v686_v35 }
 0x263   :  { %v3358_v42 = vpop.eup %2715  ;;  %v739_v44 = vmul.f32 1.442695, %v714_v39  ;;  %v695_v45 = vpop.xlane.xlu2 %694 }
 0x264   :  { %v3360_v47 = vpop.eup %2717  ;;  %v717_v49 = vsub.f32 %v3299_v50, %v695_v45  ;;  %v704_v51 = vpop.xlane.xlu0 %703  ;;  %v762_v37 = vsel %vm656_vm9, %v3358_v42, 0.0 }
 0x265   :  { %2719 = vpow2.f32 %v739_v44  ;;  %763 = vadd.xlane.f32.xlu1 %v762_v37  ;;  %v768_v43 = vsel %vm656_vm9, %v3360_v47, 0.0  ;;  %v720_v10 = vsub.f32 %v3302_v53, %v704_v51 }
 0x266   :  { %2721 = vpow2.f32 %v735_v40  ;;  %v745_v55 = vmul.f32 1.442695, %v717_v49 }
 0x267   :  { %v751_v17 = vmul.f32 1.442695, %v720_v10 }
 0x268   :  { %2723 = vpow2.f32 %v745_v55  ;;  %769 = vadd.xlane.f32.xlu2 %v768_v43  ;;  %v701_v57 = vpop.xlane.xlu1 %700 }
 0x269   :  { %v719_v46 = vsub.f32 %v3307_v58, %v701_v57  ;;  %2725 = vpow2.f32 %v741_v59 }
 0x26b   :  { %v3369_v50 = vpop.eup %2719  ;;  %v749_v60 = vmul.f32 1.442695, %v719_v46  ;;  %v698_v61 = vpop.xlane.xlu2 %697 }
 0x26c   :  { %v3371_v41 = vpop.eup %2721  ;;  %v692_v31 = vpop.xlane.xlu0 %691  ;;  %v780_v0 = vsel %vm656_vm9, %v3369_v50, 0.0  ;;  %v718_v1 = vsub.f32 %v3313_v62, %v698_v61 }
 0x26d   :  { %781 = vadd.xlane.f32.xlu1 %v780_v0  ;;  %2727 = vpow2.f32 %v749_v60  ;;  %v716_v48 = vsub.f32 %v3316_v63, %v692_v31  ;;  %v774_v58 = vsel %vm656_vm9, %v3371_v41, 0.0 }
 0x26e   :  { %v3376_v2 = vpop.eup %2723  ;;  %v747_v6 = vmul.f32 1.442695, %v718_v1 }
 0x26f   :  { %v789_v4 = vsel %vm656_vm9, %v3376_v2, 0.0  ;;  %v743_v7 = vmul.f32 1.442695, %v716_v48  ;;  %v3383_v8 = vpop.eup %2725 }
 0x270   :  { %775 = vadd.xlane.f32.xlu2 %v774_v58  ;;  %790 = vadd.xlane.f32.xlu0 %v789_v4  ;;  %v755_v5 = vpop.xlane.xlu1 %754  ;;  %v783_v63 = vsel %vm656_vm9, %v3383_v8, 0.0 }
 0x271   :  { %2729 = vrcp.f32 %v755_v5 }
 0x272   :  { %2731 = vpow2.f32 %v747_v6 }
 0x273   :  { %v3385_v62 = vpop.eup %2727  ;;  %2733 = vpow2.f32 %v743_v7 }
 0x274   :  { %v795_v12 = vsel %vm656_vm9, %v3385_v62, 0.0 }
 0x277   :  { %v2730_v13 = vpop.eup %2729 }
 0x278   :  { %784 = vadd.xlane.f32.xlu2 %v783_v63  ;;  %796 = vadd.xlane.f32.xlu0 %v795_v12  ;;  %v758_v15 = vpop.xlane.xlu1 %757  ;;  %v817_v16 = vmul.f32 %v2730_v13, %v3324_v3  ;;  %v3393_v19 = vpop.eup %2731 }
 0x279   :  { %2735 = vrcp.f32 %v758_v15  ;;  %v3396_v53 = vpop.eup %2733  ;;  %v792_v23 = vsel %vm656_vm9, %v3393_v19, 0.0 }
 0x27a   :  { %2591 = vmatmul.msk.f32.vlgmr.msra.gmra.mxu2 %vm656_vm9, %v817_v16  ;;  %2737 = vpow2.f32 %v751_v17  ;;  %v786_v18 = vsel %vm656_vm9, %v3396_v53, 0.0 }
 0x27f   :  { %v2736_v20 = vpop.eup %2735  ;;  %v2686_v14 = vpop.permute.xlu0 %2685 }
 0x280   :  { %v2687_v24 = vunpack.i.l.bf16 %v2686_v14  ;;  %787 = vadd.xlane.f32.xlu2 %v786_v18  ;;  %793 = vadd.xlane.f32.xlu0 %v792_v23  ;;  %v818_v3 = vmul.f32 %v2736_v20, %v3328_v52  ;;  %v2688_v26 = vunpack.i.h.bf16 %v2686_v14  ;;  %v3404_v27 = vpop.eup %2737 }
 0x281   :  { %v798_v28 = vsel %vm656_vm9, %v3404_v27, 0.0 }
 0x282   :  { %1027 = vmatpush.msra.mxu0 %v2687_v24  ;;  %2592 = vmatmul.msk.f32.gmra.mxu2 %vm656_vm9, %v818_v3 }
 0x284   :  { %1028 = vmatpush.msra.mxu0 %v2688_v26 }
 0x286   :  { %2690 = vrot.lane.b32.xlu1 %v3190_v25, %s2824_s18 }
 0x288   :  { %799 = vadd.xlane.f32.xlu2 %v798_v28  ;;  %v1147_v28 = vld [vmem:[%s4822_s10 + $0x38] sm:$0xff] }
 0x289   :  { %1166 = vmatpush.msra.mxu2 %v1147_v28  ;;  %v1360_v28 = vld [vmem:[%s4826_s14 + $0x390] sm:$0xff] }
 0x2c3   :  { %v767_v32 = vpop.xlane.xlu2 %766 }
 0x2c4   :  { %2739 = vrcp.f32 %v767_v32  ;;  %v1146_v32 = vld [vmem:[%s4822_s10 + $0x30] sm:$0xff] }
 0x2c5   :  { %1167 = vmatpush.msra.mxu2 %v1146_v32  ;;  %v1361_v32 = vld [vmem:[%s4826_s14 + $0x398] sm:$0xff] }
 0x2ca   :  { %v2740_v33 = vpop.eup %2739 }
 0x2cb   :  { %v821_v30 = vmul.f32 %v2740_v33, %v3336_v11  ;;  %v773_v52 = vpop.xlane.xlu2 %772 }
 0x2cc   :  { %2741 = vrcp.f32 %v773_v52  ;;  %v1144_v52 = vld [vmem:[%s4822_s10 + $0x20] sm:$0xff] }
 0x2cd   :  { %2595 = vmatmul.msk.f32.vlgmr.msrb.gmra.mxu0 %vm656_vm9, %v821_v30  ;;  %v1145_v30 = vld [vmem:[%s4822_s10 + $0x28] sm:$0xff] }
 0x2ce   :  { %1168 = vmatpush.msra.mxu2 %v1145_v30  ;;  %v1343_v30 = vld [vmem:[%s4826_s14 + $0x308] sm:$0xff] }
 0x2d0   :  { %v779_v34 = vpop.xlane.xlu0 %778  ;;  %1169 = vmatpush.msra.mxu2 %v1144_v52  ;;  %v1344_v52 = vld [vmem:[%s4826_s14 + $0x310] sm:$0xff] }
 0x2d1   :  { %2743 = vrcp.f32 %v779_v34  ;;  %v1143_v34 = vld [vmem:[%s4822_s10 + $0x18] sm:$0xff] }
 0x2d2   :  { %v2742_v36 = vpop.eup %2741  ;;  %1170 = vmatpush.msra.mxu2 %v1143_v34  ;;  %v1345_v34 = vld [vmem:[%s4826_s14 + $0x318] sm:$0xff] }
 0x2d3   :  { %v823_v38 = vmul.f32 %v2742_v36, %v3342_v22  ;;  %v761_v35 = vpop.xlane.xlu2 %760  ;;  %v1142_v36 = vld [vmem:[%s4822_s10 + $0x10] sm:$0xff] }
 0x2d4   :  { %2745 = vrcp.f32 %v761_v35  ;;  %1171 = vmatpush.msra.mxu2 %v1142_v36  ;;  %v1141_v35 = vld [vmem:[%s4822_s10 + $0x8] sm:$0xff]  ;;  %v1326_v36 = vld [vmem:[%s4826_s14 + $0x280] sm:$0xff] }
 0x2d5   :  { %2597 = vmatmul.msk.f32.vlgmr.msrb.gmra.mxu1 %vm656_vm9, %v823_v38 }
 0x2d6   :  { %1172 = vmatpush.msra.mxu2 %v1141_v35  ;;  %v1328_v35 = vld [vmem:[%s4826_s14 + $0x290] sm:$0xff] }
 0x2d7   :  { %v2744_v25 = vpop.eup %2743 }
 0x2d8   :  { %v825_v39 = vmul.f32 %v2744_v25, %v3348_v29  ;;  %v764_v40 = vpop.xlane.xlu1 %763  ;;  %v1140_v25 = vld [vmem:[%s4822_s10] sm:$0xff] }
 0x2d9   :  { %2747 = vrcp.f32 %v764_v40  ;;  %1173 = vmatpush.msra.mxu2 %v1140_v25  ;;  %v1329_v25 = vld [vmem:[%s4826_s14 + $0x298] sm:$0xff] }
 0x2da   :  { %v2746_v44 = vpop.eup %2745  ;;  %2599 = vmatmul.msk.f32.vlgmr.msrb.gmra.mxu2 %vm656_vm9, %v825_v39 }
 0x2db   :  { %v819_v11 = vmul.f32 %v2746_v44, %v3352_v21  ;;  %v770_v45 = vpop.xlane.xlu2 %769  ;;  %1493 = vmatpush.msrb.mxu2 %v1361_v32  ;;  %v1269_v32 = vld [vmem:[%s4826_s14 + $0xb8] sm:$0xff] }
 0x2dc   :  { %2749 = vrcp.f32 %v770_v45 }
 0x2dd   :  { %2593 = vmatmul.msk.f32.vlgmr.msrb.gmra.mxu3 %vm656_vm9, %v819_v11  ;;  %1494 = vmatpush.msrb.mxu2 %v1345_v34 }
 0x2df   :  { %v2748_v49 = vpop.eup %2747  ;;  %1495 = vmatpush.msrb.mxu2 %v1329_v25 }
 0x2e0   :  { %v782_v22 = vpop.xlane.xlu1 %781  ;;  %v820_v55 = vmul.f32 %v2748_v49, %v3358_v42 }
 0x2e1   :  { %2751 = vrcp.f32 %v782_v22 }
 0x2e2   :  { %v2750_v51 = vpop.eup %2749 }
 0x2e3   :  { %v776_v37 = vpop.xlane.xlu2 %775  ;;  %v791_v54 = vpop.xlane.xlu0 %790  ;;  %v822_v29 = vmul.f32 %v2750_v51, %v3360_v47 }
 0x2e4   :  { %2753 = vrcp.f32 %v776_v37 }
 0x2e5   :  { %2755 = vrcp.f32 %v791_v54  ;;  %2594 = vmatmul.msk.f32.gmra.mxu3 %vm656_vm9, %v820_v55  ;;  %2596 = vmatmul.msk.f32.gmra.mxu0 %vm656_vm9, %v822_v29 }
 0x2e7   :  { %v2752_v21 = vpop.eup %2751 }
 0x2e8   :  { %v826_v43 = vmul.f32 %v2752_v21, %v3369_v50 }
 0x2ea   :  { %v2754_v57 = vpop.eup %2753  ;;  %2600 = vmatmul.msk.f32.gmra.mxu2 %vm656_vm9, %v826_v43 }
 0x2eb   :  { %v2756_v59 = vpop.eup %2755  ;;  %v785_v46 = vpop.xlane.xlu2 %784  ;;  %v824_v61 = vmul.f32 %v2754_v57, %v3371_v41 }
 0x2ec   :  { %v797_v60 = vpop.xlane.xlu0 %796  ;;  %v829_v42 = vmul.f32 %v2756_v59, %v3376_v2  ;;  %2757 = vrcp.f32 %v785_v46 }
 0x2ed   :  { %2598 = vmatmul.msk.f32.gmra.mxu1 %vm656_vm9, %v824_v61  ;;  %2759 = vrcp.f32 %v797_v60 }
 0x2ee   :  { %2603 = vmatmul.msk.f32.vlgmr.msra.gmra.mxu0 %vm656_vm9, %v829_v42 }
 0x2f2   :  { %v2758_v47 = vpop.eup %2757 }
 0x2f3   :  { %v827_v31 = vmul.f32 %v2758_v47, %v3383_v8  ;;  %v788_v50 = vpop.xlane.xlu2 %787  ;;  %v2760_v48 = vpop.eup %2759 }
 0x2f4   :  { %v794_v0 = vpop.xlane.xlu0 %793  ;;  %2761 = vrcp.f32 %v788_v50  ;;  %v831_v7 = vmul.f32 %v2760_v48, %v3385_v62 }
 0x2f5   :  { %2763 = vrcp.f32 %v794_v0  ;;  %2601 = vmatmul.msk.f32.vlgmr.msra.gmra.mxu3 %vm656_vm9, %v827_v31 }
 0x2f8   :  { %v2691_v1 = vpop.permute.xlu1 %2690 }
 0x2f9   :  { %v2692_v41 = vunpack.i.l.bf16 %v2691_v1  ;;  %v2693_v4 = vunpack.i.h.bf16 %v2691_v1 }
 0x2fa   :  { %v2762_v58 = vpop.eup %2761 }
 0x2fb   :  { %v2764_v2 = vpop.eup %2763  ;;  %v800_v5 = vpop.xlane.xlu2 %799  ;;  %1056 = vmatpush.msra.mxu1 %v2692_v41  ;;  %v828_v6 = vmul.f32 %v2762_v58, %v3396_v53  ;;  %v2697_v41 = vld [vmem:[%s4823_s11] ss:$0 sm:$0xff] }
 0x2fc   :  { %2765 = vrcp.f32 %v800_v5  ;;  %v830_v8 = vmul.f32 %v2764_v2, %v3393_v19 }
 0x2fd   :  { %2602 = vmatmul.msk.f32.gmra.mxu3 %vm656_vm9, %v828_v6  ;;  %1057 = vmatpush.msra.mxu1 %v2693_v4  ;;  %v856_v62 = vpop.f32.mrf.mxu2 }
 0x2fe   :  { %2604 = vmatmul.msk.f32.gmra.mxu0 %vm656_vm9, %v830_v8  ;;  %2605 = vmatmul.msk.f32.vlgmr.msra.gmra.mxu1 %vm656_vm9, %v831_v7 }
 0x2ff   :  { %1470 = vmatpush.msrb.mxu1 %v1360_v28  ;;  %v1268_v28 = vld [vmem:[%s4826_s14 + $0xb0] sm:$0xff] }
 0x301   :  { %1471 = vmatpush.msrb.mxu1 %v1344_v52 }
 0x302   :  { %v2766_v10 = vpop.eup %2765 }
 0x303   :  { %v832_v63 = vmul.f32 %v2766_v10, %v3404_v27  ;;  %1472 = vmatpush.msrb.mxu1 %v1328_v35 }
 0x305   :  { %v859_v16 = vpop.f32.mrf.mxu2 }
 0x306   :  { %2606 = vmatmul.msk.f32.gmra.mxu1 %vm656_vm9, %v832_v63  ;;  %v2832_v63 = vmov 64.0  }
 0x307   :  { %2767 = vrcp.f32 %v2832_v63  ;;  %v1314_v63 = vld [vmem:[%s4826_s14 + $0x220] sm:$0xff] }
 0x34a   :  { %v914_v12 = vpop.f32.mrf.mxu0 }
 0x34b   :  { %1075 = vrot.lane.b32.xlu2 %v914_v12, %s2825_s21  ;;  %v2768_v12 = vpop.eup %2767 }
 0x34c   :  { %vm1196_vm15 = vweird.f32 %v2768_v12 }
 0x352   :  { %v943_v13 = vpop.f32.mrf.mxu1 }
 0x353   :  { %1083 = vrot.lane.b32.xlu1 %v943_v13, %s2826_s27  ;;  %v1192_v13 = vmul.f32 64.0, %v2768_v12 }
 0x35d   :  { %v972_v19 = vpop.f32.mrf.mxu2 }
 0x360   :  { %v885_v20 = vpop.f32.mrf.mxu3 }
 0x362   :  { %v917_v15 = vpop.f32.mrf.mxu0 }
 0x363   :  { %1077 = vrot.lane.b32.xlu2 %v917_v15, %s2825_s21  ;;  %s4852_s21 = sld [smem:[#allocation13_spill]] }
 0x368   :  { %v888_v23 = vpop.f32.mrf.mxu3 }
 0x36a   :  { %v946_v17 = vpop.f32.mrf.mxu1 }
 0x36b   :  { %v1030_v53 = vpop.f32.mrf.mxu0  ;;  %1085 = vrot.lane.b32.xlu1 %v946_v17, %s2826_s27 }
 0x36c   :  { %1107 = vrot.lane.b32.xlu2 %v1030_v53, %s2827_s19 }
 0x36d   :  { %v975_v14 = vpop.f32.mrf.mxu2 }
 0x373   :  { %1067 = vrot.lane.b32.xlu1 %v885_v20, %s2828_s17 }
 0x374   :  { %1093 = vrot.lane.b32.xlu2 %v975_v14, %s2829_s20 }
 0x378   :  { %v1001_v26 = vpop.f32.mrf.mxu3 }
 0x37b   :  { %1091 = vrot.lane.b32.xlu1 %v972_v19, %s2829_s20  ;;  %v1059_v18 = vpop.f32.mrf.mxu1  ;;  %v1033_v24 = vpop.f32.mrf.mxu0 }
 0x37c   :  { %1115 = vrot.lane.b32.xlu0 %v1059_v18, %s2830_s8 }
 0x380   :  { %v1004_v27 = vpop.f32.mrf.mxu3 }
 0x383   :  { %1069 = vrot.lane.b32.xlu1 %v888_v23, %s2828_s17  ;;  %v1062_v3 = vpop.f32.mrf.mxu1 }
 0x384   :  { %1109 = vrot.lane.b32.xlu0 %v1033_v24, %s2827_s19  ;;  %1117 = vrot.lane.b32.xlu2 %v1062_v3, %s2830_s8 }
 0x38b   :  { %1099 = vrot.lane.b32.xlu1 %v1001_v26, %s2831_s28  ;;  %v1358_v26 = vld [vmem:[%s4826_s14 + $0x380] sm:$0xff] }
 0x38c   :  { %1424 = vmatpush.msrb.mxu3 %v1358_v26 }
 0x393   :  { %1101 = vrot.lane.b32.xlu1 %v1004_v27, %s2831_s28  ;;  %v1359_v27 = vld [vmem:[%s4826_s14 + $0x388] sm:$0xff]  ;;  %s4855_s28 = sld [smem:[#allocation16_spill]] }
 0x394   :  { %1447 = vmatpush.msrb.mxu0 %v1359_v27  ;;  %v1267_v27 = vld [vmem:[%s4826_s14 + $0xa8] sm:$0xff] }
 0x396   :  { %1448 = vmatpush.msrb.mxu0 %v1343_v30  ;;  %v1251_v30 = vld [vmem:[%s4826_s14 + $0x28] sm:$0xff] }
 0x3a5   :  { %v1076_v39 = vpop.permute.xlu2 %1075 }
 0x3bd   :  { %v1078_v44 = vpop.permute.xlu2 %1077 }
 0x3c5   :  { %v1084_v33 = vpop.permute.xlu1 %1083 }
 0x3c6   :  { %v1108_v45 = vpop.permute.xlu2 %1107 }
 0x3ce   :  { %v1094_v57 = vpop.permute.xlu2 %1093 }
 0x3dd   :  { %v1086_v38 = vpop.permute.xlu1 %1085 }
 0x3de   :  { %v1118_v0 = vpop.permute.xlu2 %1117 }
 0x3e5   :  { %v1068_v40 = vpop.permute.xlu1 %1067 }
 0x3e6   :  { %v1121_v22 = vsel %vm407_vm8, %v856_v62, %v1068_v40  ;;  %v1193_v62 = vsub.f32 1.0, %v1192_v13  ;;  %v1311_v40 = vld [vmem:[%s4826_s14 + $0x208] sm:$0xff]  ;;  %v1316_v13 = vld [vmem:[%s4826_s14 + $0x230] sm:$0xff] }
 0x3e7   :  { %v1123_v51 = vsel %vm656_vm9, %v1121_v22, %v1076_v39  ;;  %v1310_v39 = vld [vmem:[%s4826_s14 + $0x200] sm:$0xff]  ;;  %v1296_v22 = vld [vmem:[%s4826_s14 + $0x190] sm:$0xff] }
 0x3e8   :  { %v1126_v37 = vsel %vm1125_vm10, %v1123_v51, %v1084_v33  ;;  %v1194_v15 = vmul.f32 %v2768_v12, %v1193_v62  ;;  %v1342_v33 = vld [vmem:[%s4826_s14 + $0x300] sm:$0xff]  ;;  %v1297_v51 = vld [vmem:[%s4826_s14 + $0x198] sm:$0xff] }
 0x3e9   :  { %1425 = vmatpush.msrb.mxu3 %v1342_v33  ;;  %v1317_v62 = vld [vmem:[%s4826_s14 + $0x238] sm:$0xff]  ;;  %v1250_v33 = vld [vmem:[%s4826_s14 + $0x20] sm:$0xff] }
 0x3eb   :  { %1426 = vmatpush.msrb.mxu3 %v1326_v36  ;;  %v1252_v36 = vld [vmem:[%s4826_s14 + $0x30] sm:$0xff] }
 0x3ed   :  { %v1092_v11 = vpop.permute.xlu1 %1091  ;;  %1427 = vmatpush.msrb.mxu3 %v1310_v39 }
 0x3ee   :  { %v1116_v54 = vpop.permute.xlu0 %1115  ;;  %v1129_v29 = vsel %vm1128_vm11, %v1126_v37, %v1092_v11  ;;  %v1313_v11 = vld [vmem:[%s4826_s14 + $0x218] sm:$0xff]  ;;  %v1278_v37 = vld [vmem:[%s4826_s14 + $0x100] sm:$0xff] }
 0x3ef   :  { %1496 = vmatpush.msrb.mxu2 %v1313_v11 }
 0x3f1   :  { %1497 = vmatpush.msrb.mxu2 %v1297_v51 }
 0x3f5   :  { %v1070_v49 = vpop.permute.xlu1 %1069 }
 0x3f6   :  { %v1122_v55 = vsel %vm407_vm8, %v859_v16, %v1070_v49  ;;  %v1110_v31 = vpop.permute.xlu0 %1109  ;;  %v1195_v16 = vadd.f32 %v2768_v12, %v1194_v15  ;;  %v1295_v49 = vld [vmem:[%s4826_s14 + $0x188] sm:$0xff]  ;;  %v1298_v15 = vld [vmem:[%s4826_s14 + $0x1a0] sm:$0xff] }
 0x3f7   :  { %v1124_v59 = vsel %vm656_vm9, %v1122_v55, %v1078_v44  ;;  %v1312_v44 = vld [vmem:[%s4826_s14 + $0x210] sm:$0xff] }
 0x3f8   :  { %v1127_v61 = vsel %vm1125_vm10, %v1124_v59, %v1086_v38  ;;  %v3485_v17 = vsel %vm1196_vm15, %v2768_v12, %v1195_v16  ;;  %v1327_v38 = vld [vmem:[%s4826_s14 + $0x288] sm:$0xff]  ;;  %1473 = vmatpush.msrb.mxu1 %v1312_v44  ;;  %v1280_v55 = vld [vmem:[%s4826_s14 + $0x110] sm:$0xff]  ;;  %v1265_v59 = vld [vmem:[%s4826_s14 + $0x98] sm:$0xff] }
 0x3f9   :  { %v1130_v42 = vsel %vm1128_vm11, %v1127_v61, %v1094_v57  ;;  %1449 = vmatpush.msrb.mxu0 %v1327_v38  ;;  %v1264_v57 = vld [vmem:[%s4826_s14 + $0x90] sm:$0xff]  ;;  %v1315_v12 = vld [vmem:[%s4826_s14 + $0x228] sm:$0xff]  ;;  %v1253_v38 = vld [vmem:[%s4826_s14 + $0x38] sm:$0xff] }
 0x3fa   :  { %1474 = vmatpush.msrb.mxu1 %v1296_v22  ;;  %v1248_v61 = vld [vmem:[%s4826_s14 + $0x10] sm:$0xff]  ;;  %v1299_v16 = vld [vmem:[%s4826_s14 + $0x1a8] sm:$0xff] }
 0x3fb   :  { %1450 = vmatpush.msrb.mxu0 %v1311_v40 }
 0x3fc   :  { %1475 = vmatpush.msrb.mxu1 %v1280_v55 }
 0x3fd   :  { %v1100_v21 = vpop.permute.xlu1 %1099  ;;  %1451 = vmatpush.msrb.mxu0 %v1295_v49  ;;  %v2698_v49 = vld [vmem:[%s4824_s12] ss:$0 sm:$0xff]  ;;  %s4854_s12 = sld [smem:[#allocation15_spill]] }
 0x3fe   :  { %v1132_v43 = vsel %vm1131_vm12, %v1129_v29, %v1100_v21  ;;  %v1281_v29 = vld [vmem:[%s4826_s14 + $0x118] sm:$0xff]  ;;  %v1262_v21 = vld [vmem:[%s4826_s14 + $0x80] sm:$0xff]  ;;  %1476 = vmatpush.msrb.mxu1 %v1264_v57 }
 0x3ff   :  { %v1135_v46 = vsel %vm1134_vm13, %v1132_v43, %v1108_v45  ;;  %v1294_v45 = vld [vmem:[%s4826_s14 + $0x180] sm:$0xff]  ;;  %1498 = vmatpush.msrb.mxu2 %v1281_v29  ;;  %v1263_v43 = vld [vmem:[%s4826_s14 + $0x88] sm:$0xff] }
 0x400   :  { %v1138_v60 = vsel %vm1137_vm14, %v1135_v46, %v1116_v54  ;;  %1428 = vmatpush.msrb.mxu3 %v1294_v45  ;;  %v1279_v54 = vld [vmem:[%s4826_s14 + $0x108] sm:$0xff]  ;;  %v1246_v46 = vld [vmem:[%s4826_s14] sm:$0xff]  ;;  %1477 = vmatpush.msrb.mxu1 %v1248_v61 }
 0x401   :  { %2607 = vmatmul.msk.f32.vlgmr.msra.gmra.mxu2 %vm201_vm7, %v1138_v60  ;;  %1452 = vmatpush.msrb.mxu0 %v1279_v54  ;;  %v1247_v60 = vld [vmem:[%s4826_s14 + $0x8] sm:$0xff] }
 0x402   :  { %1429 = vmatpush.msrb.mxu3 %v1278_v37  ;;  %1499 = vmatpush.msrb.mxu2 %v1265_v59  ;;  %v2699_v37 = vld [vmem:[%s4852_s21] ss:$0 sm:$0xff]  ;;  %s4853_s21 = sld [smem:[#allocation14_spill]] }
 0x403   :  { %1453 = vmatpush.msrb.mxu0 %v1263_v43  ;;  %v1366_v59 = vld [vmem:[%s4826_s14 + $0x3c0] sm:$0xff] }
 0x404   :  { %1430 = vmatpush.msrb.mxu3 %v1262_v21 }
 0x405   :  { %v1102_v47 = vpop.permute.xlu1 %1101  ;;  %1454 = vmatpush.msrb.mxu0 %v1247_v60  ;;  %v1369_v60 = vld [vmem:[%s4826_s14 + $0x3d8] sm:$0xff] }
 0x406   :  { %v1133_v50 = vsel %vm1131_vm12, %v1130_v42, %v1102_v47  ;;  %1431 = vmatpush.msrb.mxu3 %v1246_v46  ;;  %v1249_v42 = vld [vmem:[%s4826_s14 + $0x18] sm:$0xff]  ;;  %v1362_v47 = vld [vmem:[%s4826_s14 + $0x3a0] sm:$0xff]  ;;  %v1367_v46 = vld [vmem:[%s4826_s14 + $0x3c8] sm:$0xff] }
 0x407   :  { %v1136_v1 = vsel %vm1134_vm13, %v1133_v50, %v1110_v31  ;;  %1500 = vmatpush.msrb.mxu2 %v1249_v42  ;;  %v1363_v31 = vld [vmem:[%s4826_s14 + $0x3a8] sm:$0xff]  ;;  %v1364_v50 = vld [vmem:[%s4826_s14 + $0x3b0] sm:$0xff]  ;;  %v1350_v42 = vld [vmem:[%s4826_s14 + $0x340] sm:$0xff] }
 0x408   :  { %v1139_v48 = vsel %vm1137_vm14, %v1136_v1, %v1118_v0  ;;  %1516 = vmatpush.msra.mxu3 %v1362_v47  ;;  %1539 = vmatpush.msra.mxu0 %v1363_v31  ;;  %v1365_v0 = vld [vmem:[%s4826_s14 + $0x3b8] sm:$0xff]  ;;  %v1351_v47 = vld [vmem:[%s4826_s14 + $0x348] sm:$0xff] }
 0x409   :  { %2608 = vmatmul.msk.f32.gmra.mxu2 %vm201_vm7, %v1139_v48  ;;  %1562 = vmatpush.msra.mxu1 %v1364_v50  ;;  %v1346_v48 = vld [vmem:[%s4826_s14 + $0x320] sm:$0xff]  ;;  %v1352_v50 = vld [vmem:[%s4826_s14 + $0x350] sm:$0xff] }
 0x40a   :  { %1585 = vmatpush.msra.mxu2 %v1365_v0  ;;  %1517 = vmatpush.msra.mxu3 %v1346_v48  ;;  %v1353_v0 = vld [vmem:[%s4826_s14 + $0x358] sm:$0xff] }
 0x484   :  { %v1175_v58 = vpop.f32.mrf.mxu2 }
 0x485   :  { %v1176_v2 = vadd.f32 %v2697_v41, %v1175_v58  ;;  %v1348_v58 = vld [vmem:[%s4826_s14 + $0x330] sm:$0xff] }
 0x486   :  { %1563 = vmatpush.msra.mxu1 %v1348_v58  ;;  %v1337_v58 = vld [vmem:[%s4826_s14 + $0x2d8] sm:$0xff] }
 0x487   :  { %v1181_v4 = vadd.f32 %v1176_v2, %v3111_v56 }
 0x489   :  { %v1185_v5 = vsel %vm201_vm7, %v1181_v4, 0.0 }
 0x48a   :  { %1186 = vadd.xlane.f32.xlu1 %v1185_v5  ;;  %v1330_v5 = vld [vmem:[%s4826_s14 + $0x2a0] sm:$0xff] }
 0x48b   :  { %1518 = vmatpush.msra.mxu3 %v1330_v5  ;;  %v1319_v5 = vld [vmem:[%s4826_s14 + $0x248] sm:$0xff] }
 0x48c   :  { %v1178_v6 = vpop.f32.mrf.mxu2 }
 0x48d   :  { %v1179_v7 = vadd.f32 %v2697_v41, %v1178_v6  ;;  %v1347_v41 = vld [vmem:[%s4826_s14 + $0x328] sm:$0xff]  ;;  %1519 = vmatpush.msra.mxu3 %v1314_v63  ;;  %v1304_v63 = vld [vmem:[%s4826_s14 + $0x1d0] sm:$0xff] }
 0x48e   :  { %1540 = vmatpush.msra.mxu0 %v1347_v41  ;;  %v1331_v6 = vld [vmem:[%s4826_s14 + $0x2a8] sm:$0xff]  ;;  %v1336_v41 = vld [vmem:[%s4826_s14 + $0x2d0] sm:$0xff] }
 0x48f   :  { %v1182_v8 = vadd.f32 %v1179_v7, %v3139_v9  ;;  %v1332_v7 = vld [vmem:[%s4826_s14 + $0x2b0] sm:$0xff]  ;;  %1520 = vmatpush.msra.mxu3 %v1298_v15 }
 0x490   :  { %1541 = vmatpush.msra.mxu0 %v1331_v6  ;;  %1564 = vmatpush.msra.mxu1 %v1332_v7  ;;  %v1320_v6 = vld [vmem:[%s4826_s14 + $0x250] sm:$0xff]  ;;  %v1321_v7 = vld [vmem:[%s4826_s14 + $0x258] sm:$0xff] }
 0x491   :  { %v1188_v10 = vsel %vm201_vm7, %v1182_v8, 0.0  ;;  %v1288_v15 = vld [vmem:[%s4826_s14 + $0x150] sm:$0xff] }
 0x492   :  { %1189 = vadd.xlane.f32.xlu0 %v1188_v10  ;;  %v1333_v10 = vld [vmem:[%s4826_s14 + $0x2b8] sm:$0xff]  ;;  %1542 = vmatpush.msra.mxu0 %v1315_v12 }
 0x493   :  { %1565 = vmatpush.msra.mxu1 %v1316_v13  ;;  %v1305_v12 = vld [vmem:[%s4826_s14 + $0x1d8] sm:$0xff]  ;;  %v1286_v13 = vld [vmem:[%s4826_s14 + $0x140] sm:$0xff] }
 0x494   :  { %1543 = vmatpush.msra.mxu0 %v1299_v16  ;;  %v1289_v16 = vld [vmem:[%s4826_s14 + $0x158] sm:$0xff] }
 0x4fd   :  { %v1187_v56 = vpop.xlane.xlu1 %1186 }
 0x4fe   :  { %v1198_v19 = vmul.f32 %v3485_v17, %v1187_v56  ;;  %v1300_v56 = vld [vmem:[%s4826_s14 + $0x1b0] sm:$0xff] }
 0x4ff   :  { %1566 = vmatpush.msra.mxu1 %v1300_v56  ;;  %v1270_v56 = vld [vmem:[%s4826_s14 + $0xc0] sm:$0xff] }
 0x500   :  { %v3488_v53 = vsub.f32 %v1181_v4, %v1198_v19  ;;  %v1349_v4 = vld [vmem:[%s4826_s14 + $0x338] sm:$0xff] }
 0x501   :  { %1586 = vmatpush.msra.mxu2 %v1349_v4  ;;  %v1301_v19 = vld [vmem:[%s4826_s14 + $0x1b8] sm:$0xff]  ;;  %v1318_v4 = vld [vmem:[%s4826_s14 + $0x240] sm:$0xff] }
 0x502   :  { %v1202_v9 = vmul.f32 %v3488_v53, %v3488_v53 }
 0x503   :  { %1587 = vmatpush.msra.mxu2 %v1333_v10  ;;  %v1303_v10 = vld [vmem:[%s4826_s14 + $0x1c8] sm:$0xff] }
 0x504   :  { %v1204_v20 = vsel %vm201_vm7, %v1202_v9, 0.0  ;;  %v1282_v9 = vld [vmem:[%s4826_s14 + $0x120] sm:$0xff] }
 0x505   :  { %1205 = vadd.xlane.f32.xlu2 %v1204_v20  ;;  %v1190_v14 = vpop.xlane.xlu0 %1189  ;;  %1588 = vmatpush.msra.mxu2 %v1317_v62  ;;  %v1283_v20 = vld [vmem:[%s4826_s14 + $0x128] sm:$0xff] }
 0x506   :  { %v1199_v18 = vmul.f32 %v3485_v17, %v1190_v14  ;;  %1521 = vmatpush.msra.mxu3 %v1282_v9  ;;  %1544 = vmatpush.msra.mxu0 %v1283_v20  ;;  %v1287_v62 = vld [vmem:[%s4826_s14 + $0x148] sm:$0xff]  ;;  %v1272_v9 = vld [vmem:[%s4826_s14 + $0xd0] sm:$0xff]  ;;  %v1273_v20 = vld [vmem:[%s4826_s14 + $0xd8] sm:$0xff] }
 0x507   :  { %1589 = vmatpush.msra.mxu2 %v1301_v19  ;;  %v1271_v19 = vld [vmem:[%s4826_s14 + $0xc8] sm:$0xff] }
 0x508   :  { %v3494_v23 = vsub.f32 %v1182_v8, %v1199_v18  ;;  %v1284_v18 = vld [vmem:[%s4826_s14 + $0x130] sm:$0xff]  ;;  %1545 = vmatpush.msra.mxu0 %v1267_v27  ;;  %v1371_v27 = vld [vmem:[%s4826_s14 + $0x3e8] sm:$0xff] }
 0x509   :  { %1567 = vmatpush.msra.mxu1 %v1284_v18  ;;  %v1255_v18 = vld [vmem:[%s4826_s14 + $0x48] sm:$0xff] }
 0x50a   :  { %v1203_v24 = vmul.f32 %v3494_v23, %v3494_v23  ;;  %1546 = vmatpush.msra.mxu0 %v1251_v30  ;;  %v1355_v30 = vld [vmem:[%s4826_s14 + $0x368] sm:$0xff] }
 0x50b   :  { %1568 = vmatpush.msra.mxu1 %v1268_v28  ;;  %v1372_v28 = vld [vmem:[%s4826_s14 + $0x3f0] sm:$0xff] }
 0x50c   :  { %v1207_v3 = vsel %vm201_vm7, %v1203_v24, 0.0  ;;  %v1285_v24 = vld [vmem:[%s4826_s14 + $0x138] sm:$0xff] }
 0x50d   :  { %1208 = vadd.xlane.f32.xlu1 %v1207_v3  ;;  %v1266_v3 = vld [vmem:[%s4826_s14 + $0xa0] sm:$0xff]  ;;  %1590 = vmatpush.msra.mxu2 %v1285_v24  ;;  %v1256_v24 = vld [vmem:[%s4826_s14 + $0x50] sm:$0xff] }
 0x50e   :  { %1522 = vmatpush.msra.mxu3 %v1266_v3  ;;  %1569 = vmatpush.msra.mxu1 %v1252_v36  ;;  %v1257_v3 = vld [vmem:[%s4826_s14 + $0x58] sm:$0xff]  ;;  %v1338_v36 = vld [vmem:[%s4826_s14 + $0x2e0] sm:$0xff] }
 0x50f   :  { %1591 = vmatpush.msra.mxu2 %v1269_v32  ;;  %v1373_v32 = vld [vmem:[%s4826_s14 + $0x3f8] sm:$0xff] }
 0x510   :  { %1523 = vmatpush.msra.mxu3 %v1250_v33  ;;  %v1354_v33 = vld [vmem:[%s4826_s14 + $0x360] sm:$0xff] }
 0x511   :  { %1592 = vmatpush.msra.mxu2 %v1253_v38  ;;  %v1339_v38 = vld [vmem:[%s4826_s14 + $0x2e8] sm:$0xff] }
 0x578   :  { %v1206_v1 = vpop.xlane.xlu2 %1205 }
 0x579   :  { %v1210_v2 = vmul.f32 %v1206_v1, %v3485_v17  ;;  %v1334_v1 = vld [vmem:[%s4826_s14 + $0x2c0] sm:$0xff] }
 0x57b   :  { %v1212_v8 = vadd.f32 1e-05, %v1210_v2 }
 0x57d   :  { %2769 = vrsqrt.f32 %v1212_v8  ;;  %vm1220_vm1 = vweird.f32 %v1212_v8 }
 0x580   :  { %v1209_v14 = vpop.xlane.xlu1 %1208 }
 0x581   :  { %v1211_v26 = vmul.f32 %v1209_v14, %v3485_v17  ;;  %v1254_v14 = vld [vmem:[%s4826_s14 + $0x40] sm:$0xff] }
 0x583   :  { %v2770_v52 = vpop.eup %2769  ;;  %v1213_v34 = vadd.f32 1e-05, %v1211_v26  ;;  %v1370_v26 = vld [vmem:[%s4826_s14 + $0x3e0] sm:$0xff] }
 0x584   :  { %v1215_v35 = vmul.f32 %v2770_v52, %v1212_v8  ;;  %vm1221_vm0 = vweird.f32 %v2770_v52  ;;  %v1302_v8 = vld [vmem:[%s4826_s14 + $0x1c0] sm:$0xff] }
 0x585   :  { %2771 = vrsqrt.f32 %v1213_v34  ;;  %vm1222_vm2 = vmor %vm1220_vm1, %vm1221_vm0  ;;  %vm1230_vm4 = vweird.f32 %v1213_v34 }
 0x586   :  { %v1216_v25 = vmul.f32 %v2770_v52, %v1215_v35  ;;  %v1340_v35 = vld [vmem:[%s4826_s14 + $0x2f0] sm:$0xff] }
 0x588   :  { %v1217_v39 = vmul.f32 0.5, %v1216_v25  ;;  %v1341_v25 = vld [vmem:[%s4826_s14 + $0x2f8] sm:$0xff] }
 0x58a   :  { %v1218_v40 = vsub.f32 1.5, %v1217_v39  ;;  %v1322_v39 = vld [vmem:[%s4826_s14 + $0x260] sm:$0xff] }
 0x58b   :  { %v2772_v44 = vpop.eup %2771 }
 0x58c   :  { %v1219_v11 = vmul.f32 %v2770_v52, %v1218_v40  ;;  %v1225_v45 = vmul.f32 %v2772_v44, %v1213_v34  ;;  %vm1231_vm3 = vweird.f32 %v2772_v44  ;;  %v1357_v34 = vld [vmem:[%s4826_s14 + $0x378] sm:$0xff]  ;;  %v1323_v40 = vld [vmem:[%s4826_s14 + $0x268] sm:$0xff] }
 0x58d   :  { %vm1232_vm5 = vmor %vm1230_vm4, %vm1231_vm3 }
 0x58e   :  { %v1223_v22 = vsel %vm1222_vm2, %v2770_v52, %v1219_v11  ;;  %v1226_v51 = vmul.f32 %v2772_v44, %v1225_v45  ;;  %v1356_v52 = vld [vmem:[%s4826_s14 + $0x370] sm:$0xff]  ;;  %v1325_v11 = vld [vmem:[%s4826_s14 + $0x278] sm:$0xff]  ;;  %v1306_v45 = vld [vmem:[%s4826_s14 + $0x1e0] sm:$0xff] }
 0x58f   :  { %v1234_v54 = vmul.f32 %v1223_v22, %v3488_v53  ;;  %v1368_v53 = vld [vmem:[%s4826_s14 + $0x3d0] sm:$0xff] }
 0x590   :  { %v1227_v55 = vmul.f32 0.5, %v1226_v51  ;;  %v1308_v22 = vld [vmem:[%s4826_s14 + $0x1f0] sm:$0xff]  ;;  %v1309_v51 = vld [vmem:[%s4826_s14 + $0x1f8] sm:$0xff] }
 0x591   :  { %v1239_v29 = vmul.f32 %v2698_v49, %v1234_v54  ;;  %v1291_v54 = vld [vmem:[%s4826_s14 + $0x168] sm:$0xff] }
 0x592   :  { %v1228_v21 = vsub.f32 1.5, %v1227_v55  ;;  %v1292_v55 = vld [vmem:[%s4826_s14 + $0x170] sm:$0xff] }
 0x593   :  { %v3700_v43 = vadd.f32 %v2699_v37, %v1239_v29  ;;  %v1293_v29 = vld [vmem:[%s4826_s14 + $0x178] sm:$0xff] }
 0x594   :  { %v1229_v57 = vmul.f32 %v2772_v44, %v1228_v21  ;;  %v1274_v21 = vld [vmem:[%s4826_s14 + $0xe0] sm:$0xff] }
 0x595   :  { %2609 = vmatmul.msk.f32.vlgmr.msrb.gmra.mxu3 %vm201_vm7, %v3700_v43  ;;  %2611 = vmatmul.msk.f32.vlgmr.msrb.gmra.mxu0 %vm201_vm7, %v3700_v43 }
 0x596   :  { %v1233_v61 = vsel %vm1232_vm5, %v2772_v44, %v1229_v57  ;;  %2613 = vmatmul.msk.f32.vlgmr.msrb.gmra.mxu1 %vm201_vm7, %v3700_v43  ;;  %2615 = vmatmul.msk.f32.vlgmr.msrb.gmra.mxu2 %vm201_vm7, %v3700_v43  ;;  %v1324_v44 = vld [vmem:[%s4826_s14 + $0x270] sm:$0xff]  ;;  %v1275_v57 = vld [vmem:[%s4826_s14 + $0xe8] sm:$0xff] }
 0x597   :  { %v1235_v31 = vmul.f32 %v1233_v61, %v3494_v23  ;;  %1608 = vmatpush.msrb.mxu3 %v1366_v59  ;;  %1631 = vmatpush.msrb.mxu0 %v1367_v46  ;;  %v1335_v23 = vld [vmem:[%s4826_s14 + $0x2c8] sm:$0xff]  ;;  %v1276_v59 = vld [vmem:[%s4826_s14 + $0xf0] sm:$0xff]  ;;  %v1277_v46 = vld [vmem:[%s4826_s14 + $0xf8] sm:$0xff] }
 0x598   :  { %1654 = vmatpush.msrb.mxu1 %v1368_v53  ;;  %1677 = vmatpush.msrb.mxu2 %v1369_v60  ;;  %v1258_v53 = vld [vmem:[%s4826_s14 + $0x60] sm:$0xff]  ;;  %v1259_v60 = vld [vmem:[%s4826_s14 + $0x68] sm:$0xff]  ;;  %v1260_v61 = vld [vmem:[%s4826_s14 + $0x70] sm:$0xff] }
 0x599   :  { %v1240_v48 = vmul.f32 %v2698_v49, %v1235_v31  ;;  %1609 = vmatpush.msrb.mxu3 %v1350_v42  ;;  %1632 = vmatpush.msrb.mxu0 %v1351_v47  ;;  %v1307_v49 = vld [vmem:[%s4826_s14 + $0x1e8] sm:$0xff]  ;;  %v1261_v42 = vld [vmem:[%s4826_s14 + $0x78] sm:$0xff] }
 0x59a   :  { %1655 = vmatpush.msrb.mxu1 %v1352_v50  ;;  %1678 = vmatpush.msrb.mxu2 %v1353_v0  ;;  %v1847_v47 = vld [vmem:[%s4828_s16 + $0xf8] sm:$0xff] }
 0x59b   :  { %v3747_v2 = vadd.f32 %v2699_v37, %v1240_v48  ;;  %1610 = vmatpush.msrb.mxu3 %v1334_v1  ;;  %1633 = vmatpush.msrb.mxu0 %v1335_v23  ;;  %v1290_v37 = vld [vmem:[%s4826_s14 + $0x160] sm:$0xff]  ;;  %v1863_v31 = vld [vmem:[%s4828_s16 + $0x178] sm:$0xff]  ;;  %v1846_v1 = vld [vmem:[%s4828_s16 + $0xf0] sm:$0xff] }
 0x59c   :  { %1656 = vmatpush.msrb.mxu1 %v1336_v41  ;;  %1679 = vmatpush.msrb.mxu2 %v1337_v58  ;;  %v1831_v50 = vld [vmem:[%s4828_s16 + $0x78] sm:$0xff]  ;;  %v1862_v23 = vld [vmem:[%s4828_s16 + $0x170] sm:$0xff]  ;;  %v1845_v58 = vld [vmem:[%s4828_s16 + $0xe8] sm:$0xff] }
 0x59d   :  { %2610 = vmatmul.msk.f32.gmra.mxu3 %vm201_vm7, %v3747_v2  ;;  %2612 = vmatmul.msk.f32.gmra.mxu0 %vm201_vm7, %v3747_v2  ;;  %v1879_v0 = vld [vmem:[%s4828_s16 + $0x1f8] sm:$0xff]  ;;  %v1830_v48 = vld [vmem:[%s4828_s16 + $0x70] sm:$0xff] }
 0x59e   :  { %2614 = vmatmul.msk.f32.gmra.mxu1 %vm201_vm7, %v3747_v2  ;;  %2616 = vmatmul.msk.f32.gmra.mxu2 %vm201_vm7, %v3747_v2  ;;  %v1878_v41 = vld [vmem:[%s4828_s16 + $0x1f0] sm:$0xff] }
 0x59f   :  { %1611 = vmatpush.msrb.mxu3 %v1318_v4  ;;  %1634 = vmatpush.msrb.mxu0 %v1319_v5  ;;  %v1861_v4 = vld [vmem:[%s4828_s16 + $0x168] sm:$0xff] }
 0x5a0   :  { %1657 = vmatpush.msrb.mxu1 %v1320_v6  ;;  %1680 = vmatpush.msrb.mxu2 %v1321_v7  ;;  %v1829_v5 = vld [vmem:[%s4828_s16 + $0x68] sm:$0xff]  ;;  %v1844_v7 = vld [vmem:[%s4828_s16 + $0xe0] sm:$0xff] }
 0x5a1   :  { %1612 = vmatpush.msrb.mxu3 %v1302_v8  ;;  %1635 = vmatpush.msrb.mxu0 %v1303_v10  ;;  %v1877_v6 = vld [vmem:[%s4828_s16 + $0x1e8] sm:$0xff]  ;;  %v1860_v8 = vld [vmem:[%s4828_s16 + $0x160] sm:$0xff] }
 0x5a2   :  { %1658 = vmatpush.msrb.mxu1 %v1304_v63  ;;  %1681 = vmatpush.msrb.mxu2 %v1305_v12  ;;  %v1828_v10 = vld [vmem:[%s4828_s16 + $0x60] sm:$0xff]  ;;  %v1843_v12 = vld [vmem:[%s4828_s16 + $0xd8] sm:$0xff] }
 0x5a3   :  { %1613 = vmatpush.msrb.mxu3 %v1286_v13  ;;  %1636 = vmatpush.msrb.mxu0 %v1287_v62  ;;  %v1876_v63 = vld [vmem:[%s4828_s16 + $0x1e0] sm:$0xff]  ;;  %v1859_v13 = vld [vmem:[%s4828_s16 + $0x158] sm:$0xff] }
 0x5a4   :  { %1659 = vmatpush.msrb.mxu1 %v1288_v15  ;;  %1682 = vmatpush.msrb.mxu2 %v1289_v16  ;;  %v1827_v62 = vld [vmem:[%s4828_s16 + $0x58] sm:$0xff]  ;;  %v1842_v16 = vld [vmem:[%s4828_s16 + $0xd0] sm:$0xff] }
 0x5a5   :  { %2617 = vmatmul.msk.f32.vlgmr.msra.gmra.mxu3 %vm201_vm7, %v3700_v43  ;;  %2619 = vmatmul.msk.f32.vlgmr.msra.gmra.mxu0 %vm201_vm7, %v3700_v43  ;;  %v1875_v15 = vld [vmem:[%s4828_s16 + $0x1d8] sm:$0xff] }
 0x5a6   :  { %2621 = vmatmul.msk.f32.vlgmr.msra.gmra.mxu1 %vm201_vm7, %v3700_v43  ;;  %2623 = vmatmul.msk.f32.vlgmr.msra.gmra.mxu2 %vm201_vm7, %v3700_v43 }
 0x5a7   :  { %1614 = vmatpush.msrb.mxu3 %v1270_v56  ;;  %1637 = vmatpush.msrb.mxu0 %v1271_v19  ;;  %v1858_v56 = vld [vmem:[%s4828_s16 + $0x150] sm:$0xff] }
 0x5a8   :  { %1660 = vmatpush.msrb.mxu1 %v1272_v9  ;;  %1683 = vmatpush.msrb.mxu2 %v1273_v20  ;;  %v1826_v19 = vld [vmem:[%s4828_s16 + $0x50] sm:$0xff]  ;;  %v1841_v20 = vld [vmem:[%s4828_s16 + $0xc8] sm:$0xff] }
 0x5a9   :  { %1615 = vmatpush.msrb.mxu3 %v1254_v14  ;;  %1638 = vmatpush.msrb.mxu0 %v1255_v18  ;;  %v1874_v9 = vld [vmem:[%s4828_s16 + $0x1d0] sm:$0xff]  ;;  %v1857_v14 = vld [vmem:[%s4828_s16 + $0x148] sm:$0xff] }
 0x5aa   :  { %1661 = vmatpush.msrb.mxu1 %v1256_v24  ;;  %1684 = vmatpush.msrb.mxu2 %v1257_v3  ;;  %v1825_v18 = vld [vmem:[%s4828_s16 + $0x48] sm:$0xff]  ;;  %v1840_v3 = vld [vmem:[%s4828_s16 + $0xc0] sm:$0xff] }
 0x5ab   :  { %1700 = vmatpush.msra.mxu3 %v1370_v26  ;;  %1723 = vmatpush.msra.mxu0 %v1371_v27  ;;  %v1873_v24 = vld [vmem:[%s4828_s16 + $0x1c8] sm:$0xff]  ;;  %v1856_v26 = vld [vmem:[%s4828_s16 + $0x140] sm:$0xff] }
 0x5ac   :  { %1746 = vmatpush.msra.mxu1 %v1372_v28  ;;  %1769 = vmatpush.msra.mxu2 %v1373_v32  ;;  %v1824_v27 = vld [vmem:[%s4828_s16 + $0x40] sm:$0xff]  ;;  %v1839_v32 = vld [vmem:[%s4828_s16 + $0xb8] sm:$0xff] }
 0x5ad   :  { %2618 = vmatmul.msk.f32.gmra.mxu3 %vm201_vm7, %v3747_v2  ;;  %2620 = vmatmul.msk.f32.gmra.mxu0 %vm201_vm7, %v3747_v2  ;;  %v1872_v28 = vld [vmem:[%s4828_s16 + $0x1c0] sm:$0xff] }
 0x5ae   :  { %2622 = vmatmul.msk.f32.gmra.mxu1 %vm201_vm7, %v3747_v2  ;;  %2624 = vmatmul.msk.f32.gmra.mxu2 %vm201_vm7, %v3747_v2 }
 0x5af   :  { %1701 = vmatpush.msra.mxu3 %v1354_v33  ;;  %1724 = vmatpush.msra.mxu0 %v1355_v30  ;;  %v1855_v33 = vld [vmem:[%s4828_s16 + $0x138] sm:$0xff] }
 0x5b0   :  { %1747 = vmatpush.msra.mxu1 %v1356_v52  ;;  %1770 = vmatpush.msra.mxu2 %v1357_v34  ;;  %v1823_v30 = vld [vmem:[%s4828_s16 + $0x38] sm:$0xff]  ;;  %v1838_v34 = vld [vmem:[%s4828_s16 + $0xb0] sm:$0xff] }
 0x5b1   :  { %1702 = vmatpush.msra.mxu3 %v1338_v36  ;;  %1725 = vmatpush.msra.mxu0 %v1339_v38  ;;  %v1871_v52 = vld [vmem:[%s4828_s16 + $0x1b8] sm:$0xff]  ;;  %v1854_v36 = vld [vmem:[%s4828_s16 + $0x130] sm:$0xff] }
 0x5b2   :  { %1748 = vmatpush.msra.mxu1 %v1340_v35  ;;  %1771 = vmatpush.msra.mxu2 %v1341_v25  ;;  %v1822_v38 = vld [vmem:[%s4828_s16 + $0x30] sm:$0xff]  ;;  %v1837_v25 = vld [vmem:[%s4828_s16 + $0xa8] sm:$0xff] }
 0x5b3   :  { %1703 = vmatpush.msra.mxu3 %v1322_v39  ;;  %1726 = vmatpush.msra.mxu0 %v1323_v40  ;;  %v1870_v35 = vld [vmem:[%s4828_s16 + $0x1b0] sm:$0xff]  ;;  %v1853_v39 = vld [vmem:[%s4828_s16 + $0x128] sm:$0xff] }
 0x5b4   :  { %1749 = vmatpush.msra.mxu1 %v1324_v44  ;;  %1772 = vmatpush.msra.mxu2 %v1325_v11  ;;  %v1821_v40 = vld [vmem:[%s4828_s16 + $0x28] sm:$0xff]  ;;  %v1836_v11 = vld [vmem:[%s4828_s16 + $0xa0] sm:$0xff] }
 0x5b5   :  { %2625 = vmatmul.msk.f32.vlgmr.msrb.gmra.mxu3 %vm201_vm7, %v3700_v43  ;;  %2627 = vmatmul.msk.f32.vlgmr.msrb.gmra.mxu0 %vm201_vm7, %v3700_v43  ;;  %v1869_v44 = vld [vmem:[%s4828_s16 + $0x1a8] sm:$0xff] }
 0x5b6   :  { %2629 = vmatmul.msk.f32.vlgmr.msrb.gmra.mxu1 %vm201_vm7, %v3700_v43  ;;  %2631 = vmatmul.msk.f32.vlgmr.msrb.gmra.mxu2 %vm201_vm7, %v3700_v43 }
 0x5b7   :  { %1704 = vmatpush.msra.mxu3 %v1306_v45  ;;  %1727 = vmatpush.msra.mxu0 %v1307_v49  ;;  %v1852_v45 = vld [vmem:[%s4828_s16 + $0x120] sm:$0xff] }
 0x5b8   :  { %1750 = vmatpush.msra.mxu1 %v1308_v22  ;;  %1773 = vmatpush.msra.mxu2 %v1309_v51  ;;  %v1820_v49 = vld [vmem:[%s4828_s16 + $0x20] sm:$0xff]  ;;  %v1835_v51 = vld [vmem:[%s4828_s16 + $0x98] sm:$0xff] }
 0x5b9   :  { %1705 = vmatpush.msra.mxu3 %v1290_v37  ;;  %1728 = vmatpush.msra.mxu0 %v1291_v54  ;;  %v1868_v22 = vld [vmem:[%s4828_s16 + $0x1a0] sm:$0xff]  ;;  %v1851_v37 = vld [vmem:[%s4828_s16 + $0x118] sm:$0xff] }
 0x5ba   :  { %1751 = vmatpush.msra.mxu1 %v1292_v55  ;;  %1774 = vmatpush.msra.mxu2 %v1293_v29  ;;  %v1819_v54 = vld [vmem:[%s4828_s16 + $0x18] sm:$0xff]  ;;  %v1834_v29 = vld [vmem:[%s4828_s16 + $0x90] sm:$0xff] }
 0x5bb   :  { %1706 = vmatpush.msra.mxu3 %v1274_v21  ;;  %1729 = vmatpush.msra.mxu0 %v1275_v57  ;;  %v1867_v55 = vld [vmem:[%s4828_s16 + $0x198] sm:$0xff]  ;;  %v1850_v21 = vld [vmem:[%s4828_s16 + $0x110] sm:$0xff] }
 0x5bc   :  { %1752 = vmatpush.msra.mxu1 %v1276_v59  ;;  %1775 = vmatpush.msra.mxu2 %v1277_v46  ;;  %v1818_v57 = vld [vmem:[%s4828_s16 + $0x10] sm:$0xff]  ;;  %v1833_v46 = vld [vmem:[%s4828_s16 + $0x88] sm:$0xff] }
 0x5bd   :  { %2626 = vmatmul.msk.f32.gmra.mxu3 %vm201_vm7, %v3747_v2  ;;  %2628 = vmatmul.msk.f32.gmra.mxu0 %vm201_vm7, %v3747_v2  ;;  %v1866_v59 = vld [vmem:[%s4828_s16 + $0x190] sm:$0xff] }
 0x5be   :  { %2630 = vmatmul.msk.f32.gmra.mxu1 %vm201_vm7, %v3747_v2  ;;  %2632 = vmatmul.msk.f32.gmra.mxu2 %vm201_vm7, %v3747_v2 }
 0x5bf   :  { %1707 = vmatpush.msra.mxu3 %v1258_v53  ;;  %1730 = vmatpush.msra.mxu0 %v1259_v60  ;;  %v1849_v53 = vld [vmem:[%s4828_s16 + $0x108] sm:$0xff] }
 0x5c0   :  { %1753 = vmatpush.msra.mxu1 %v1260_v61  ;;  %1776 = vmatpush.msra.mxu2 %v1261_v42  ;;  %v1817_v60 = vld [vmem:[%s4828_s16 + $0x8] sm:$0xff]  ;;  %v1832_v42 = vld [vmem:[%s4828_s16 + $0x80] sm:$0xff] }
 0x5c1   :  { %2099 = vmatpush.msrb.mxu0 %v1847_v47  ;;  %2076 = vmatpush.msrb.mxu3 %v1831_v50  ;;  %v1865_v61 = vld [vmem:[%s4828_s16 + $0x188] sm:$0xff]  ;;  %v1848_v47 = vld [vmem:[%s4828_s16 + $0x100] sm:$0xff]  ;;  %v1927_v50 = vld [vmem:[%s4828_s16 + $0x378] sm:$0xff] }
 0x5c2   :  { %2122 = vmatpush.msrb.mxu1 %v1863_v31  ;;  %2145 = vmatpush.msrb.mxu2 %v1879_v0  ;;  %v1911_v31 = vld [vmem:[%s4828_s16 + $0x2f8] sm:$0xff]  ;;  %v1816_v0 = vld [vmem:[%s4828_s16] sm:$0xff] }
 0x5c3   :  { %2100 = vmatpush.msrb.mxu0 %v1846_v1  ;;  %2077 = vmatpush.msrb.mxu3 %v1830_v48  ;;  %v1864_v1 = vld [vmem:[%s4828_s16 + $0x180] sm:$0xff]  ;;  %v1926_v48 = vld [vmem:[%s4828_s16 + $0x370] sm:$0xff] }
 0x5c4   :  { %2123 = vmatpush.msrb.mxu1 %v1862_v23  ;;  %2146 = vmatpush.msrb.mxu2 %v1878_v41  ;;  %v1910_v23 = vld [vmem:[%s4828_s16 + $0x2f0] sm:$0xff]  ;;  %v1895_v41 = vld [vmem:[%s4828_s16 + $0x278] sm:$0xff] }
 0x5c5   :  { %2633 = vmatmul.msk.f32.vlgmr.msra.gmra.mxu3 %vm201_vm7, %v3700_v43  ;;  %2635 = vmatmul.msk.f32.vlgmr.msra.gmra.mxu0 %vm201_vm7, %v3700_v43 }
 0x5c6   :  { %2637 = vmatmul.msk.f32.vlgmr.msra.gmra.mxu1 %vm201_vm7, %v3700_v43  ;;  %2639 = vmatmul.msk.f32.vlgmr.msra.gmra.mxu2 %vm201_vm7, %v3700_v43 }
 0x5c7   :  { %2101 = vmatpush.msrb.mxu0 %v1845_v58  ;;  %2124 = vmatpush.msrb.mxu1 %v1861_v4  ;;  %v1943_v58 = vld [vmem:[%s4828_s16 + $0x3f8] sm:$0xff]  ;;  %v1909_v4 = vld [vmem:[%s4828_s16 + $0x2e8] sm:$0xff] }
 0x5c8   :  { %2078 = vmatpush.msrb.mxu3 %v1829_v5  ;;  %2147 = vmatpush.msrb.mxu2 %v1877_v6  ;;  %v1925_v5 = vld [vmem:[%s4828_s16 + $0x368] sm:$0xff]  ;;  %v1894_v6 = vld [vmem:[%s4828_s16 + $0x270] sm:$0xff] }
 0x5c9   :  { %2102 = vmatpush.msrb.mxu0 %v1844_v7  ;;  %2125 = vmatpush.msrb.mxu1 %v1860_v8  ;;  %v1942_v7 = vld [vmem:[%s4828_s16 + $0x3f0] sm:$0xff]  ;;  %v1908_v8 = vld [vmem:[%s4828_s16 + $0x2e0] sm:$0xff] }
 0x5ca   :  { %2079 = vmatpush.msrb.mxu3 %v1828_v10  ;;  %2148 = vmatpush.msrb.mxu2 %v1876_v63  ;;  %v1924_v10 = vld [vmem:[%s4828_s16 + $0x360] sm:$0xff]  ;;  %v1893_v63 = vld [vmem:[%s4828_s16 + $0x268] sm:$0xff] }
 0x5cb   :  { %2103 = vmatpush.msrb.mxu0 %v1843_v12  ;;  %2126 = vmatpush.msrb.mxu1 %v1859_v13  ;;  %v1941_v12 = vld [vmem:[%s4828_s16 + $0x3e8] sm:$0xff]  ;;  %v1907_v13 = vld [vmem:[%s4828_s16 + $0x2d8] sm:$0xff] }
 0x5cc   :  { %2080 = vmatpush.msrb.mxu3 %v1827_v62  ;;  %2149 = vmatpush.msrb.mxu2 %v1875_v15  ;;  %v1923_v62 = vld [vmem:[%s4828_s16 + $0x358] sm:$0xff]  ;;  %v1892_v15 = vld [vmem:[%s4828_s16 + $0x260] sm:$0xff] }
 0x5cd   :  { %2634 = vmatmul.msk.f32.gmra.mxu3 %vm201_vm7, %v3747_v2  ;;  %2636 = vmatmul.msk.f32.gmra.mxu0 %vm201_vm7, %v3747_v2 }
 0x5ce   :  { %2638 = vmatmul.msk.f32.gmra.mxu1 %vm201_vm7, %v3747_v2  ;;  %2640 = vmatmul.msk.f32.gmra.mxu2 %vm201_vm7, %v3747_v2 }
 0x5cf   :  { %2104 = vmatpush.msrb.mxu0 %v1842_v16  ;;  %2127 = vmatpush.msrb.mxu1 %v1858_v56  ;;  %v1940_v16 = vld [vmem:[%s4828_s16 + $0x3e0] sm:$0xff]  ;;  %v1906_v56 = vld [vmem:[%s4828_s16 + $0x2d0] sm:$0xff] }
 0x5d0   :  { %2081 = vmatpush.msrb.mxu3 %v1826_v19  ;;  %2150 = vmatpush.msrb.mxu2 %v1874_v9  ;;  %v1922_v19 = vld [vmem:[%s4828_s16 + $0x350] sm:$0xff]  ;;  %v1891_v9 = vld [vmem:[%s4828_s16 + $0x258] sm:$0xff] }
 0x5d1   :  { %2105 = vmatpush.msrb.mxu0 %v1841_v20  ;;  %2128 = vmatpush.msrb.mxu1 %v1857_v14  ;;  %v1939_v20 = vld [vmem:[%s4828_s16 + $0x3d8] sm:$0xff]  ;;  %v1905_v14 = vld [vmem:[%s4828_s16 + $0x2c8] sm:$0xff] }
 0x5d2   :  { %2082 = vmatpush.msrb.mxu3 %v1825_v18  ;;  %2151 = vmatpush.msrb.mxu2 %v1873_v24  ;;  %v1921_v18 = vld [vmem:[%s4828_s16 + $0x348] sm:$0xff]  ;;  %v1890_v24 = vld [vmem:[%s4828_s16 + $0x250] sm:$0xff] }
 0x5d3   :  { %2106 = vmatpush.msrb.mxu0 %v1840_v3  ;;  %2129 = vmatpush.msrb.mxu1 %v1856_v26  ;;  %v1938_v3 = vld [vmem:[%s4828_s16 + $0x3d0] sm:$0xff]  ;;  %v1904_v26 = vld [vmem:[%s4828_s16 + $0x2c0] sm:$0xff] }
 0x5d4   :  { %2083 = vmatpush.msrb.mxu3 %v1824_v27  ;;  %2152 = vmatpush.msrb.mxu2 %v1872_v28  ;;  %v1920_v27 = vld [vmem:[%s4828_s16 + $0x340] sm:$0xff]  ;;  %v1889_v28 = vld [vmem:[%s4828_s16 + $0x248] sm:$0xff] }
 0x5d5   :  { %2107 = vmatpush.msrb.mxu0 %v1839_v32  ;;  %2130 = vmatpush.msrb.mxu1 %v1855_v33  ;;  %v1937_v32 = vld [vmem:[%s4828_s16 + $0x3c8] sm:$0xff]  ;;  %v1903_v33 = vld [vmem:[%s4828_s16 + $0x2b8] sm:$0xff] }
 0x5d6   :  { %2084 = vmatpush.msrb.mxu3 %v1823_v30  ;;  %2153 = vmatpush.msrb.mxu2 %v1871_v52  ;;  %v1919_v30 = vld [vmem:[%s4828_s16 + $0x338] sm:$0xff]  ;;  %v1888_v52 = vld [vmem:[%s4828_s16 + $0x240] sm:$0xff] }
 0x5d7   :  { %2108 = vmatpush.msrb.mxu0 %v1838_v34  ;;  %2131 = vmatpush.msrb.mxu1 %v1854_v36  ;;  %v1936_v34 = vld [vmem:[%s4828_s16 + $0x3c0] sm:$0xff]  ;;  %v1902_v36 = vld [vmem:[%s4828_s16 + $0x2b0] sm:$0xff] }
 0x5d8   :  { %2085 = vmatpush.msrb.mxu3 %v1822_v38  ;;  %2154 = vmatpush.msrb.mxu2 %v1870_v35  ;;  %v1918_v38 = vld [vmem:[%s4828_s16 + $0x330] sm:$0xff]  ;;  %v1887_v35 = vld [vmem:[%s4828_s16 + $0x238] sm:$0xff] }
 0x5d9   :  { %2109 = vmatpush.msrb.mxu0 %v1837_v25  ;;  %2132 = vmatpush.msrb.mxu1 %v1853_v39  ;;  %v1935_v25 = vld [vmem:[%s4828_s16 + $0x3b8] sm:$0xff]  ;;  %v1901_v39 = vld [vmem:[%s4828_s16 + $0x2a8] sm:$0xff] }
 0x5da   :  { %2086 = vmatpush.msrb.mxu3 %v1821_v40  ;;  %2155 = vmatpush.msrb.mxu2 %v1869_v44  ;;  %v1917_v40 = vld [vmem:[%s4828_s16 + $0x328] sm:$0xff]  ;;  %v1886_v44 = vld [vmem:[%s4828_s16 + $0x230] sm:$0xff] }
 0x5db   :  { %2110 = vmatpush.msrb.mxu0 %v1836_v11  ;;  %2133 = vmatpush.msrb.mxu1 %v1852_v45  ;;  %v1934_v11 = vld [vmem:[%s4828_s16 + $0x3b0] sm:$0xff]  ;;  %v1900_v45 = vld [vmem:[%s4828_s16 + $0x2a0] sm:$0xff] }
 0x5dc   :  { %2087 = vmatpush.msrb.mxu3 %v1820_v49  ;;  %2156 = vmatpush.msrb.mxu2 %v1868_v22  ;;  %v1916_v49 = vld [vmem:[%s4828_s16 + $0x320] sm:$0xff]  ;;  %v1885_v22 = vld [vmem:[%s4828_s16 + $0x228] sm:$0xff] }
 0x5dd   :  { %2111 = vmatpush.msrb.mxu0 %v1835_v51  ;;  %2134 = vmatpush.msrb.mxu1 %v1851_v37  ;;  %v1933_v51 = vld [vmem:[%s4828_s16 + $0x3a8] sm:$0xff]  ;;  %v1899_v37 = vld [vmem:[%s4828_s16 + $0x298] sm:$0xff] }
 0x5de   :  { %2088 = vmatpush.msrb.mxu3 %v1819_v54  ;;  %2157 = vmatpush.msrb.mxu2 %v1867_v55  ;;  %v1915_v54 = vld [vmem:[%s4828_s16 + $0x318] sm:$0xff]  ;;  %v1884_v55 = vld [vmem:[%s4828_s16 + $0x220] sm:$0xff] }
 0x5df   :  { %2112 = vmatpush.msrb.mxu0 %v1834_v29  ;;  %2135 = vmatpush.msrb.mxu1 %v1850_v21  ;;  %v1932_v29 = vld [vmem:[%s4828_s16 + $0x3a0] sm:$0xff]  ;;  %v1898_v21 = vld [vmem:[%s4828_s16 + $0x290] sm:$0xff] }
 0x5e0   :  { %2089 = vmatpush.msrb.mxu3 %v1818_v57  ;;  %2158 = vmatpush.msrb.mxu2 %v1866_v59  ;;  %v1914_v57 = vld [vmem:[%s4828_s16 + $0x310] sm:$0xff]  ;;  %v1883_v59 = vld [vmem:[%s4828_s16 + $0x218] sm:$0xff] }
 0x5e1   :  { %2113 = vmatpush.msrb.mxu0 %v1833_v46  ;;  %2136 = vmatpush.msrb.mxu1 %v1849_v53  ;;  %v1931_v46 = vld [vmem:[%s4828_s16 + $0x398] sm:$0xff]  ;;  %v1897_v53 = vld [vmem:[%s4828_s16 + $0x288] sm:$0xff] }
 0x5e2   :  { %2090 = vmatpush.msrb.mxu3 %v1817_v60  ;;  %2159 = vmatpush.msrb.mxu2 %v1865_v61  ;;  %v1913_v60 = vld [vmem:[%s4828_s16 + $0x308] sm:$0xff]  ;;  %v1882_v61 = vld [vmem:[%s4828_s16 + $0x210] sm:$0xff] }
 0x5e3   :  { %2114 = vmatpush.msrb.mxu0 %v1832_v42  ;;  %2137 = vmatpush.msrb.mxu1 %v1848_v47  ;;  %v1930_v42 = vld [vmem:[%s4828_s16 + $0x390] sm:$0xff]  ;;  %v1896_v47 = vld [vmem:[%s4828_s16 + $0x280] sm:$0xff] }
 0x5e4   :  { %2091 = vmatpush.msrb.mxu3 %v1816_v0  ;;  %2160 = vmatpush.msrb.mxu2 %v1864_v1  ;;  %v1929_v0 = vld [vmem:[%s4828_s16 + $0x388] sm:$0xff]  ;;  %v1880_v1 = vld [vmem:[%s4828_s16 + $0x200] sm:$0xff] }
 0x5e5   :  { %2191 = vmatpush.msra.mxu0 %v1911_v31  ;;  %2214 = vmatpush.msra.mxu1 %v1927_v50  ;;  %v1912_v31 = vld [vmem:[%s4828_s16 + $0x300] sm:$0xff]  ;;  %v1881_v50 = vld [vmem:[%s4828_s16 + $0x208] sm:$0xff] }
 0x5e6   :  { %2168 = vmatpush.msra.mxu3 %v1895_v41  ;;  %2237 = vmatpush.msra.mxu2 %v1943_v58 }
 0x5e7   :  { %2192 = vmatpush.msra.mxu0 %v1910_v23  ;;  %2215 = vmatpush.msra.mxu1 %v1926_v48  ;;  %v1928_v23 = vld [vmem:[%s4828_s16 + $0x380] sm:$0xff] }
 0x5e8   :  { %2169 = vmatpush.msra.mxu3 %v1894_v6  ;;  %2238 = vmatpush.msra.mxu2 %v1942_v7  ;;  %v4348_v48 = vld [vmem:[%s4827_s15] sm:$0xff] }
 0x5e9   :  { %2193 = vmatpush.msra.mxu0 %v1909_v4  ;;  %2216 = vmatpush.msra.mxu1 %v1925_v5  ;;  %v1379_v41 = vperm.slane %v4348_v48, 1  ;;  %v1380_v58 = vperm.slane %v4348_v48, 2 }
 0x5ea   :  { %2170 = vmatpush.msra.mxu3 %v1893_v63  ;;  %2239 = vmatpush.msra.mxu2 %v1941_v12  ;;  %v1378_v63 = vperm.slane %v4348_v48, 0 }
 0x5eb   :  { %2194 = vmatpush.msra.mxu0 %v1908_v8  ;;  %2217 = vmatpush.msra.mxu1 %v1924_v10  ;;  %v1975_v10 = vld [vmem:[%s4828_s16 + $0x4f8] sm:$0xff] }
 0x5ec   :  { %2171 = vmatpush.msra.mxu3 %v1892_v15  ;;  %2240 = vmatpush.msra.mxu2 %v1940_v16  ;;  %v1974_v15 = vld [vmem:[%s4828_s16 + $0x4f0] sm:$0xff] }
 0x5ed   :  { %2195 = vmatpush.msra.mxu0 %v1907_v13  ;;  %2218 = vmatpush.msra.mxu1 %v1923_v62  ;;  %v1991_v13 = vld [vmem:[%s4828_s16 + $0x578] sm:$0xff]  ;;  %v1381_v62 = vperm.slane %v4348_v48, 3 }
 0x5ee   :  { %2172 = vmatpush.msra.mxu3 %v1891_v9  ;;  %2241 = vmatpush.msra.mxu2 %v1939_v20  ;;  %v1973_v20 = vld [vmem:[%s4828_s16 + $0x4e8] sm:$0xff] }
 0x5ef   :  { %2196 = vmatpush.msra.mxu0 %v1906_v56  ;;  %2219 = vmatpush.msra.mxu1 %v1922_v19  ;;  %v1990_v56 = vld [vmem:[%s4828_s16 + $0x570] sm:$0xff] }
 0x5f0   :  { %2173 = vmatpush.msra.mxu3 %v1890_v24  ;;  %2242 = vmatpush.msra.mxu2 %v1938_v3  ;;  %v1989_v24 = vld [vmem:[%s4828_s16 + $0x568] sm:$0xff] }
 0x5f1   :  { %2197 = vmatpush.msra.mxu0 %v1905_v14  ;;  %2220 = vmatpush.msra.mxu1 %v1921_v18 }
 0x5f2   :  { %2174 = vmatpush.msra.mxu3 %v1889_v28  ;;  %2243 = vmatpush.msra.mxu2 %v1937_v32  ;;  %v1959_v28 = vld [vmem:[%s4828_s16 + $0x478] sm:$0xff] }
 0x5f3   :  { %2198 = vmatpush.msra.mxu0 %v1904_v26  ;;  %2221 = vmatpush.msra.mxu1 %v1920_v27 }
 0x5f4   :  { %2175 = vmatpush.msra.mxu3 %v1888_v52  ;;  %2244 = vmatpush.msra.mxu2 %v1936_v34  ;;  %v1988_v52 = vld [vmem:[%s4828_s16 + $0x560] sm:$0xff] }
 0x5f5   :  { %2199 = vmatpush.msra.mxu0 %v1903_v33  ;;  %2222 = vmatpush.msra.mxu1 %v1919_v30  ;;  %v1972_v30 = vld [vmem:[%s4828_s16 + $0x4e0] sm:$0xff] }
 0x5f6   :  { %2176 = vmatpush.msra.mxu3 %v1887_v35  ;;  %2245 = vmatpush.msra.mxu2 %v1935_v25  ;;  %v1958_v35 = vld [vmem:[%s4828_s16 + $0x470] sm:$0xff]  ;;  %v1971_v25 = vld [vmem:[%s4828_s16 + $0x4d8] sm:$0xff] }
 0x5f7   :  { %2200 = vmatpush.msra.mxu0 %v1902_v36  ;;  %2223 = vmatpush.msra.mxu1 %v1918_v38  ;;  %v2007_v36 = vld [vmem:[%s4828_s16 + $0x5f8] sm:$0xff] }
 0x5f8   :  { %2177 = vmatpush.msra.mxu3 %v1886_v44  ;;  %2246 = vmatpush.msra.mxu2 %v1934_v11  ;;  %v2006_v44 = vld [vmem:[%s4828_s16 + $0x5f0] sm:$0xff] }
 0x5f9   :  { %2201 = vmatpush.msra.mxu0 %v1901_v39  ;;  %2224 = vmatpush.msra.mxu1 %v1917_v40  ;;  %v1987_v39 = vld [vmem:[%s4828_s16 + $0x558] sm:$0xff]  ;;  %v1383_v40 = vperm.slane %v4348_v48, 5 }
 0x5fa   :  { %2178 = vmatpush.msra.mxu3 %v1885_v22  ;;  %2247 = vmatpush.msra.mxu2 %v1933_v51 }
 0x5fb   :  { %2202 = vmatpush.msra.mxu0 %v1900_v45  ;;  %2225 = vmatpush.msra.mxu1 %v1916_v49  ;;  %v1957_v45 = vld [vmem:[%s4828_s16 + $0x468] sm:$0xff]  ;;  %v1384_v49 = vperm.slane %v4348_v48, 6 }
 0x5fc   :  { %2179 = vmatpush.msra.mxu3 %v1884_v55  ;;  %2248 = vmatpush.msra.mxu2 %v1932_v29  ;;  %v2005_v29 = vld [vmem:[%s4828_s16 + $0x5e8] sm:$0xff] }
 0x5fd   :  { %2203 = vmatpush.msra.mxu0 %v1899_v37  ;;  %2226 = vmatpush.msra.mxu1 %v1915_v54  ;;  %v1970_v37 = vld [vmem:[%s4828_s16 + $0x4d0] sm:$0xff] }
 0x5fe   :  { %2180 = vmatpush.msra.mxu3 %v1883_v59  ;;  %2249 = vmatpush.msra.mxu2 %v1931_v46  ;;  %v1986_v54 = vld [vmem:[%s4828_s16 + $0x550] sm:$0xff] }
 0x5ff   :  { %2204 = vmatpush.msra.mxu0 %v1898_v21  ;;  %2227 = vmatpush.msra.mxu1 %v1914_v57  ;;  %v1956_v57 = vld [vmem:[%s4828_s16 + $0x460] sm:$0xff] }
 0x600   :  { %2181 = vmatpush.msra.mxu3 %v1882_v61  ;;  %2250 = vmatpush.msra.mxu2 %v1930_v42  ;;  %v1985_v61 = vld [vmem:[%s4828_s16 + $0x548] sm:$0xff] }
 0x601   :  { %2205 = vmatpush.msra.mxu0 %v1897_v53  ;;  %2228 = vmatpush.msra.mxu1 %v1913_v60  ;;  %v1969_v60 = vld [vmem:[%s4828_s16 + $0x4c8] sm:$0xff] }
 0x602   :  { %2182 = vmatpush.msra.mxu3 %v1881_v50  ;;  %2251 = vmatpush.msra.mxu2 %v1929_v0  ;;  %v1955_v50 = vld [vmem:[%s4828_s16 + $0x458] sm:$0xff]  ;;  %v1382_v0 = vperm.slane %v4348_v48, 4 }
 0x603   :  { %2206 = vmatpush.msra.mxu0 %v1896_v47  ;;  %2229 = vmatpush.msra.mxu1 %v1912_v31  ;;  %v2004_v31 = vld [vmem:[%s4828_s16 + $0x5e0] sm:$0xff] }
 0x604   :  { %2183 = vmatpush.msra.mxu3 %v1880_v1  ;;  %2252 = vmatpush.msra.mxu2 %v1928_v23  ;;  %v1968_v23 = vld [vmem:[%s4828_s16 + $0x4c0] sm:$0xff] }
 0x612   :  { %v1456_v4 = vpop.f32.mrf.mxu0 }
 0x613   :  { %v1457_v5 = vadd.f32 %v1456_v4, %v1379_v41  ;;  %v1479_v6 = vpop.f32.mrf.mxu1 }
 0x614   :  { %v1480_v7 = vadd.f32 %v1479_v6, %v1380_v58  ;;  %v1954_v6 = vld [vmem:[%s4828_s16 + $0x450] sm:$0xff] }
 0x615   :  { %v1785_v8 = vmax.f32 %v1457_v5, 0.0  ;;  %v2003_v5 = vld [vmem:[%s4828_s16 + $0x5d8] sm:$0xff] }
 0x616   :  { %v1786_v12 = vmax.f32 %v1480_v7, 0.0 }
 0x617   :  { %2115 = vmatmul.f32.vlgmr.msrb.gmra.mxu0 %v1785_v8  ;;  %v1967_v8 = vld [vmem:[%s4828_s16 + $0x4b8] sm:$0xff] }
 0x618   :  { %2138 = vmatmul.f32.vlgmr.msrb.gmra.mxu1 %v1786_v12  ;;  %2283 = vmatpush.msrb.mxu0 %v1975_v10  ;;  %v1433_v16 = vpop.f32.mrf.mxu3  ;;  %v1983_v10 = vld [vmem:[%s4828_s16 + $0x538] sm:$0xff] }
 0x619   :  { %2306 = vmatpush.msrb.mxu1 %v1991_v13  ;;  %v1434_v19 = vadd.f32 %v1433_v16, %v1378_v63  ;;  %v1502_v9 = vpop.f32.mrf.mxu2  ;;  %v2002_v13 = vld [vmem:[%s4828_s16 + $0x5d0] sm:$0xff] }
 0x61a   :  { %v1503_v14 = vadd.f32 %v1502_v9, %v1381_v62  ;;  %2284 = vmatpush.msrb.mxu0 %v1974_v15  ;;  %v1459_v18 = vpop.f32.mrf.mxu0  ;;  %v1953_v15 = vld [vmem:[%s4828_s16 + $0x448] sm:$0xff] }
 0x61b   :  { %v1784_v3 = vmax.f32 %v1434_v19, 0.0  ;;  %2307 = vmatpush.msrb.mxu1 %v1990_v56  ;;  %v1460_v26 = vadd.f32 %v1459_v18, %v1379_v41  ;;  %v1482_v27 = vpop.f32.mrf.mxu1  ;;  %v1984_v41 = vld [vmem:[%s4828_s16 + $0x540] sm:$0xff]  ;;  %v1966_v56 = vld [vmem:[%s4828_s16 + $0x4b0] sm:$0xff] }
 0x61c   :  { %v1787_v32 = vmax.f32 %v1503_v14, 0.0  ;;  %v1483_v33 = vadd.f32 %v1482_v27, %v1380_v58  ;;  %2285 = vmatpush.msrb.mxu0 %v1973_v20  ;;  %v1385_v58 = vperm.slane %v4348_v48, 7  ;;  %v1982_v19 = vld [vmem:[%s4828_s16 + $0x530] sm:$0xff]  ;;  %v2001_v20 = vld [vmem:[%s4828_s16 + $0x5c8] sm:$0xff]  ;;  %v1952_v18 = vld [vmem:[%s4828_s16 + $0x440] sm:$0xff] }
 0x61d   :  { %v1801_v34 = vmax.f32 %v1460_v26, 0.0  ;;  %2308 = vmatpush.msrb.mxu1 %v1989_v24  ;;  %2092 = vmatmul.f32.vlgmr.msrb.gmra.mxu3 %v1784_v3  ;;  %v1965_v26 = vld [vmem:[%s4828_s16 + $0x4a8] sm:$0xff] }
 0x61e   :  { %v1802_v38 = vmax.f32 %v1483_v33, 0.0  ;;  %2161 = vmatmul.f32.vlgmr.msrb.gmra.mxu2 %v1787_v32  ;;  %2260 = vmatpush.msrb.mxu3 %v1959_v28  ;;  %v1981_v27 = vld [vmem:[%s4828_s16 + $0x528] sm:$0xff]  ;;  %v2000_v32 = vld [vmem:[%s4828_s16 + $0x5c0] sm:$0xff]  ;;  %v1951_v33 = vld [vmem:[%s4828_s16 + $0x438] sm:$0xff] }
 0x61f   :  { %2286 = vmatpush.msrb.mxu0 %v1972_v30  ;;  %2309 = vmatpush.msrb.mxu1 %v1988_v52  ;;  %v1964_v52 = vld [vmem:[%s4828_s16 + $0x4a0] sm:$0xff] }
 0x620   :  { %2329 = vmatpush.msrb.mxu2 %v2007_v36  ;;  %2118 = vmatmul.f32.gmra.mxu0 %v1801_v34  ;;  %v1436_v11 = vpop.f32.mrf.mxu3  ;;  %v1980_v34 = vld [vmem:[%s4828_s16 + $0x520] sm:$0xff] }
 0x621   :  { %2141 = vmatmul.f32.gmra.mxu1 %v1802_v38  ;;  %2261 = vmatpush.msrb.mxu3 %v1958_v35  ;;  %v1437_v22 = vadd.f32 %v1436_v11, %v1378_v63  ;;  %v1505_v51 = vpop.f32.mrf.mxu2  ;;  %v1999_v35 = vld [vmem:[%s4828_s16 + $0x5b8] sm:$0xff] }
 0x622   :  { %2287 = vmatpush.msrb.mxu0 %v1971_v25  ;;  %2310 = vmatpush.msrb.mxu1 %v1987_v39  ;;  %v1506_v55 = vadd.f32 %v1505_v51, %v1381_v62  ;;  %v1548_v21 = vpop.f32.mrf.mxu0  ;;  %v4499_v39 = vld [vmem:[%s4827_s15 + $0x8] sm:$0xff]  ;;  %v1979_v11 = vld [vmem:[%s4828_s16 + $0x518] sm:$0xff]  ;;  %s2833_s15 = smov [#allocation4]  }
 0x623   :  { %2330 = vmatpush.msrb.mxu2 %v2006_v44  ;;  %v1800_v59 = vmax.f32 %v1437_v22, 0.0  ;;  %2262 = vmatpush.msrb.mxu3 %v1957_v45  ;;  %v1549_v46 = vadd.f32 %v1548_v21, %v1383_v40  ;;  %v1571_v53 = vpop.f32.mrf.mxu1  ;;  %v1963_v44 = vld [vmem:[%s4828_s16 + $0x498] sm:$0xff]  ;;  %v1949_v51 = vld [vmem:[%s4828_s16 + $0x428] sm:$0xff]  ;;  %s2508_s3 = sshll.u32 %s2833_s15, 4  ;;  %s2509_s3 = int_to_ptr.vmem [resolvable:$true] %s2508_s3 }
 0x624   :  { %v1803_v42 = vmax.f32 %v1506_v55, 0.0  ;;  %2288 = vmatpush.msrb.mxu0 %v1970_v37  ;;  %2311 = vmatpush.msrb.mxu1 %v1986_v54  ;;  %v1572_v47 = vadd.f32 %v1571_v53, %v1384_v49  ;;  %v1387_v37 = vperm.slane %v4499_v39, 1  ;;  %v1388_v54 = vperm.slane %v4499_v39, 2  ;;  %v1962_v55 = vld [vmem:[%s4828_s16 + $0x490] sm:$0xff]  ;;  %v1961_v53 = vld [vmem:[%s4828_s16 + $0x488] sm:$0xff] }
 0x625   :  { %2331 = vmatpush.msrb.mxu2 %v2005_v29  ;;  %2263 = vmatpush.msrb.mxu3 %v1956_v57  ;;  %v1789_v1 = vmax.f32 %v1549_v46, 0.0  ;;  %v1978_v29 = vld [vmem:[%s4828_s16 + $0x510] sm:$0xff]  ;;  %v1997_v57 = vld [vmem:[%s4828_s16 + $0x5a8] sm:$0xff] }
 0x626   :  { %2289 = vmatpush.msrb.mxu0 %v1969_v60  ;;  %2312 = vmatpush.msrb.mxu1 %v1985_v61  ;;  %v1790_v4 = vmax.f32 %v1572_v47, 0.0  ;;  %v1977_v60 = vld [vmem:[%s4828_s16 + $0x508] sm:$0xff] }
 0x627   :  { %2332 = vmatpush.msrb.mxu2 %v2004_v31  ;;  %2095 = vmatmul.f32.gmra.mxu3 %v1800_v59  ;;  %v1948_v59 = vld [vmem:[%s4828_s16 + $0x420] sm:$0xff] }
 0x628   :  { %2164 = vmatmul.f32.gmra.mxu2 %v1803_v42  ;;  %2264 = vmatpush.msrb.mxu3 %v1955_v50  ;;  %v1525_v7 = vpop.f32.mrf.mxu3  ;;  %v1996_v31 = vld [vmem:[%s4828_s16 + $0x5a0] sm:$0xff]  ;;  %v1947_v50 = vld [vmem:[%s4828_s16 + $0x418] sm:$0xff] }
 0x629   :  { %2290 = vmatpush.msrb.mxu0 %v1968_v23  ;;  %2313 = vmatpush.msrb.mxu1 %v1984_v41  ;;  %v1526_v63 = vadd.f32 %v1525_v7, %v1382_v0  ;;  %v1594_v12 = vpop.f32.mrf.mxu2  ;;  %v1995_v23 = vld [vmem:[%s4828_s16 + $0x598] sm:$0xff]  ;;  %v1946_v7 = vld [vmem:[%s4828_s16 + $0x410] sm:$0xff] }
 0x62a   :  { %2333 = vmatpush.msrb.mxu2 %v2003_v5  ;;  %2207 = vmatmul.f32.vlgmr.msra.gmra.mxu0 %v1789_v1  ;;  %v1595_v62 = vadd.f32 %v1594_v12, %v1385_v58  ;;  %v1551_v16 = vpop.f32.mrf.mxu0  ;;  %v1976_v1 = vld [vmem:[%s4828_s16 + $0x500] sm:$0xff]  ;;  %v2039_v41 = vld [vmem:[%s4828_s16 + $0x6f8] sm:$0xff]  ;;  %v1994_v12 = vld [vmem:[%s4828_s16 + $0x590] sm:$0xff] }
 0x62b   :  { %2230 = vmatmul.f32.vlgmr.msra.gmra.mxu1 %v1790_v4  ;;  %2265 = vmatpush.msrb.mxu3 %v1954_v6  ;;  %v1574_v9 = vpop.f32.mrf.mxu1  ;;  %v1552_v14 = vadd.f32 %v1551_v16, %v1383_v40  ;;  %v1788_v24 = vmax.f32 %v1526_v63, 0.0  ;;  %v1950_v40 = vld [vmem:[%s4828_s16 + $0x430] sm:$0xff]  ;;  %v2055_v6 = vld [vmem:[%s4828_s16 + $0x778] sm:$0xff]  ;;  %v1945_v16 = vld [vmem:[%s4828_s16 + $0x408] sm:$0xff] }
 0x62c   :  { %2291 = vmatpush.msrb.mxu0 %v1967_v8  ;;  %2314 = vmatpush.msrb.mxu1 %v1983_v10  ;;  %v1575_v3 = vadd.f32 %v1574_v9, %v1384_v49  ;;  %v1791_v28 = vmax.f32 %v1595_v62, 0.0  ;;  %v1998_v49 = vld [vmem:[%s4828_s16 + $0x5b0] sm:$0xff]  ;;  %v1389_v10 = vperm.slane %v4499_v39, 3  ;;  %v1993_v9 = vld [vmem:[%s4828_s16 + $0x588] sm:$0xff] }
 0x62d   :  { %2334 = vmatpush.msrb.mxu2 %v2002_v13  ;;  %2266 = vmatpush.msrb.mxu3 %v1953_v15  ;;  %v1805_v30 = vmax.f32 %v1552_v14, 0.0  ;;  %v2038_v13 = vld [vmem:[%s4828_s16 + $0x6f0] sm:$0xff]  ;;  %v2037_v14 = vld [vmem:[%s4828_s16 + $0x6e8] sm:$0xff] }
 0x62e   :  { %2292 = vmatpush.msrb.mxu0 %v1966_v56  ;;  %2315 = vmatpush.msrb.mxu1 %v1982_v19  ;;  %v1806_v38 = vmax.f32 %v1575_v3, 0.0  ;;  %v2054_v15 = vld [vmem:[%s4828_s16 + $0x770] sm:$0xff] }
 0x62f   :  { %2335 = vmatpush.msrb.mxu2 %v2001_v20  ;;  %2267 = vmatpush.msrb.mxu3 %v1952_v18  ;;  %v2053_v18 = vld [vmem:[%s4828_s16 + $0x768] sm:$0xff] }
 0x630   :  { %2293 = vmatpush.msrb.mxu0 %v1965_v26  ;;  %2316 = vmatpush.msrb.mxu1 %v1981_v27  ;;  %v1528_v36 = vpop.f32.mrf.mxu3  ;;  %v1992_v26 = vld [vmem:[%s4828_s16 + $0x580] sm:$0xff]  ;;  %v2023_v27 = vld [vmem:[%s4828_s16 + $0x678] sm:$0xff] }
 0x631   :  { %2336 = vmatpush.msrb.mxu2 %v2000_v32  ;;  %2184 = vmatmul.f32.vlgmr.msra.gmra.mxu3 %v1788_v24  ;;  %v1597_v25 = vpop.f32.mrf.mxu2  ;;  %v1529_v45 = vadd.f32 %v1528_v36, %v1382_v0  ;;  %v1960_v0 = vld [vmem:[%s4828_s16 + $0x480] sm:$0xff]  ;;  %v2022_v36 = vld [vmem:[%s4828_s16 + $0x670] sm:$0xff] }
 0x632   :  { %2253 = vmatmul.f32.vlgmr.msra.gmra.mxu2 %v1791_v28  ;;  %2268 = vmatpush.msrb.mxu3 %v1951_v33  ;;  %v1598_v22 = vadd.f32 %v1597_v25, %v1385_v58  ;;  %v1640_v48 = vpop.f32.mrf.mxu0  ;;  %v1386_v58 = vperm.slane %v4499_v39, 0  ;;  %v1944_v24 = vld [vmem:[%s4828_s16 + $0x400] sm:$0xff]  ;;  %v2051_v25 = vld [vmem:[%s4828_s16 + $0x758] sm:$0xff] }
 0x633   :  { %2294 = vmatpush.msrb.mxu0 %v1964_v52  ;;  %2317 = vmatpush.msrb.mxu1 %v1980_v34  ;;  %v1663_v21 = vpop.f32.mrf.mxu1  ;;  %v1804_v46 = vmax.f32 %v1529_v45, 0.0  ;;  %v1641_v42 = vadd.f32 %v1640_v48, %v1387_v37  ;;  %v2036_v33 = vld [vmem:[%s4828_s16 + $0x6e0] sm:$0xff]  ;;  %v2071_v34 = vld [vmem:[%s4828_s16 + $0x7f8] sm:$0xff]  ;;  %v2033_v48 = vld [vmem:[%s4828_s16 + $0x6c8] sm:$0xff] }
 0x634   :  { %2337 = vmatpush.msrb.mxu2 %v1999_v35  ;;  %2210 = vmatmul.f32.gmra.mxu0 %v1805_v30  ;;  %v1807_v61 = vmax.f32 %v1598_v22, 0.0  ;;  %v1664_v47 = vadd.f32 %v1663_v21, %v1388_v54  ;;  %v2052_v30 = vld [vmem:[%s4828_s16 + $0x760] sm:$0xff]  ;;  %v2035_v35 = vld [vmem:[%s4828_s16 + $0x6d8] sm:$0xff]  ;;  %v2049_v21 = vld [vmem:[%s4828_s16 + $0x748] sm:$0xff] }
 0x635   :  { %2233 = vmatmul.f32.gmra.mxu1 %v1806_v38  ;;  %2269 = vmatpush.msrb.mxu3 %v1950_v40  ;;  %v1793_v4 = vmax.f32 %v1641_v42, 0.0  ;;  %v2067_v42 = vld [vmem:[%s4828_s16 + $0x7d8] sm:$0xff] }
 0x636   :  { %2295 = vmatpush.msrb.mxu0 %v1963_v44  ;;  %2318 = vmatpush.msrb.mxu1 %v1979_v11  ;;  %v1794_v5 = vmax.f32 %v1664_v47, 0.0  ;;  %v2070_v11 = vld [vmem:[%s4828_s16 + $0x7f0] sm:$0xff] }
 0x637   :  { %2338 = vmatpush.msrb.mxu2 %v1998_v49  ;;  %2270 = vmatpush.msrb.mxu3 %v1949_v51  ;;  %v2021_v49 = vld [vmem:[%s4828_s16 + $0x668] sm:$0xff]  ;;  %v2034_v51 = vld [vmem:[%s4828_s16 + $0x6d0] sm:$0xff] }
 0x638   :  { %2296 = vmatpush.msrb.mxu0 %v1962_v55  ;;  %2319 = vmatpush.msrb.mxu1 %v1978_v29  ;;  %v1617_v8 = vpop.f32.mrf.mxu3  ;;  %v2069_v55 = vld [vmem:[%s4828_s16 + $0x7e8] sm:$0xff]  ;;  %v2020_v29 = vld [vmem:[%s4828_s16 + $0x660] sm:$0xff]  ;;  %v2018_v47 = vld [vmem:[%s4828_s16 + $0x650] sm:$0xff] }
 0x639   :  { %2339 = vmatpush.msrb.mxu2 %v1997_v57  ;;  %2271 = vmatpush.msrb.mxu3 %v1948_v59  ;;  %v1686_v63 = vpop.f32.mrf.mxu2  ;;  %v1618_v62 = vadd.f32 %v1617_v8, %v1386_v58  ;;  %v2068_v57 = vld [vmem:[%s4828_s16 + $0x7e0] sm:$0xff]  ;;  %v2019_v59 = vld [vmem:[%s4828_s16 + $0x658] sm:$0xff] }
 0x63a   :  { %2297 = vmatpush.msrb.mxu0 %v1961_v53  ;;  %2320 = vmatpush.msrb.mxu1 %v1977_v60  ;;  %v1643_v56 = vpop.f32.mrf.mxu0  ;;  %v1687_v19 = vadd.f32 %v1686_v63, %v1389_v10  ;;  %v2032_v53 = vld [vmem:[%s4828_s16 + $0x6c0] sm:$0xff]  ;;  %v2015_v8 = vld [vmem:[%s4828_s16 + $0x638] sm:$0xff] }
 0x63b   :  { %2340 = vmatpush.msrb.mxu2 %v1996_v31  ;;  %2187 = vmatmul.f32.gmra.mxu3 %v1804_v46  ;;  %v1666_v20 = vpop.f32.mrf.mxu1  ;;  %v1644_v3 = vadd.f32 %v1643_v56, %v1387_v37  ;;  %v1792_v28 = vmax.f32 %v1618_v62, 0.0  ;;  %v2050_v37 = vld [vmem:[%s4828_s16 + $0x750] sm:$0xff]  ;;  %v2048_v60 = vld [vmem:[%s4828_s16 + $0x740] sm:$0xff]  ;;  %v2031_v31 = vld [vmem:[%s4828_s16 + $0x6b8] sm:$0xff] }
 0x63c   :  { %2256 = vmatmul.f32.gmra.mxu2 %v1807_v61  ;;  %2272 = vmatpush.msrb.mxu3 %v1947_v50  ;;  %v1667_v32 = vadd.f32 %v1666_v20, %v1388_v54  ;;  %v1795_v52 = vmax.f32 %v1687_v19, 0.0  ;;  %v2047_v50 = vld [vmem:[%s4828_s16 + $0x738] sm:$0xff]  ;;  %v2044_v63 = vld [vmem:[%s4828_s16 + $0x720] sm:$0xff]  ;;  %v2014_v62 = vld [vmem:[%s4828_s16 + $0x630] sm:$0xff] }
 0x63d   :  { %2298 = vmatpush.msrb.mxu0 %v1960_v0  ;;  %2321 = vmatpush.msrb.mxu1 %v1976_v1  ;;  %v1809_v38 = vmax.f32 %v1644_v3, 0.0  ;;  %v2066_v0 = vld [vmem:[%s4828_s16 + $0x7d0] sm:$0xff]  ;;  %v2017_v1 = vld [vmem:[%s4828_s16 + $0x648] sm:$0xff]  ;;  %v2027_v56 = vld [vmem:[%s4828_s16 + $0x698] sm:$0xff] }
 0x63e   :  { %2341 = vmatpush.msrb.mxu2 %v1995_v23  ;;  %2273 = vmatpush.msrb.mxu3 %v1946_v7  ;;  %v1810_v44 = vmax.f32 %v1667_v32, 0.0  ;;  %v2030_v23 = vld [vmem:[%s4828_s16 + $0x6b0] sm:$0xff]  ;;  %v2064_v7 = vld [vmem:[%s4828_s16 + $0x7c0] sm:$0xff]  ;;  %v2043_v19 = vld [vmem:[%s4828_s16 + $0x718] sm:$0xff] }
 0x63f   :  { %2375 = vmatpush.msra.mxu0 %v2039_v41  ;;  %2398 = vmatpush.msra.mxu1 %v2055_v6  ;;  %v2046_v41 = vld [vmem:[%s4828_s16 + $0x730] sm:$0xff]  ;;  %v2045_v6 = vld [vmem:[%s4828_s16 + $0x728] sm:$0xff] }
 0x640   :  { %2299 = vmatmul.f32.vlgmr.msrb.gmra.mxu0 %v1793_v4  ;;  %2322 = vmatmul.f32.vlgmr.msrb.gmra.mxu1 %v1794_v5  ;;  %v1620_v40 = vpop.f32.mrf.mxu3  ;;  %v2016_v4 = vld [vmem:[%s4828_s16 + $0x640] sm:$0xff]  ;;  %v2029_v5 = vld [vmem:[%s4828_s16 + $0x6a8] sm:$0xff]  ;;  %v2062_v20 = vld [vmem:[%s4828_s16 + $0x7b0] sm:$0xff] }
 0x641   :  { %2342 = vmatpush.msrb.mxu2 %v1994_v12  ;;  %2376 = vmatpush.msra.mxu0 %v2038_v13  ;;  %v1689_v45 = vpop.f32.mrf.mxu2  ;;  %v1621_v22 = vadd.f32 %v1620_v40, %v1386_v58  ;;  %v2065_v58 = vld [vmem:[%s4828_s16 + $0x7c8] sm:$0xff]  ;;  %v2063_v13 = vld [vmem:[%s4828_s16 + $0x7b8] sm:$0xff]  ;;  %v1393_v40 = vperm.slane %v4499_v39, 7 }
 0x642   :  { %2399 = vmatpush.msra.mxu1 %v2054_v15  ;;  %2274 = vmatpush.msrb.mxu3 %v1945_v16  ;;  %v1690_v54 = vadd.f32 %v1689_v45, %v1389_v10  ;;  %v2028_v10 = vld [vmem:[%s4828_s16 + $0x6a0] sm:$0xff]  ;;  %v1732_v12 = vpop.f32.mrf.mxu0  ;;  %v1391_v15 = vperm.slane %v4499_v39, 5  ;;  %v2061_v3 = vld [vmem:[%s4828_s16 + $0x7a8] sm:$0xff]  ;;  %v2010_v45 = vld [vmem:[%s4828_s16 + $0x610] sm:$0xff] }
 0x643   :  { %2343 = vmatpush.msrb.mxu2 %v1993_v9  ;;  %2377 = vmatpush.msra.mxu0 %v2037_v14  ;;  %v1808_v46 = vmax.f32 %v1621_v22, 0.0  ;;  %v1755_v16 = vpop.f32.mrf.mxu1  ;;  %v1392_v9 = vperm.slane %v4499_v39, 6  ;;  %v2013_v14 = vld [vmem:[%s4828_s16 + $0x628] sm:$0xff] }
 0x644   :  { %2400 = vmatpush.msra.mxu1 %v2053_v18  ;;  %2275 = vmatpush.msrb.mxu3 %v1944_v24  ;;  %v1811_v61 = vmax.f32 %v1690_v54, 0.0  ;;  %v2026_v18 = vld [vmem:[%s4828_s16 + $0x690] sm:$0xff]  ;;  %v2041_v32 = vld [vmem:[%s4828_s16 + $0x708] sm:$0xff] }
 0x645   :  { %2344 = vmatpush.msrb.mxu2 %v1992_v26  ;;  %2378 = vmatpush.msra.mxu0 %v2036_v33  ;;  %v2042_v24 = vld [vmem:[%s4828_s16 + $0x710] sm:$0xff]  ;;  %v2012_v26 = vld [vmem:[%s4828_s16 + $0x620] sm:$0xff]  ;;  %v1756_v33 = vadd.f32 %v1755_v16, %v1392_v9  ;;  %v2009_v54 = vld [vmem:[%s4828_s16 + $0x608] sm:$0xff] }
 0x646   :  { %2352 = vmatpush.msra.mxu3 %v2023_v27  ;;  %2401 = vmatpush.msra.mxu1 %v2052_v30  ;;  %v1733_v27 = vadd.f32 %v1732_v12, %v1391_v15 }
 0x647   :  { %2421 = vmatpush.msra.mxu2 %v2071_v34  ;;  %2276 = vmatmul.f32.vlgmr.msrb.gmra.mxu3 %v1792_v28  ;;  %v2025_v28 = vld [vmem:[%s4828_s16 + $0x688] sm:$0xff]  ;;  %v2011_v34 = vld [vmem:[%s4828_s16 + $0x618] sm:$0xff] }
 0x648   :  { %2345 = vmatmul.f32.vlgmr.msrb.gmra.mxu2 %v1795_v52  ;;  %2353 = vmatpush.msra.mxu3 %v2022_v36  ;;  %v1709_v30 = vpop.f32.mrf.mxu3  ;;  %v2060_v52 = vld [vmem:[%s4828_s16 + $0x7a0] sm:$0xff]  ;;  %v1390_v36 = vperm.slane %v4499_v39, 4  ;;  %v2058_v39 = vld [vmem:[%s4828_s16 + $0x790] sm:$0xff] }
 0x649   :  { %2379 = vmatpush.msra.mxu0 %v2035_v35  ;;  %2402 = vmatpush.msra.mxu1 %v2051_v25  ;;  %v2024_v35 = vld [vmem:[%s4828_s16 + $0x680] sm:$0xff] }
 0x64a   :  { %2422 = vmatpush.msra.mxu2 %v2070_v11  ;;  %2302 = vmatmul.f32.gmra.mxu0 %v1809_v38  ;;  %v1778_v38 = vpop.f32.mrf.mxu2  ;;  %v2040_v25 = vld [vmem:[%s4828_s16 + $0x700] sm:$0xff]  ;;  %v1797_v11 = vmax.f32 %v1733_v27, 0.0  ;;  %v1735_v22 = vpop.f32.mrf.mxu0 }
 0x64b   :  { %2325 = vmatmul.f32.gmra.mxu1 %v1810_v44  ;;  %2354 = vmatpush.msra.mxu3 %v2021_v49  ;;  %v2059_v44 = vld [vmem:[%s4828_s16 + $0x798] sm:$0xff]  ;;  %v1798_v49 = vmax.f32 %v1756_v33, 0.0 }
 0x64c   :  { %2380 = vmatpush.msra.mxu0 %v2034_v51  ;;  %2403 = vmatpush.msra.mxu1 %v2050_v37  ;;  %v1710_v51 = vadd.f32 %v1709_v30, %v1390_v36  ;;  %v1758_v37 = vpop.f32.mrf.mxu1 }
 0x64d   :  { %2423 = vmatpush.msra.mxu2 %v2069_v55  ;;  %2355 = vmatpush.msra.mxu3 %v2020_v29  ;;  %v1779_v55 = vadd.f32 %v1778_v38, %v1393_v40  ;;  %v2057_v29 = vld [vmem:[%s4828_s16 + $0x788] sm:$0xff] }
 0x64e   :  { %2381 = vmatpush.msra.mxu0 %v2033_v48  ;;  %2404 = vmatpush.msra.mxu1 %v2049_v21  ;;  %v1736_v48 = vadd.f32 %v1735_v22, %v1391_v15  ;;  %v2008_v21 = vld [vmem:[%s4828_s16 + $0x600] sm:$0xff] }
 0x64f   :  { %2424 = vmatpush.msra.mxu2 %v2068_v57  ;;  %2356 = vmatpush.msra.mxu3 %v2019_v59  ;;  %v1759_v57 = vadd.f32 %v1758_v37, %v1392_v9  ;;  %v2056_v59 = vld [vmem:[%s4828_s16 + $0x780] sm:$0xff] }
 0x650   :  { %2382 = vmatpush.msra.mxu0 %v2032_v53  ;;  %2405 = vmatpush.msra.mxu1 %v2048_v60  ;;  %v1799_v53 = vmax.f32 %v1779_v55, 0.0  ;;  %v1712_v60 = vpop.f32.mrf.mxu3 }
 0x651   :  { %2425 = vmatpush.msra.mxu2 %v2067_v42  ;;  %2279 = vmatmul.f32.gmra.mxu3 %v1808_v46  ;;  %v1796_v46 = vmax.f32 %v1710_v51, 0.0 }
 0x652   :  { %2348 = vmatmul.f32.gmra.mxu2 %v1811_v61  ;;  %2357 = vmatpush.msra.mxu3 %v2018_v47  ;;  %v1813_v61 = vmax.f32 %v1736_v48, 0.0  ;;  %v1781_v42 = vpop.f32.mrf.mxu2  ;;  %v1814_v47 = vmax.f32 %v1759_v57, 0.0 }
 0x653   :  { %2383 = vmatpush.msra.mxu0 %v2031_v31  ;;  %2406 = vmatpush.msra.mxu1 %v2047_v50  ;;  %v1713_v31 = vadd.f32 %v1712_v60, %v1390_v36  ;;  %v1782_v50 = vadd.f32 %v1781_v42, %v1393_v40 }
 0x654   :  { %2426 = vmatpush.msra.mxu2 %v2066_v0  ;;  %2358 = vmatpush.msra.mxu3 %v2017_v1 }
 0x655   :  { %2384 = vmatpush.msra.mxu0 %v2030_v23  ;;  %2407 = vmatpush.msra.mxu1 %v2046_v41  ;;  %v1812_v0 = vmax.f32 %v1713_v31, 0.0  ;;  %v1815_v1 = vmax.f32 %v1782_v50, 0.0 }
 0x656   :  { %2427 = vmatpush.msra.mxu2 %v2065_v58  ;;  %2359 = vmatpush.msra.mxu3 %v2016_v4 }
 0x657   :  { %2385 = vmatpush.msra.mxu0 %v2029_v5  ;;  %2408 = vmatpush.msra.mxu1 %v2045_v6 }
 0x658   :  { %2428 = vmatpush.msra.mxu2 %v2064_v7  ;;  %2360 = vmatpush.msra.mxu3 %v2015_v8  ;;  %v2700_v8 = vld [vmem:[%s4853_s21] ss:$0 sm:$0xff] }
 0x659   :  { %2386 = vmatpush.msra.mxu0 %v2028_v10  ;;  %2409 = vmatpush.msra.mxu1 %v2044_v63 }
 0x65a   :  { %2429 = vmatpush.msra.mxu2 %v2063_v13  ;;  %2361 = vmatpush.msra.mxu3 %v2014_v62 }
 0x65b   :  { %2387 = vmatpush.msra.mxu0 %v2027_v56  ;;  %2410 = vmatpush.msra.mxu1 %v2043_v19 }
 0x65c   :  { %2430 = vmatpush.msra.mxu2 %v2062_v20  ;;  %2362 = vmatpush.msra.mxu3 %v2013_v14 }
 0x65d   :  { %2388 = vmatpush.msra.mxu0 %v2026_v18  ;;  %2411 = vmatpush.msra.mxu1 %v2042_v24 }
 0x65e   :  { %2431 = vmatpush.msra.mxu2 %v2061_v3  ;;  %2363 = vmatpush.msra.mxu3 %v2012_v26 }
 0x65f   :  { %2389 = vmatpush.msra.mxu0 %v2025_v28  ;;  %2412 = vmatpush.msra.mxu1 %v2041_v32 }
 0x660   :  { %2432 = vmatpush.msra.mxu2 %v2060_v52  ;;  %2364 = vmatpush.msra.mxu3 %v2011_v34 }
 0x661   :  { %2390 = vmatpush.msra.mxu0 %v2024_v35  ;;  %2413 = vmatpush.msra.mxu1 %v2040_v25 }
 0x662   :  { %2433 = vmatpush.msra.mxu2 %v2059_v44  ;;  %2391 = vmatmul.f32.vlgmr.msra.gmra.mxu0 %v1797_v11 }
 0x663   :  { %2414 = vmatmul.f32.vlgmr.msra.gmra.mxu1 %v1798_v49  ;;  %2365 = vmatpush.msra.mxu3 %v2010_v45 }
 0x664   :  { %2434 = vmatpush.msra.mxu2 %v2058_v39 }
 0x665   :  { %2366 = vmatpush.msra.mxu3 %v2009_v54 }
 0x666   :  { %2435 = vmatpush.msra.mxu2 %v2057_v29 }
 0x667   :  { %2367 = vmatpush.msra.mxu3 %v2008_v21 }
 0x668   :  { %2436 = vmatpush.msra.mxu2 %v2056_v59  ;;  %2368 = vmatmul.f32.vlgmr.msra.gmra.mxu3 %v1796_v46 }
 0x669   :  { %2437 = vmatmul.f32.vlgmr.msra.gmra.mxu2 %v1799_v53 }
 0x66a   :  { %2394 = vmatmul.f32.gmra.mxu0 %v1813_v61 }
 0x66b   :  { %2417 = vmatmul.f32.gmra.mxu1 %v1814_v47 }
 0x670   :  { %2371 = vmatmul.f32.gmra.mxu3 %v1812_v0 }
 0x671   :  { %2440 = vmatmul.f32.gmra.mxu2 %v1815_v1 }
 0x694   :  { %v2116_v23 = vpop.f32.mrf.mxu0 }
 0x695   :  { %v2139_v58 = vpop.f32.mrf.mxu1 }
 0x69d   :  { %v2119_v5 = vpop.f32.mrf.mxu0 }
 0x69e   :  { %v2142_v7 = vpop.f32.mrf.mxu1 }
 0x6a0   :  { %v2093_v41 = vpop.f32.mrf.mxu3 }
 0x6a1   :  { %v2162_v4 = vpop.f32.mrf.mxu2  ;;  %v2094_v63 = vadd.f32 %v2700_v8, %v2093_v41 }
 0x6a3   :  { %v2117_v62 = vadd.f32 %v2116_v23, %v2094_v63 }
 0x6a5   :  { %v2140_v56 = vadd.f32 %v2139_v58, %v2117_v62 }
 0x6a7   :  { %v2208_v12 = vpop.f32.mrf.mxu0  ;;  %v2163_v9 = vadd.f32 %v2162_v4, %v2140_v56 }
 0x6a8   :  { %v2231_v15 = vpop.f32.mrf.mxu1 }
 0x6aa   :  { %v2096_v6 = vpop.f32.mrf.mxu3 }
 0x6ab   :  { %v2165_v10 = vpop.f32.mrf.mxu2  ;;  %v2097_v19 = vadd.f32 %v2700_v8, %v2096_v6 }
 0x6ad   :  { %v2120_v20 = vadd.f32 %v2119_v5, %v2097_v19 }
 0x6af   :  { %v2143_v26 = vadd.f32 %v2142_v7, %v2120_v20 }
 0x6b1   :  { %v2211_v14 = vpop.f32.mrf.mxu0  ;;  %v2166_v32 = vadd.f32 %v2165_v10, %v2143_v26 }
 0x6b2   :  { %v2234_v3 = vpop.f32.mrf.mxu1 }
 0x6b4   :  { %v2185_v13 = vpop.f32.mrf.mxu3 }
 0x6b5   :  { %v2254_v16 = vpop.f32.mrf.mxu2  ;;  %v2186_v24 = vadd.f32 %v2185_v13, %v2163_v9 }
 0x6b7   :  { %v2209_v28 = vadd.f32 %v2208_v12, %v2186_v24 }
 0x6b9   :  { %v2232_v33 = vadd.f32 %v2231_v15, %v2209_v28 }
 0x6bb   :  { %v2255_v38 = vadd.f32 %v2254_v16, %v2232_v33 }
 0x6bd   :  { %v2300_v52 = vpop.f32.mrf.mxu0  ;;  %v2323_v36 = vpop.f32.mrf.mxu1 }
 0x6be   :  { %v2188_v18 = vpop.f32.mrf.mxu3 }
 0x6bf   :  { %v2257_v27 = vpop.f32.mrf.mxu2  ;;  %v2189_v30 = vadd.f32 %v2188_v18, %v2166_v32 }
 0x6c1   :  { %v2212_v35 = vadd.f32 %v2211_v14, %v2189_v30 }
 0x6c3   :  { %v2235_v44 = vadd.f32 %v2234_v3, %v2212_v35  ;;  %v2702_v35 = vld [vmem:[%s4855_s28] ss:$0 sm:$0xff] }
 0x6c5   :  { %v2258_v22 = vadd.f32 %v2257_v27, %v2235_v44 }
 0x6c7   :  { %v2303_v45 = vpop.f32.mrf.mxu0 }
 0x6c8   :  { %v2326_v39 = vpop.f32.mrf.mxu1 }
 0x6ca   :  { %v2277_v34 = vpop.f32.mrf.mxu3 }
 0x6cb   :  { %v2346_v25 = vpop.f32.mrf.mxu2  ;;  %v2278_v40 = vadd.f32 %v2277_v34, %v2255_v38  ;;  %v2701_v34 = vld [vmem:[%s4854_s12] ss:$0 sm:$0xff] }
 0x6cd   :  { %v2301_v11 = vadd.f32 %v2300_v52, %v2278_v40 }
 0x6cf   :  { %v2324_v51 = vadd.f32 %v2323_v36, %v2301_v11 }
 0x6d1   :  { %v2347_v55 = vadd.f32 %v2346_v25, %v2324_v51 }
 0x6d4   :  { %v2280_v49 = vpop.f32.mrf.mxu3 }
 0x6d5   :  { %v2281_v37 = vadd.f32 %v2280_v49, %v2258_v22  ;;  %v2349_v54 = vpop.f32.mrf.mxu2 }
 0x6d7   :  { %v2304_v29 = vadd.f32 %v2303_v45, %v2281_v37 }
 0x6d9   :  { %v2327_v46 = vadd.f32 %v2326_v39, %v2304_v29 }
 0x6db   :  { %v2350_v42 = vadd.f32 %v2349_v54, %v2327_v46 }
 0x6df   :  { %v2392_v48 = vpop.f32.mrf.mxu0 }
 0x6e0   :  { %v2415_v59 = vpop.f32.mrf.mxu1 }
 0x6e7   :  { %v2395_v1 = vpop.f32.mrf.mxu0 }
 0x6e8   :  { %v2418_v58 = vpop.f32.mrf.mxu1 }
 0x6eb   :  { %v2369_v21 = vpop.f32.mrf.mxu3 }
 0x6ec   :  { %v2370_v57 = vadd.f32 %v2369_v21, %v2347_v55  ;;  %v2438_v60 = vpop.f32.mrf.mxu2 }
 0x6ee   :  { %v2393_v53 = vadd.f32 %v2392_v48, %v2370_v57 }
 0x6f0   :  { %v2416_v61 = vadd.f32 %v2415_v59, %v2393_v53 }
 0x6f2   :  { %v2439_v47 = vadd.f32 %v2438_v60, %v2416_v61 }
 0x6f3   :  { %v2372_v31 = vpop.f32.mrf.mxu3 }
 0x6f4   :  { %v2373_v50 = vadd.f32 %v2372_v31, %v2350_v42  ;;  %v2444_v0 = vadd.f32 %v2439_v47, %v3700_v43  ;;  %v2441_v5 = vpop.f32.mrf.mxu2 }
 0x6f6   :  { %v2396_v23 = vadd.f32 %v2395_v1, %v2373_v50  ;;  %v2448_v41 = vsel %vm201_vm7, %v2444_v0, 0.0 }
 0x6f7   :  { %2449 = vadd.xlane.f32.xlu2 %v2448_v41 }
 0x6f8   :  { %v2419_v4 = vadd.f32 %v2418_v58, %v2396_v23 }
 0x6fa   :  { %v2442_v6 = vadd.f32 %v2441_v5, %v2419_v4 }
 0x6fc   :  { %v2445_v7 = vadd.f32 %v2442_v6, %v3747_v2 }
 0x6fe   :  { %v2451_v8 = vsel %vm201_vm7, %v2445_v7, 0.0 }
 0x6ff   :  { %2452 = vadd.xlane.f32.xlu0 %v2451_v8 }
 0x76a   :  { %v2450_v10 = vpop.xlane.xlu2 %2449 }
 0x76b   :  { %v2454_v63 = vmul.f32 %v2450_v10, %v3485_v17 }
 0x76d   :  { %v2456_v12 = vsub.f32 %v2444_v0, %v2454_v63 }
 0x76f   :  { %v2458_v13 = vmul.f32 %v2456_v12, %v2456_v12 }
 0x771   :  { %v2460_v43 = vsel %vm201_vm7, %v2458_v13, 0.0 }
 0x772   :  { %v2453_v62 = vpop.xlane.xlu0 %2452  ;;  %2461 = vadd.xlane.f32.xlu1 %v2460_v43 }
 0x773   :  { %v2455_v15 = vmul.f32 %v2453_v62, %v3485_v17 }
 0x775   :  { %v2457_v16 = vsub.f32 %v2445_v7, %v2455_v15 }
 0x777   :  { %v2459_v56 = vmul.f32 %v2457_v16, %v2457_v16 }
 0x779   :  { %v2463_v19 = vsel %vm201_vm7, %v2459_v56, 0.0 }
 0x77a   :  { %2464 = vadd.xlane.f32.xlu2 %v2463_v19 }
 0x7e5   :  { %v2462_v2 = vpop.xlane.xlu1 %2461 }
 0x7e6   :  { %v2466_v9 = vmul.f32 %v2462_v2, %v3485_v17 }
 0x7e8   :  { %v2468_v20 = vadd.f32 1e-05, %v2466_v9 }
 0x7ea   :  { %2773 = vrsqrt.f32 %v2468_v20  ;;  %vm2476_vm8 = vweird.f32 %v2468_v20 }
 0x7ed   :  { %v2465_v14 = vpop.xlane.xlu2 %2464 }
 0x7ee   :  { %v2467_v18 = vmul.f32 %v2465_v14, %v3485_v17 }
 0x7f0   :  { %v2774_v24 = vpop.eup %2773  ;;  %v2469_v3 = vadd.f32 1e-05, %v2467_v18 }
 0x7f1   :  { %v2471_v26 = vmul.f32 %v2774_v24, %v2468_v20  ;;  %vm2477_vm6 = vweird.f32 %v2774_v24 }
 0x7f2   :  { %2775 = vrsqrt.f32 %v2469_v3  ;;  %vm2478_vm9 = vmor %vm2476_vm8, %vm2477_vm6  ;;  %vm2486_vm11 = vweird.f32 %v2469_v3 }
 0x7f3   :  { %v2472_v27 = vmul.f32 %v2774_v24, %v2471_v26 }
 0x7f5   :  { %v2473_v28 = vmul.f32 0.5, %v2472_v27 }
 0x7f7   :  { %v2474_v32 = vsub.f32 1.5, %v2473_v28 }
 0x7f8   :  { %v2776_v33 = vpop.eup %2775 }
 0x7f9   :  { %v2475_v30 = vmul.f32 %v2774_v24, %v2474_v32  ;;  %v2481_v52 = vmul.f32 %v2776_v33, %v2469_v3  ;;  %vm2487_vm10 = vweird.f32 %v2776_v33 }
 0x7fa   :  { %vm2488_vm12 = vmor %vm2486_vm11, %vm2487_vm10 }
 0x7fb   :  { %v2479_v36 = vsel %vm2478_vm9, %v2774_v24, %v2475_v30  ;;  %v2482_v38 = vmul.f32 %v2776_v33, %v2481_v52 }
 0x7fc   :  { %v2490_v17 = vmul.f32 %v2479_v36, %v2456_v12 }
 0x7fd   :  { %v2483_v25 = vmul.f32 0.5, %v2482_v38 }
 0x7fe   :  { %v2495_v40 = vmul.f32 %v2701_v34, %v2490_v17 }
 0x7ff   :  { %v2484_v44 = vsub.f32 1.5, %v2483_v25 }
 0x800   :  { %v2500_v11 = vadd.f32 %v2702_v35, %v2495_v40 }
 0x801   :  { %v2485_v45 = vmul.f32 %v2776_v33, %v2484_v44 }
 0x802   :  { %2502 = vst.msk [vmem:[#allocation4] sm:$0xff] %vm201_vm7, %v2500_v11 }
 0x803   :  { %v2489_v49 = vsel %vm2488_vm12, %v2776_v33, %v2485_v45 }
 0x804   :  { %v2491_v22 = vmul.f32 %v2489_v49, %v2457_v16 }
 0x806   :  { %v2496_v39 = vmul.f32 %v2701_v34, %v2491_v22 }
 0x808   :  { %v2501_v51 = vadd.f32 %v2702_v35, %v2496_v39 }
 0x80a   :  { %2503 = vst.msk [vmem:[#allocation4 + $0x8] sm:$0xff] %vm201_vm7, %v2501_v51 }
 0x80b   :  { %2516 = dma.vmem_to_hbm [thread:$0]  %s2509_s3, 256, %s2511_s4, [#allocation5], %s2834_s30, %s2834_s30, %s2828_s17  }
 0x80c   :  { %2815 = dma.done.wait [#allocation5], 256  }
 0x80d   :  { %2816 = vsyncadd [#allocation5], 4294967040 }
 0x80e   :  { %2521 = vsyncpa [#allocation5], 1 }

</bundles_post_ra>
